<compile_context>
chip_gen: v7x
topology: tpu7x:2x2x1
jax: 0.10.0
libtpu: 0.0.40
codegen_flags: <defaults>
</compile_context>

<pallas_src>
import functools

import jax
import jax.numpy as jnp
import numpy as np
from jax.experimental import pallas as pl
from jax.experimental.pallas import tpu as pltpu

NEG_SLOPE = 0.01        # nn.LeakyReLU default
NEG_BIG = -1e9          # stands in for -inf in the pool (finite, so 0 * NEG_BIG == 0)
_CANVAS_OFF = 128       # lane-aligned offset where activation data is placed in the scratch


def _fused_kernel(x_ref, col_ref, w30_ref, b30_ref, w21_ref, b21_ref,
                  w22_ref, b22_ref, w23_ref, b23_ref, sel_ref, o_ref,
                  canvas_ref, *, W, H, WO, HO):
    """Whole SecondFeature forward for one batch element.

    x_ref:   (1, C, H*W)    input, rows flattened onto lanes (row stride W)
    col_ref: (1, HO*W)      int32 column-within-row index of every output-canvas lane
    w*_ref:  (K, C, K*C)    conv weights regrouped per kernel row: [dh, cout, dw*Cin + cin]
    b*_ref:  (C, 1)         conv bias as a column (broadcasts over lanes)
    sel_ref: (HO*W, PH*PW)  0/1 matrix decimating the dense pooled canvas (stride-2 pick)
    o_ref:   (1, C, PH*PW)  pooled output
    canvas_ref: (C, XV)     VMEM scratch holding the padded canvas of the current stage
    """
    F = _CANVAS_OFF
    L = HO * W
    col = col_ref[...]                 # (1, L) int32
    x = x_ref[0]                       # (C, H*W) float32

    def conv(inp, hv, wv, w_ref, b_ref, K, p):
        # inp: (Cin, hv*W) canvas with row stride W; columns >= wv are garbage.
        ho = hv + 2 * p - K + 1        # == HO for every conv of this module
        lo = ho * W
        base = F - p * W - p           # canvas index read by output position 0, tap (0, 0)
        # zero-padded canvas in VMEM scratch: [zeros | data @ F | zeros]
        canvas_ref[...] = jnp.zeros(canvas_ref.shape, canvas_ref.dtype)
        canvas_ref[:, F:F + hv * W] = inp
        acc = jnp.zeros((w_ref.shape[1], lo), jnp.float32)
        for dh in range(K):
            band = []
            for dw in range(K):
                start = base + dh * W + dw                # lane offset of tap (dh, dw)
                tap = canvas_ref[:, start:start + lo]     # (Cin, lo)
                read = col + (dw - p)                     # source column of each output lane
                ok = (read >= 0) & (read < wv)            # horizontal-padding / wrap mask
                band.append(jnp.where(ok, tap, 0.0))
            band = jnp.concatenate(band, axis=0)          # (K*Cin, lo)
            acc = acc + jnp.dot(w_ref[dh], band, preferred_element_type=jnp.float32)
        acc = acc + b_ref[...]                            # (Cout, 1) bias column
        return jnp.where(acc > 0, acc, NEG_SLOPE * acc)   # LeakyReLU

    x0 = conv(x, H, W, w30_ref, b30_ref, 5, 0)      # conv30: k5, p0
    h = conv(x, H, W, w21_ref, b21_ref, 7, 1)       # conv21: k7, p1
    h = conv(h, HO, WO, w22_ref, b22_ref, 5, 2)     # conv22: k5, p2
    h = conv(h, HO, WO, w23_ref, b23_ref, 3, 1)     # conv23: k3, p1
    s = x0 + h                                      # residual (both post-LeakyReLU)

    # 3x3 / stride-2 / pad-1 max pool: dense (stride-1) max over the 9 taps, then a 0/1
    # selection matmul picks the stride-2 grid (valid rows/cols only -> fully valid output).
    canvas_ref[...] = jnp.full(canvas_ref.shape, NEG_BIG, canvas_ref.dtype)
    canvas_ref[:, F:F + L] = s
    base = F - W - 1
    pooled = jnp.full((s.shape[0], L), NEG_BIG, jnp.float32)
    for dh in range(3):
        for dw in range(3):
            start = base + dh * W + dw
            tap = canvas_ref[:, start:start + L]
            read = col + (dw - 1)
            ok = (read >= 0) & (read < WO)
            pooled = jnp.maximum(pooled, jnp.where(ok, tap, NEG_BIG))
    o_ref[0] = jnp.dot(pooled, sel_ref[...], preferred_element_type=jnp.float32)


def _const_spec(shape):
    nd = len(shape)
    return pl.BlockSpec(shape, lambda n: (0,) * nd)


def second_feature_forward(x_nchw, params):
    N, C, H, W = x_nchw.shape
    HO, WO = H - 4, W - 4              # spatial size after conv30/conv21 (kept by conv22/23)
    PH = (HO + 2 - 3) // 2 + 1         # pooled height
    PW = (WO + 2 - 3) // 2 + 1         # pooled width
    L = HO * W                         # output-canvas length (row stride stays W)
    PP = PH * PW

    x_flat = x_nchw.reshape(N, C, H * W).astype(jnp.float32)

    # Column-within-row index of every output-canvas lane (for horizontal-pad masking).
    col = jnp.asarray((np.arange(L, dtype=np.int32) % W).reshape(1, L))

    # 0/1 decimation matrix: dense pooled canvas (stride 1, row stride W) -> (PH, PW) grid.
    sel_np = np.zeros((L, PP), np.float32)
    for i in range(PH):
        for j in range(PW):
            sel_np[2 * i * W + 2 * j, i * PW + j] = 1.0
    sel = jnp.asarray(sel_np)

    def prep_w(w):                     # OIHW -> (Kh, Cout, Kw*Cin), matching band ordering
        co, ci, kh, kw = w.shape
        return jnp.transpose(w, (2, 0, 3, 1)).reshape(kh, co, kw * ci).astype(jnp.float32)

    w30, b30 = prep_w(params['w30']), params['b30'].reshape(C, 1).astype(jnp.float32)
    w21, b21 = prep_w(params['w21']), params['b21'].reshape(C, 1).astype(jnp.float32)
    w22, b22 = prep_w(params['w22']), params['b22'].reshape(C, 1).astype(jnp.float32)
    w23, b23 = prep_w(params['w23']), params['b23'].reshape(C, 1).astype(jnp.float32)

    # Scratch canvas: data at lane offset _CANVAS_OFF + worst-case tap over-read, lane-rounded.
    xv_len = ((_CANVAS_OFF + H * W + 2 * W + 16 + 127) // 128) * 128

    kernel = functools.partial(_fused_kernel, W=W, H=H, WO=WO, HO=HO)

    out = pl.pallas_call(
        kernel,
        out_shape=jax.ShapeDtypeStruct((N, C, PP), jnp.float32),
        grid=(N,),
        in_specs=[
            pl.BlockSpec((1, C, H * W), lambda n: (n, 0, 0)),
            _const_spec(col.shape),
            _const_spec(w30.shape), _const_spec(b30.shape),
            _const_spec(w21.shape), _const_spec(b21.shape),
            _const_spec(w22.shape), _const_spec(b22.shape),
            _const_spec(w23.shape), _const_spec(b23.shape),
            _const_spec(sel.shape),
        ],
        out_specs=pl.BlockSpec((1, C, PP), lambda n: (n, 0, 0)),
        scratch_shapes=[pltpu.VMEM((C, xv_len), jnp.float32)],
        compiler_params=pltpu.CompilerParams(dimension_semantics=("parallel",)),
    )(x_flat, col, w30, b30, w21, b21, w22, b22, w23, b23, sel)

    return out.reshape(N, C, PH, PW)


# --------------------------- deterministic params ---------------------------

def init_params(key, c):
    def conv_init(k, cout, cin, ksz):
        k1, k2 = jax.random.split(k)
        fan_in = cin * ksz * ksz
        bound = 1.0 / (fan_in ** 0.5)
        w = jax.random.uniform(k1, (cout, cin, ksz, ksz), jnp.float32, -bound, bound)
        b = jax.random.uniform(k2, (cout,), jnp.float32, -bound, bound)
        return w, b

    ks = jax.random.split(key, 4)
    p = {}
    p['w21'], p['b21'] = conv_init(ks[0], c, c, 7)
    p['w22'], p['b22'] = conv_init(ks[1], c, c, 5)
    p['w23'], p['b23'] = conv_init(ks[2], c, c, 3)
    p['w30'], p['b30'] = conv_init(ks[3], c, c, 5)
    return p


# --------------------------- pure-JAX reference ------------------------------

def _ref_forward(x_nchw, p):
    def conv(x, w, b, pad):
        out = jax.lax.conv_general_dilated(
            x, w, (1, 1), [(pad, pad), (pad, pad)],
            dimension_numbers=('NCHW', 'OIHW', 'NCHW'))
        return out + b[None, :, None, None]

    lrelu = lambda v: jnp.where(v > 0, v, NEG_SLOPE * v)
    x0 = lrelu(conv(x_nchw, p['w30'], p['b30'], 0))
    h = lrelu(conv(x_nchw, p['w21'], p['b21'], 1))
    h = lrelu(conv(h, p['w22'], p['b22'], 2))
    h = lrelu(conv(h, p['w23'], p['b23'], 1))
    s = x0 + h
    return jax.lax.reduce_window(s, -jnp.inf, jax.lax.max,
                                 (1, 1, 3, 3), (1, 1, 2, 2),
                                 [(0, 0), (0, 0), (1, 1), (1, 1)])


if __name__ == "__main__":
    key = jax.random.PRNGKey(0)
    kx, kp = jax.random.split(key)
    N, C, H, W = 2, 8, 16, 16          # small shapes consistent with the module
    x = jax.random.normal(kx, (N, C, H, W), jnp.float32)
    params = init_params(kp, C)

    fwd = jax.jit(second_feature_forward)
    out = fwd(x, params)
    jax.block_until_ready(out)

    ref = _ref_forward(x, params)
    assert out.shape == ref.shape, (out.shape, ref.shape)
    err = float(jnp.max(jnp.abs(out - ref)))
    assert err < 1e-3, err
    print("KERNEL_OK")
</pallas_src>

<mosaic_0001>
module attributes {stable_mosaic.version = 11 : i64} {
  func.func @_fused_kernel(%arg0: i32, %arg1: memref<1x8x256xf32, #tpu.memory_space<vmem>>, %arg2: memref<1x192xi32, #tpu.memory_space<vmem>>, %arg3: memref<5x8x40xf32, #tpu.memory_space<vmem>>, %arg4: memref<8x1xf32, #tpu.memory_space<vmem>>, %arg5: memref<7x8x56xf32, #tpu.memory_space<vmem>>, %arg6: memref<8x1xf32, #tpu.memory_space<vmem>>, %arg7: memref<5x8x40xf32, #tpu.memory_space<vmem>>, %arg8: memref<8x1xf32, #tpu.memory_space<vmem>>, %arg9: memref<3x8x24xf32, #tpu.memory_space<vmem>>, %arg10: memref<8x1xf32, #tpu.memory_space<vmem>>, %arg11: memref<192x36xf32, #tpu.memory_space<vmem>>, %arg12: memref<1x8x36xf32, #tpu.memory_space<vmem>>, %arg13: memref<8x512xf32, #tpu.memory_space<vmem>>) attributes {dimension_semantics = [#tpu.dimension_semantics<parallel>], iteration_bounds = array<i64: 2>, scalar_prefetch = 0 : i64, scratch_operands = 1 : i64, tpu.core_type = #tpu.core_type<tc>, window_params = [{transform_indices = @transform_0, window_bounds = array<i64: 1, 8, 256>}, {pipeline_mode = #tpu.pipeline_mode<synchronous>, transform_indices = @transform_1, window_bounds = array<i64: 1, 192>}, {pipeline_mode = #tpu.pipeline_mode<synchronous>, transform_indices = @transform_2, window_bounds = array<i64: 5, 8, 40>}, {pipeline_mode = #tpu.pipeline_mode<synchronous>, transform_indices = @transform_3, window_bounds = array<i64: 8, 1>}, {pipeline_mode = #tpu.pipeline_mode<synchronous>, transform_indices = @transform_4, window_bounds = array<i64: 7, 8, 56>}, {pipeline_mode = #tpu.pipeline_mode<synchronous>, transform_indices = @transform_5, window_bounds = array<i64: 8, 1>}, {pipeline_mode = #tpu.pipeline_mode<synchronous>, transform_indices = @transform_6, window_bounds = array<i64: 5, 8, 40>}, {pipeline_mode = #tpu.pipeline_mode<synchronous>, transform_indices = @transform_7, window_bounds = array<i64: 8, 1>}, {pipeline_mode = #tpu.pipeline_mode<synchronous>, transform_indices = @transform_8, window_bounds = array<i64: 3, 8, 24>}, {pipeline_mode = #tpu.pipeline_mode<synchronous>, transform_indices = @transform_9, window_bounds = array<i64: 8, 1>}, {pipeline_mode = #tpu.pipeline_mode<synchronous>, transform_indices = @transform_10, window_bounds = array<i64: 192, 36>}, {transform_indices = @transform_11, window_bounds = array<i64: 1, 8, 36>}]} {
    %c0 = arith.constant 0 : index
    %c0_0 = arith.constant 0 : index
    %0 = vector.load %arg2[%c0, %c0_0] : memref<1x192xi32, #tpu.memory_space<vmem>>, vector<1x192xi32>
    %c0_1 = arith.constant 0 : index
    %c0_2 = arith.constant 0 : index
    %c0_3 = arith.constant 0 : index
    %1 = vector.load %arg1[%c0_1, %c0_2, %c0_3] : memref<1x8x256xf32, #tpu.memory_space<vmem>>, vector<1x8x256xf32>
    %2 = vector.shape_cast %1 : vector<1x8x256xf32> to vector<8x256xf32>
    %cst = arith.constant 0.000000e+00 : f32
    %3 = vector.broadcast %cst : f32 to vector<8x512xf32>
    %c0_4 = arith.constant 0 : index
    %c0_5 = arith.constant 0 : index
    %4 = vector.load %arg13[%c0_4, %c0_5] : memref<8x512xf32, #tpu.memory_space<vmem>>, vector<8x512xf32>
    tpu.vector_store %arg13[%c0_4, %c0_5], %3 {strides = array<i32>} : memref<8x512xf32, #tpu.memory_space<vmem>>, vector<8x512xf32>,
    %c0_6 = arith.constant 0 : index
    %c128 = arith.constant 128 : index
    %5 = vector.load %arg13[%c0_6, %c128] : memref<8x512xf32, #tpu.memory_space<vmem>>, vector<8x256xf32>
    tpu.vector_store %arg13[%c0_6, %c128], %2 {strides = array<i32>} : memref<8x512xf32, #tpu.memory_space<vmem>>, vector<8x256xf32>,
    %cst_7 = arith.constant 0.000000e+00 : f32
    %6 = vector.broadcast %cst_7 : f32 to vector<8x192xf32>
    %c0_8 = arith.constant 0 : index
    %c128_9 = arith.constant 128 : index
    %7 = vector.load %arg13[%c0_8, %c128_9] : memref<8x512xf32, #tpu.memory_space<vmem>>, vector<8x192xf32>
    %c0_i32 = arith.constant 0 : i32
    %8 = vector.broadcast %c0_i32 : i32 to vector<1x192xi32>
    %9 = arith.addi %0, %8 : vector<1x192xi32>
    %c0_i32_10 = arith.constant 0 : i32
    %10 = vector.broadcast %c0_i32_10 : i32 to vector<1x192xi32>
    %11 = arith.cmpi sge, %9, %10 : vector<1x192xi32>
    %c16_i32 = arith.constant 16 : i32
    %12 = vector.broadcast %c16_i32 : i32 to vector<1x192xi32>
    %13 = arith.cmpi slt, %9, %12 : vector<1x192xi32>
    %14 = arith.andi %11, %13 : vector<1x192xi1>
    %cst_11 = arith.constant 0.000000e+00 : f32
    %15 = vector.shape_cast %14 : vector<1x192xi1> to vector<1x192xi1>
    %16 = vector.broadcast %15 : vector<1x192xi1> to vector<8x192xi1>
    %17 = vector.broadcast %cst_11 : f32 to vector<8x192xf32>
    %18 = arith.select %16, %7, %17 : vector<8x192xi1>, vector<8x192xf32>
    %c0_12 = arith.constant 0 : index
    %c129 = arith.constant 129 : index
    %19 = vector.load %arg13[%c0_12, %c129] : memref<8x512xf32, #tpu.memory_space<vmem>>, vector<8x192xf32>
    %c1_i32 = arith.constant 1 : i32
    %20 = vector.broadcast %c1_i32 : i32 to vector<1x192xi32>
    %21 = arith.addi %0, %20 : vector<1x192xi32>
    %c0_i32_13 = arith.constant 0 : i32
    %22 = vector.broadcast %c0_i32_13 : i32 to vector<1x192xi32>
    %23 = arith.cmpi sge, %21, %22 : vector<1x192xi32>
    %c16_i32_14 = arith.constant 16 : i32
    %24 = vector.broadcast %c16_i32_14 : i32 to vector<1x192xi32>
    %25 = arith.cmpi slt, %21, %24 : vector<1x192xi32>
    %26 = arith.andi %23, %25 : vector<1x192xi1>
    %cst_15 = arith.constant 0.000000e+00 : f32
    %27 = vector.shape_cast %26 : vector<1x192xi1> to vector<1x192xi1>
    %28 = vector.broadcast %27 : vector<1x192xi1> to vector<8x192xi1>
    %29 = vector.broadcast %cst_15 : f32 to vector<8x192xf32>
    %30 = arith.select %28, %19, %29 : vector<8x192xi1>, vector<8x192xf32>
    %c0_16 = arith.constant 0 : index
    %c130 = arith.constant 130 : index
    %31 = vector.load %arg13[%c0_16, %c130] : memref<8x512xf32, #tpu.memory_space<vmem>>, vector<8x192xf32>
    %c2_i32 = arith.constant 2 : i32
    %32 = vector.broadcast %c2_i32 : i32 to vector<1x192xi32>
    %33 = arith.addi %0, %32 : vector<1x192xi32>
    %c0_i32_17 = arith.constant 0 : i32
    %34 = vector.broadcast %c0_i32_17 : i32 to vector<1x192xi32>
    %35 = arith.cmpi sge, %33, %34 : vector<1x192xi32>
    %c16_i32_18 = arith.constant 16 : i32
    %36 = vector.broadcast %c16_i32_18 : i32 to vector<1x192xi32>
    %37 = arith.cmpi slt, %33, %36 : vector<1x192xi32>
    %38 = arith.andi %35, %37 : vector<1x192xi1>
    %cst_19 = arith.constant 0.000000e+00 : f32
    %39 = vector.shape_cast %38 : vector<1x192xi1> to vector<1x192xi1>
    %40 = vector.broadcast %39 : vector<1x192xi1> to vector<8x192xi1>
    %41 = vector.broadcast %cst_19 : f32 to vector<8x192xf32>
    %42 = arith.select %40, %31, %41 : vector<8x192xi1>, vector<8x192xf32>
    %c0_20 = arith.constant 0 : index
    %c131 = arith.constant 131 : index
    %43 = vector.load %arg13[%c0_20, %c131] : memref<8x512xf32, #tpu.memory_space<vmem>>, vector<8x192xf32>
    %c3_i32 = arith.constant 3 : i32
    %44 = vector.broadcast %c3_i32 : i32 to vector<1x192xi32>
    %45 = arith.addi %0, %44 : vector<1x192xi32>
    %c0_i32_21 = arith.constant 0 : i32
    %46 = vector.broadcast %c0_i32_21 : i32 to vector<1x192xi32>
    %47 = arith.cmpi sge, %45, %46 : vector<1x192xi32>
    %c16_i32_22 = arith.constant 16 : i32
    %48 = vector.broadcast %c16_i32_22 : i32 to vector<1x192xi32>
    %49 = arith.cmpi slt, %45, %48 : vector<1x192xi32>
    %50 = arith.andi %47, %49 : vector<1x192xi1>
    %cst_23 = arith.constant 0.000000e+00 : f32
    %51 = vector.shape_cast %50 : vector<1x192xi1> to vector<1x192xi1>
    %52 = vector.broadcast %51 : vector<1x192xi1> to vector<8x192xi1>
    %53 = vector.broadcast %cst_23 : f32 to vector<8x192xf32>
    %54 = arith.select %52, %43, %53 : vector<8x192xi1>, vector<8x192xf32>
    %c0_24 = arith.constant 0 : index
    %c132 = arith.constant 132 : index
    %55 = vector.load %arg13[%c0_24, %c132] : memref<8x512xf32, #tpu.memory_space<vmem>>, vector<8x192xf32>
    %c4_i32 = arith.constant 4 : i32
    %56 = vector.broadcast %c4_i32 : i32 to vector<1x192xi32>
    %57 = arith.addi %0, %56 : vector<1x192xi32>
    %c0_i32_25 = arith.constant 0 : i32
    %58 = vector.broadcast %c0_i32_25 : i32 to vector<1x192xi32>
    %59 = arith.cmpi sge, %57, %58 : vector<1x192xi32>
    %c16_i32_26 = arith.constant 16 : i32
    %60 = vector.broadcast %c16_i32_26 : i32 to vector<1x192xi32>
    %61 = arith.cmpi slt, %57, %60 : vector<1x192xi32>
    %62 = arith.andi %59, %61 : vector<1x192xi1>
    %cst_27 = arith.constant 0.000000e+00 : f32
    %63 = vector.shape_cast %62 : vector<1x192xi1> to vector<1x192xi1>
    %64 = vector.broadcast %63 : vector<1x192xi1> to vector<8x192xi1>
    %65 = vector.broadcast %cst_27 : f32 to vector<8x192xf32>
    %66 = arith.select %64, %55, %65 : vector<8x192xi1>, vector<8x192xf32>
    %67 = tpu.concatenate %18, %30, %42, %54, %66 in 0 : vector<8x192xf32>, vector<8x192xf32>, vector<8x192xf32>, vector<8x192xf32>, vector<8x192xf32> -> vector<40x192xf32>
    %c0_28 = arith.constant 0 : index
    %c0_29 = arith.constant 0 : index
    %c0_30 = arith.constant 0 : index
    %68 = vector.load %arg3[%c0_28, %c0_29, %c0_30] : memref<5x8x40xf32, #tpu.memory_space<vmem>>, vector<1x8x40xf32>
    %69 = vector.shape_cast %68 : vector<1x8x40xf32> to vector<8x40xf32>
    %cst_31 = arith.constant dense<0.000000e+00> : vector<8x192xf32>
    %70 = tpu.matmul %69, %67, %cst_31 {dimension_numbers = #tpu.dot_dimension_numbers<[1], [0], [0], [1], [0, 0, 1, 1], [], []>} : vector<8x40xf32>, vector<40x192xf32>, vector<8x192xf32> -> vector<8x192xf32>
    %71 = arith.addf %6, %70 : vector<8x192xf32>
    %c0_32 = arith.constant 0 : index
    %c144 = arith.constant 144 : index
    %72 = vector.load %arg13[%c0_32, %c144] : memref<8x512xf32, #tpu.memory_space<vmem>>, vector<8x192xf32>
    %c0_i32_33 = arith.constant 0 : i32
    %73 = vector.broadcast %c0_i32_33 : i32 to vector<1x192xi32>
    %74 = arith.addi %0, %73 : vector<1x192xi32>
    %c0_i32_34 = arith.constant 0 : i32
    %75 = vector.broadcast %c0_i32_34 : i32 to vector<1x192xi32>
    %76 = arith.cmpi sge, %74, %75 : vector<1x192xi32>
    %c16_i32_35 = arith.constant 16 : i32
    %77 = vector.broadcast %c16_i32_35 : i32 to vector<1x192xi32>
    %78 = arith.cmpi slt, %74, %77 : vector<1x192xi32>
    %79 = arith.andi %76, %78 : vector<1x192xi1>
    %cst_36 = arith.constant 0.000000e+00 : f32
    %80 = vector.shape_cast %79 : vector<1x192xi1> to vector<1x192xi1>
    %81 = vector.broadcast %80 : vector<1x192xi1> to vector<8x192xi1>
    %82 = vector.broadcast %cst_36 : f32 to vector<8x192xf32>
    %83 = arith.select %81, %72, %82 : vector<8x192xi1>, vector<8x192xf32>
    %c0_37 = arith.constant 0 : index
    %c145 = arith.constant 145 : index
    %84 = vector.load %arg13[%c0_37, %c145] : memref<8x512xf32, #tpu.memory_space<vmem>>, vector<8x192xf32>
    %c1_i32_38 = arith.constant 1 : i32
    %85 = vector.broadcast %c1_i32_38 : i32 to vector<1x192xi32>
    %86 = arith.addi %0, %85 : vector<1x192xi32>
    %c0_i32_39 = arith.constant 0 : i32
    %87 = vector.broadcast %c0_i32_39 : i32 to vector<1x192xi32>
    %88 = arith.cmpi sge, %86, %87 : vector<1x192xi32>
    %c16_i32_40 = arith.constant 16 : i32
    %89 = vector.broadcast %c16_i32_40 : i32 to vector<1x192xi32>
    %90 = arith.cmpi slt, %86, %89 : vector<1x192xi32>
    %91 = arith.andi %88, %90 : vector<1x192xi1>
    %cst_41 = arith.constant 0.000000e+00 : f32
    %92 = vector.shape_cast %91 : vector<1x192xi1> to vector<1x192xi1>
    %93 = vector.broadcast %92 : vector<1x192xi1> to vector<8x192xi1>
    %94 = vector.broadcast %cst_41 : f32 to vector<8x192xf32>
    %95 = arith.select %93, %84, %94 : vector<8x192xi1>, vector<8x192xf32>
    %c0_42 = arith.constant 0 : index
    %c146 = arith.constant 146 : index
    %96 = vector.load %arg13[%c0_42, %c146] : memref<8x512xf32, #tpu.memory_space<vmem>>, vector<8x192xf32>
    %c2_i32_43 = arith.constant 2 : i32
    %97 = vector.broadcast %c2_i32_43 : i32 to vector<1x192xi32>
    %98 = arith.addi %0, %97 : vector<1x192xi32>
    %c0_i32_44 = arith.constant 0 : i32
    %99 = vector.broadcast %c0_i32_44 : i32 to vector<1x192xi32>
    %100 = arith.cmpi sge, %98, %99 : vector<1x192xi32>
    %c16_i32_45 = arith.constant 16 : i32
    %101 = vector.broadcast %c16_i32_45 : i32 to vector<1x192xi32>
    %102 = arith.cmpi slt, %98, %101 : vector<1x192xi32>
    %103 = arith.andi %100, %102 : vector<1x192xi1>
    %cst_46 = arith.constant 0.000000e+00 : f32
    %104 = vector.shape_cast %103 : vector<1x192xi1> to vector<1x192xi1>
    %105 = vector.broadcast %104 : vector<1x192xi1> to vector<8x192xi1>
    %106 = vector.broadcast %cst_46 : f32 to vector<8x192xf32>
    %107 = arith.select %105, %96, %106 : vector<8x192xi1>, vector<8x192xf32>
    %c0_47 = arith.constant 0 : index
    %c147 = arith.constant 147 : index
    %108 = vector.load %arg13[%c0_47, %c147] : memref<8x512xf32, #tpu.memory_space<vmem>>, vector<8x192xf32>
    %c3_i32_48 = arith.constant 3 : i32
    %109 = vector.broadcast %c3_i32_48 : i32 to vector<1x192xi32>
    %110 = arith.addi %0, %109 : vector<1x192xi32>
    %c0_i32_49 = arith.constant 0 : i32
    %111 = vector.broadcast %c0_i32_49 : i32 to vector<1x192xi32>
    %112 = arith.cmpi sge, %110, %111 : vector<1x192xi32>
    %c16_i32_50 = arith.constant 16 : i32
    %113 = vector.broadcast %c16_i32_50 : i32 to vector<1x192xi32>
    %114 = arith.cmpi slt, %110, %113 : vector<1x192xi32>
    %115 = arith.andi %112, %114 : vector<1x192xi1>
    %cst_51 = arith.constant 0.000000e+00 : f32
    %116 = vector.shape_cast %115 : vector<1x192xi1> to vector<1x192xi1>
    %117 = vector.broadcast %116 : vector<1x192xi1> to vector<8x192xi1>
    %118 = vector.broadcast %cst_51 : f32 to vector<8x192xf32>
    %119 = arith.select %117, %108, %118 : vector<8x192xi1>, vector<8x192xf32>
    %c0_52 = arith.constant 0 : index
    %c148 = arith.constant 148 : index
    %120 = vector.load %arg13[%c0_52, %c148] : memref<8x512xf32, #tpu.memory_space<vmem>>, vector<8x192xf32>
    %c4_i32_53 = arith.constant 4 : i32
    %121 = vector.broadcast %c4_i32_53 : i32 to vector<1x192xi32>
    %122 = arith.addi %0, %121 : vector<1x192xi32>
    %c0_i32_54 = arith.constant 0 : i32
    %123 = vector.broadcast %c0_i32_54 : i32 to vector<1x192xi32>
    %124 = arith.cmpi sge, %122, %123 : vector<1x192xi32>
    %c16_i32_55 = arith.constant 16 : i32
    %125 = vector.broadcast %c16_i32_55 : i32 to vector<1x192xi32>
    %126 = arith.cmpi slt, %122, %125 : vector<1x192xi32>
    %127 = arith.andi %124, %126 : vector<1x192xi1>
    %cst_56 = arith.constant 0.000000e+00 : f32
    %128 = vector.shape_cast %127 : vector<1x192xi1> to vector<1x192xi1>
    %129 = vector.broadcast %128 : vector<1x192xi1> to vector<8x192xi1>
    %130 = vector.broadcast %cst_56 : f32 to vector<8x192xf32>
    %131 = arith.select %129, %120, %130 : vector<8x192xi1>, vector<8x192xf32>
    %132 = tpu.concatenate %83, %95, %107, %119, %131 in 0 : vector<8x192xf32>, vector<8x192xf32>, vector<8x192xf32>, vector<8x192xf32>, vector<8x192xf32> -> vector<40x192xf32>
    %c1 = arith.constant 1 : index
    %c0_57 = arith.constant 0 : index
    %c0_58 = arith.constant 0 : index
    %133 = vector.load %arg3[%c1, %c0_57, %c0_58] : memref<5x8x40xf32, #tpu.memory_space<vmem>>, vector<1x8x40xf32>
    %134 = vector.shape_cast %133 : vector<1x8x40xf32> to vector<8x40xf32>
    %cst_59 = arith.constant dense<0.000000e+00> : vector<8x192xf32>
    %135 = tpu.matmul %134, %132, %cst_59 {dimension_numbers = #tpu.dot_dimension_numbers<[1], [0], [0], [1], [0, 0, 1, 1], [], []>} : vector<8x40xf32>, vector<40x192xf32>, vector<8x192xf32> -> vector<8x192xf32>
    %136 = arith.addf %71, %135 : vector<8x192xf32>
    %c0_60 = arith.constant 0 : index
    %c160 = arith.constant 160 : index
    %137 = vector.load %arg13[%c0_60, %c160] : memref<8x512xf32, #tpu.memory_space<vmem>>, vector<8x192xf32>
    %c0_i32_61 = arith.constant 0 : i32
    %138 = vector.broadcast %c0_i32_61 : i32 to vector<1x192xi32>
    %139 = arith.addi %0, %138 : vector<1x192xi32>
    %c0_i32_62 = arith.constant 0 : i32
    %140 = vector.broadcast %c0_i32_62 : i32 to vector<1x192xi32>
    %141 = arith.cmpi sge, %139, %140 : vector<1x192xi32>
    %c16_i32_63 = arith.constant 16 : i32
    %142 = vector.broadcast %c16_i32_63 : i32 to vector<1x192xi32>
    %143 = arith.cmpi slt, %139, %142 : vector<1x192xi32>
    %144 = arith.andi %141, %143 : vector<1x192xi1>
    %cst_64 = arith.constant 0.000000e+00 : f32
    %145 = vector.shape_cast %144 : vector<1x192xi1> to vector<1x192xi1>
    %146 = vector.broadcast %145 : vector<1x192xi1> to vector<8x192xi1>
    %147 = vector.broadcast %cst_64 : f32 to vector<8x192xf32>
    %148 = arith.select %146, %137, %147 : vector<8x192xi1>, vector<8x192xf32>
    %c0_65 = arith.constant 0 : index
    %c161 = arith.constant 161 : index
    %149 = vector.load %arg13[%c0_65, %c161] : memref<8x512xf32, #tpu.memory_space<vmem>>, vector<8x192xf32>
    %c1_i32_66 = arith.constant 1 : i32
    %150 = vector.broadcast %c1_i32_66 : i32 to vector<1x192xi32>
    %151 = arith.addi %0, %150 : vector<1x192xi32>
    %c0_i32_67 = arith.constant 0 : i32
    %152 = vector.broadcast %c0_i32_67 : i32 to vector<1x192xi32>
    %153 = arith.cmpi sge, %151, %152 : vector<1x192xi32>
    %c16_i32_68 = arith.constant 16 : i32
    %154 = vector.broadcast %c16_i32_68 : i32 to vector<1x192xi32>
    %155 = arith.cmpi slt, %151, %154 : vector<1x192xi32>
    %156 = arith.andi %153, %155 : vector<1x192xi1>
    %cst_69 = arith.constant 0.000000e+00 : f32
    %157 = vector.shape_cast %156 : vector<1x192xi1> to vector<1x192xi1>
    %158 = vector.broadcast %157 : vector<1x192xi1> to vector<8x192xi1>
    %159 = vector.broadcast %cst_69 : f32 to vector<8x192xf32>
    %160 = arith.select %158, %149, %159 : vector<8x192xi1>, vector<8x192xf32>
    %c0_70 = arith.constant 0 : index
    %c162 = arith.constant 162 : index
    %161 = vector.load %arg13[%c0_70, %c162] : memref<8x512xf32, #tpu.memory_space<vmem>>, vector<8x192xf32>
    %c2_i32_71 = arith.constant 2 : i32
    %162 = vector.broadcast %c2_i32_71 : i32 to vector<1x192xi32>
    %163 = arith.addi %0, %162 : vector<1x192xi32>
    %c0_i32_72 = arith.constant 0 : i32
    %164 = vector.broadcast %c0_i32_72 : i32 to vector<1x192xi32>
    %165 = arith.cmpi sge, %163, %164 : vector<1x192xi32>
    %c16_i32_73 = arith.constant 16 : i32
    %166 = vector.broadcast %c16_i32_73 : i32 to vector<1x192xi32>
    %167 = arith.cmpi slt, %163, %166 : vector<1x192xi32>
    %168 = arith.andi %165, %167 : vector<1x192xi1>
    %cst_74 = arith.constant 0.000000e+00 : f32
    %169 = vector.shape_cast %168 : vector<1x192xi1> to vector<1x192xi1>
    %170 = vector.broadcast %169 : vector<1x192xi1> to vector<8x192xi1>
    %171 = vector.broadcast %cst_74 : f32 to vector<8x192xf32>
    %172 = arith.select %170, %161, %171 : vector<8x192xi1>, vector<8x192xf32>
    %c0_75 = arith.constant 0 : index
    %c163 = arith.constant 163 : index
    %173 = vector.load %arg13[%c0_75, %c163] : memref<8x512xf32, #tpu.memory_space<vmem>>, vector<8x192xf32>
    %c3_i32_76 = arith.constant 3 : i32
    %174 = vector.broadcast %c3_i32_76 : i32 to vector<1x192xi32>
    %175 = arith.addi %0, %174 : vector<1x192xi32>
    %c0_i32_77 = arith.constant 0 : i32
    %176 = vector.broadcast %c0_i32_77 : i32 to vector<1x192xi32>
    %177 = arith.cmpi sge, %175, %176 : vector<1x192xi32>
    %c16_i32_78 = arith.constant 16 : i32
    %178 = vector.broadcast %c16_i32_78 : i32 to vector<1x192xi32>
    %179 = arith.cmpi slt, %175, %178 : vector<1x192xi32>
    %180 = arith.andi %177, %179 : vector<1x192xi1>
    %cst_79 = arith.constant 0.000000e+00 : f32
    %181 = vector.shape_cast %180 : vector<1x192xi1> to vector<1x192xi1>
    %182 = vector.broadcast %181 : vector<1x192xi1> to vector<8x192xi1>
    %183 = vector.broadcast %cst_79 : f32 to vector<8x192xf32>
    %184 = arith.select %182, %173, %183 : vector<8x192xi1>, vector<8x192xf32>
    %c0_80 = arith.constant 0 : index
    %c164 = arith.constant 164 : index
    %185 = vector.load %arg13[%c0_80, %c164] : memref<8x512xf32, #tpu.memory_space<vmem>>, vector<8x192xf32>
    %c4_i32_81 = arith.constant 4 : i32
    %186 = vector.broadcast %c4_i32_81 : i32 to vector<1x192xi32>
    %187 = arith.addi %0, %186 : vector<1x192xi32>
    %c0_i32_82 = arith.constant 0 : i32
    %188 = vector.broadcast %c0_i32_82 : i32 to vector<1x192xi32>
    %189 = arith.cmpi sge, %187, %188 : vector<1x192xi32>
    %c16_i32_83 = arith.constant 16 : i32
    %190 = vector.broadcast %c16_i32_83 : i32 to vector<1x192xi32>
    %191 = arith.cmpi slt, %187, %190 : vector<1x192xi32>
    %192 = arith.andi %189, %191 : vector<1x192xi1>
    %cst_84 = arith.constant 0.000000e+00 : f32
    %193 = vector.shape_cast %192 : vector<1x192xi1> to vector<1x192xi1>
    %194 = vector.broadcast %193 : vector<1x192xi1> to vector<8x192xi1>
    %195 = vector.broadcast %cst_84 : f32 to vector<8x192xf32>
    %196 = arith.select %194, %185, %195 : vector<8x192xi1>, vector<8x192xf32>
    %197 = tpu.concatenate %148, %160, %172, %184, %196 in 0 : vector<8x192xf32>, vector<8x192xf32>, vector<8x192xf32>, vector<8x192xf32>, vector<8x192xf32> -> vector<40x192xf32>
    %c2 = arith.constant 2 : index
    %c0_85 = arith.constant 0 : index
    %c0_86 = arith.constant 0 : index
    %198 = vector.load %arg3[%c2, %c0_85, %c0_86] : memref<5x8x40xf32, #tpu.memory_space<vmem>>, vector<1x8x40xf32>
    %199 = vector.shape_cast %198 : vector<1x8x40xf32> to vector<8x40xf32>
    %cst_87 = arith.constant dense<0.000000e+00> : vector<8x192xf32>
    %200 = tpu.matmul %199, %197, %cst_87 {dimension_numbers = #tpu.dot_dimension_numbers<[1], [0], [0], [1], [0, 0, 1, 1], [], []>} : vector<8x40xf32>, vector<40x192xf32>, vector<8x192xf32> -> vector<8x192xf32>
    %201 = arith.addf %136, %200 : vector<8x192xf32>
    %c0_88 = arith.constant 0 : index
    %c176 = arith.constant 176 : index
    %202 = vector.load %arg13[%c0_88, %c176] : memref<8x512xf32, #tpu.memory_space<vmem>>, vector<8x192xf32>
    %c0_i32_89 = arith.constant 0 : i32
    %203 = vector.broadcast %c0_i32_89 : i32 to vector<1x192xi32>
    %204 = arith.addi %0, %203 : vector<1x192xi32>
    %c0_i32_90 = arith.constant 0 : i32
    %205 = vector.broadcast %c0_i32_90 : i32 to vector<1x192xi32>
    %206 = arith.cmpi sge, %204, %205 : vector<1x192xi32>
    %c16_i32_91 = arith.constant 16 : i32
    %207 = vector.broadcast %c16_i32_91 : i32 to vector<1x192xi32>
    %208 = arith.cmpi slt, %204, %207 : vector<1x192xi32>
    %209 = arith.andi %206, %208 : vector<1x192xi1>
    %cst_92 = arith.constant 0.000000e+00 : f32
    %210 = vector.shape_cast %209 : vector<1x192xi1> to vector<1x192xi1>
    %211 = vector.broadcast %210 : vector<1x192xi1> to vector<8x192xi1>
    %212 = vector.broadcast %cst_92 : f32 to vector<8x192xf32>
    %213 = arith.select %211, %202, %212 : vector<8x192xi1>, vector<8x192xf32>
    %c0_93 = arith.constant 0 : index
    %c177 = arith.constant 177 : index
    %214 = vector.load %arg13[%c0_93, %c177] : memref<8x512xf32, #tpu.memory_space<vmem>>, vector<8x192xf32>
    %c1_i32_94 = arith.constant 1 : i32
    %215 = vector.broadcast %c1_i32_94 : i32 to vector<1x192xi32>
    %216 = arith.addi %0, %215 : vector<1x192xi32>
    %c0_i32_95 = arith.constant 0 : i32
    %217 = vector.broadcast %c0_i32_95 : i32 to vector<1x192xi32>
    %218 = arith.cmpi sge, %216, %217 : vector<1x192xi32>
    %c16_i32_96 = arith.constant 16 : i32
    %219 = vector.broadcast %c16_i32_96 : i32 to vector<1x192xi32>
    %220 = arith.cmpi slt, %216, %219 : vector<1x192xi32>
    %221 = arith.andi %218, %220 : vector<1x192xi1>
    %cst_97 = arith.constant 0.000000e+00 : f32
    %222 = vector.shape_cast %221 : vector<1x192xi1> to vector<1x192xi1>
    %223 = vector.broadcast %222 : vector<1x192xi1> to vector<8x192xi1>
    %224 = vector.broadcast %cst_97 : f32 to vector<8x192xf32>
    %225 = arith.select %223, %214, %224 : vector<8x192xi1>, vector<8x192xf32>
    %c0_98 = arith.constant 0 : index
    %c178 = arith.constant 178 : index
    %226 = vector.load %arg13[%c0_98, %c178] : memref<8x512xf32, #tpu.memory_space<vmem>>, vector<8x192xf32>
    %c2_i32_99 = arith.constant 2 : i32
    %227 = vector.broadcast %c2_i32_99 : i32 to vector<1x192xi32>
    %228 = arith.addi %0, %227 : vector<1x192xi32>
    %c0_i32_100 = arith.constant 0 : i32
    %229 = vector.broadcast %c0_i32_100 : i32 to vector<1x192xi32>
    %230 = arith.cmpi sge, %228, %229 : vector<1x192xi32>
    %c16_i32_101 = arith.constant 16 : i32
    %231 = vector.broadcast %c16_i32_101 : i32 to vector<1x192xi32>
    %232 = arith.cmpi slt, %228, %231 : vector<1x192xi32>
    %233 = arith.andi %230, %232 : vector<1x192xi1>
    %cst_102 = arith.constant 0.000000e+00 : f32
    %234 = vector.shape_cast %233 : vector<1x192xi1> to vector<1x192xi1>
    %235 = vector.broadcast %234 : vector<1x192xi1> to vector<8x192xi1>
    %236 = vector.broadcast %cst_102 : f32 to vector<8x192xf32>
    %237 = arith.select %235, %226, %236 : vector<8x192xi1>, vector<8x192xf32>
    %c0_103 = arith.constant 0 : index
    %c179 = arith.constant 179 : index
    %238 = vector.load %arg13[%c0_103, %c179] : memref<8x512xf32, #tpu.memory_space<vmem>>, vector<8x192xf32>
    %c3_i32_104 = arith.constant 3 : i32
    %239 = vector.broadcast %c3_i32_104 : i32 to vector<1x192xi32>
    %240 = arith.addi %0, %239 : vector<1x192xi32>
    %c0_i32_105 = arith.constant 0 : i32
    %241 = vector.broadcast %c0_i32_105 : i32 to vector<1x192xi32>
    %242 = arith.cmpi sge, %240, %241 : vector<1x192xi32>
    %c16_i32_106 = arith.constant 16 : i32
    %243 = vector.broadcast %c16_i32_106 : i32 to vector<1x192xi32>
    %244 = arith.cmpi slt, %240, %243 : vector<1x192xi32>
    %245 = arith.andi %242, %244 : vector<1x192xi1>
    %cst_107 = arith.constant 0.000000e+00 : f32
    %246 = vector.shape_cast %245 : vector<1x192xi1> to vector<1x192xi1>
    %247 = vector.broadcast %246 : vector<1x192xi1> to vector<8x192xi1>
    %248 = vector.broadcast %cst_107 : f32 to vector<8x192xf32>
    %249 = arith.select %247, %238, %248 : vector<8x192xi1>, vector<8x192xf32>
    %c0_108 = arith.constant 0 : index
    %c180 = arith.constant 180 : index
    %250 = vector.load %arg13[%c0_108, %c180] : memref<8x512xf32, #tpu.memory_space<vmem>>, vector<8x192xf32>
    %c4_i32_109 = arith.constant 4 : i32
    %251 = vector.broadcast %c4_i32_109 : i32 to vector<1x192xi32>
    %252 = arith.addi %0, %251 : vector<1x192xi32>
    %c0_i32_110 = arith.constant 0 : i32
    %253 = vector.broadcast %c0_i32_110 : i32 to vector<1x192xi32>
    %254 = arith.cmpi sge, %252, %253 : vector<1x192xi32>
    %c16_i32_111 = arith.constant 16 : i32
    %255 = vector.broadcast %c16_i32_111 : i32 to vector<1x192xi32>
    %256 = arith.cmpi slt, %252, %255 : vector<1x192xi32>
    %257 = arith.andi %254, %256 : vector<1x192xi1>
    %cst_112 = arith.constant 0.000000e+00 : f32
    %258 = vector.shape_cast %257 : vector<1x192xi1> to vector<1x192xi1>
    %259 = vector.broadcast %258 : vector<1x192xi1> to vector<8x192xi1>
    %260 = vector.broadcast %cst_112 : f32 to vector<8x192xf32>
    %261 = arith.select %259, %250, %260 : vector<8x192xi1>, vector<8x192xf32>
    %262 = tpu.concatenate %213, %225, %237, %249, %261 in 0 : vector<8x192xf32>, vector<8x192xf32>, vector<8x192xf32>, vector<8x192xf32>, vector<8x192xf32> -> vector<40x192xf32>
    %c3 = arith.constant 3 : index
    %c0_113 = arith.constant 0 : index
    %c0_114 = arith.constant 0 : index
    %263 = vector.load %arg3[%c3, %c0_113, %c0_114] : memref<5x8x40xf32, #tpu.memory_space<vmem>>, vector<1x8x40xf32>
    %264 = vector.shape_cast %263 : vector<1x8x40xf32> to vector<8x40xf32>
    %cst_115 = arith.constant dense<0.000000e+00> : vector<8x192xf32>
    %265 = tpu.matmul %264, %262, %cst_115 {dimension_numbers = #tpu.dot_dimension_numbers<[1], [0], [0], [1], [0, 0, 1, 1], [], []>} : vector<8x40xf32>, vector<40x192xf32>, vector<8x192xf32> -> vector<8x192xf32>
    %266 = arith.addf %201, %265 : vector<8x192xf32>
    %c0_116 = arith.constant 0 : index
    %c192 = arith.constant 192 : index
    %267 = vector.load %arg13[%c0_116, %c192] : memref<8x512xf32, #tpu.memory_space<vmem>>, vector<8x192xf32>
    %c0_i32_117 = arith.constant 0 : i32
    %268 = vector.broadcast %c0_i32_117 : i32 to vector<1x192xi32>
    %269 = arith.addi %0, %268 : vector<1x192xi32>
    %c0_i32_118 = arith.constant 0 : i32
    %270 = vector.broadcast %c0_i32_118 : i32 to vector<1x192xi32>
    %271 = arith.cmpi sge, %269, %270 : vector<1x192xi32>
    %c16_i32_119 = arith.constant 16 : i32
    %272 = vector.broadcast %c16_i32_119 : i32 to vector<1x192xi32>
    %273 = arith.cmpi slt, %269, %272 : vector<1x192xi32>
    %274 = arith.andi %271, %273 : vector<1x192xi1>
    %cst_120 = arith.constant 0.000000e+00 : f32
    %275 = vector.shape_cast %274 : vector<1x192xi1> to vector<1x192xi1>
    %276 = vector.broadcast %275 : vector<1x192xi1> to vector<8x192xi1>
    %277 = vector.broadcast %cst_120 : f32 to vector<8x192xf32>
    %278 = arith.select %276, %267, %277 : vector<8x192xi1>, vector<8x192xf32>
    %c0_121 = arith.constant 0 : index
    %c193 = arith.constant 193 : index
    %279 = vector.load %arg13[%c0_121, %c193] : memref<8x512xf32, #tpu.memory_space<vmem>>, vector<8x192xf32>
    %c1_i32_122 = arith.constant 1 : i32
    %280 = vector.broadcast %c1_i32_122 : i32 to vector<1x192xi32>
    %281 = arith.addi %0, %280 : vector<1x192xi32>
    %c0_i32_123 = arith.constant 0 : i32
    %282 = vector.broadcast %c0_i32_123 : i32 to vector<1x192xi32>
    %283 = arith.cmpi sge, %281, %282 : vector<1x192xi32>
    %c16_i32_124 = arith.constant 16 : i32
    %284 = vector.broadcast %c16_i32_124 : i32 to vector<1x192xi32>
    %285 = arith.cmpi slt, %281, %284 : vector<1x192xi32>
    %286 = arith.andi %283, %285 : vector<1x192xi1>
    %cst_125 = arith.constant 0.000000e+00 : f32
    %287 = vector.shape_cast %286 : vector<1x192xi1> to vector<1x192xi1>
    %288 = vector.broadcast %287 : vector<1x192xi1> to vector<8x192xi1>
    %289 = vector.broadcast %cst_125 : f32 to vector<8x192xf32>
    %290 = arith.select %288, %279, %289 : vector<8x192xi1>, vector<8x192xf32>
    %c0_126 = arith.constant 0 : index
    %c194 = arith.constant 194 : index
    %291 = vector.load %arg13[%c0_126, %c194] : memref<8x512xf32, #tpu.memory_space<vmem>>, vector<8x192xf32>
    %c2_i32_127 = arith.constant 2 : i32
    %292 = vector.broadcast %c2_i32_127 : i32 to vector<1x192xi32>
    %293 = arith.addi %0, %292 : vector<1x192xi32>
    %c0_i32_128 = arith.constant 0 : i32
    %294 = vector.broadcast %c0_i32_128 : i32 to vector<1x192xi32>
    %295 = arith.cmpi sge, %293, %294 : vector<1x192xi32>
    %c16_i32_129 = arith.constant 16 : i32
    %296 = vector.broadcast %c16_i32_129 : i32 to vector<1x192xi32>
    %297 = arith.cmpi slt, %293, %296 : vector<1x192xi32>
    %298 = arith.andi %295, %297 : vector<1x192xi1>
    %cst_130 = arith.constant 0.000000e+00 : f32
    %299 = vector.shape_cast %298 : vector<1x192xi1> to vector<1x192xi1>
    %300 = vector.broadcast %299 : vector<1x192xi1> to vector<8x192xi1>
    %301 = vector.broadcast %cst_130 : f32 to vector<8x192xf32>
    %302 = arith.select %300, %291, %301 : vector<8x192xi1>, vector<8x192xf32>
    %c0_131 = arith.constant 0 : index
    %c195 = arith.constant 195 : index
    %303 = vector.load %arg13[%c0_131, %c195] : memref<8x512xf32, #tpu.memory_space<vmem>>, vector<8x192xf32>
    %c3_i32_132 = arith.constant 3 : i32
    %304 = vector.broadcast %c3_i32_132 : i32 to vector<1x192xi32>
    %305 = arith.addi %0, %304 : vector<1x192xi32>
    %c0_i32_133 = arith.constant 0 : i32
    %306 = vector.broadcast %c0_i32_133 : i32 to vector<1x192xi32>
    %307 = arith.cmpi sge, %305, %306 : vector<1x192xi32>
    %c16_i32_134 = arith.constant 16 : i32
    %308 = vector.broadcast %c16_i32_134 : i32 to vector<1x192xi32>
    %309 = arith.cmpi slt, %305, %308 : vector<1x192xi32>
    %310 = arith.andi %307, %309 : vector<1x192xi1>
    %cst_135 = arith.constant 0.000000e+00 : f32
    %311 = vector.shape_cast %310 : vector<1x192xi1> to vector<1x192xi1>
    %312 = vector.broadcast %311 : vector<1x192xi1> to vector<8x192xi1>
    %313 = vector.broadcast %cst_135 : f32 to vector<8x192xf32>
    %314 = arith.select %312, %303, %313 : vector<8x192xi1>, vector<8x192xf32>
    %c0_136 = arith.constant 0 : index
    %c196 = arith.constant 196 : index
    %315 = vector.load %arg13[%c0_136, %c196] : memref<8x512xf32, #tpu.memory_space<vmem>>, vector<8x192xf32>
    %c4_i32_137 = arith.constant 4 : i32
    %316 = vector.broadcast %c4_i32_137 : i32 to vector<1x192xi32>
    %317 = arith.addi %0, %316 : vector<1x192xi32>
    %c0_i32_138 = arith.constant 0 : i32
    %318 = vector.broadcast %c0_i32_138 : i32 to vector<1x192xi32>
    %319 = arith.cmpi sge, %317, %318 : vector<1x192xi32>
    %c16_i32_139 = arith.constant 16 : i32
    %320 = vector.broadcast %c16_i32_139 : i32 to vector<1x192xi32>
    %321 = arith.cmpi slt, %317, %320 : vector<1x192xi32>
    %322 = arith.andi %319, %321 : vector<1x192xi1>
    %cst_140 = arith.constant 0.000000e+00 : f32
    %323 = vector.shape_cast %322 : vector<1x192xi1> to vector<1x192xi1>
    %324 = vector.broadcast %323 : vector<1x192xi1> to vector<8x192xi1>
    %325 = vector.broadcast %cst_140 : f32 to vector<8x192xf32>
    %326 = arith.select %324, %315, %325 : vector<8x192xi1>, vector<8x192xf32>
    %327 = tpu.concatenate %278, %290, %302, %314, %326 in 0 : vector<8x192xf32>, vector<8x192xf32>, vector<8x192xf32>, vector<8x192xf32>, vector<8x192xf32> -> vector<40x192xf32>
    %c4 = arith.constant 4 : index
    %c0_141 = arith.constant 0 : index
    %c0_142 = arith.constant 0 : index
    %328 = vector.load %arg3[%c4, %c0_141, %c0_142] : memref<5x8x40xf32, #tpu.memory_space<vmem>>, vector<1x8x40xf32>
    %329 = vector.shape_cast %328 : vector<1x8x40xf32> to vector<8x40xf32>
    %cst_143 = arith.constant dense<0.000000e+00> : vector<8x192xf32>
    %330 = tpu.matmul %329, %327, %cst_143 {dimension_numbers = #tpu.dot_dimension_numbers<[1], [0], [0], [1], [0, 0, 1, 1], [], []>} : vector<8x40xf32>, vector<40x192xf32>, vector<8x192xf32> -> vector<8x192xf32>
    %331 = arith.addf %266, %330 : vector<8x192xf32>
    %c0_144 = arith.constant 0 : index
    %c0_145 = arith.constant 0 : index
    %332 = vector.load %arg4[%c0_144, %c0_145] : memref<8x1xf32, #tpu.memory_space<vmem>>, vector<8x1xf32>
    %333 = vector.broadcast %332 : vector<8x1xf32> to vector<8x192xf32>
    %334 = arith.addf %331, %333 : vector<8x192xf32>
    %cst_146 = arith.constant 0.000000e+00 : f32
    %335 = vector.broadcast %cst_146 : f32 to vector<8x192xf32>
    %336 = arith.cmpf ogt, %334, %335 : vector<8x192xf32>
    %cst_147 = arith.constant 0.00999999977 : f32
    %337 = vector.broadcast %cst_147 : f32 to vector<8x192xf32>
    %338 = arith.mulf %337, %334 : vector<8x192xf32>
    %339 = arith.select %336, %334, %338 : vector<8x192xi1>, vector<8x192xf32>
    %cst_148 = arith.constant 0.000000e+00 : f32
    %340 = vector.broadcast %cst_148 : f32 to vector<8x512xf32>
    %c0_149 = arith.constant 0 : index
    %c0_150 = arith.constant 0 : index
    %341 = vector.load %arg13[%c0_149, %c0_150] : memref<8x512xf32, #tpu.memory_space<vmem>>, vector<8x512xf32>
    tpu.vector_store %arg13[%c0_149, %c0_150], %340 {strides = array<i32>} : memref<8x512xf32, #tpu.memory_space<vmem>>, vector<8x512xf32>,
    %c0_151 = arith.constant 0 : index
    %c128_152 = arith.constant 128 : index
    %342 = vector.load %arg13[%c0_151, %c128_152] : memref<8x512xf32, #tpu.memory_space<vmem>>, vector<8x256xf32>
    tpu.vector_store %arg13[%c0_151, %c128_152], %2 {strides = array<i32>} : memref<8x512xf32, #tpu.memory_space<vmem>>, vector<8x256xf32>,
    %cst_153 = arith.constant 0.000000e+00 : f32
    %343 = vector.broadcast %cst_153 : f32 to vector<8x192xf32>
    %c0_154 = arith.constant 0 : index
    %c111 = arith.constant 111 : index
    %344 = vector.load %arg13[%c0_154, %c111] : memref<8x512xf32, #tpu.memory_space<vmem>>, vector<8x192xf32>
    %c-1_i32 = arith.constant -1 : i32
    %345 = vector.broadcast %c-1_i32 : i32 to vector<1x192xi32>
    %346 = arith.addi %0, %345 : vector<1x192xi32>
    %c0_i32_155 = arith.constant 0 : i32
    %347 = vector.broadcast %c0_i32_155 : i32 to vector<1x192xi32>
    %348 = arith.cmpi sge, %346, %347 : vector<1x192xi32>
    %c16_i32_156 = arith.constant 16 : i32
    %349 = vector.broadcast %c16_i32_156 : i32 to vector<1x192xi32>
    %350 = arith.cmpi slt, %346, %349 : vector<1x192xi32>
    %351 = arith.andi %348, %350 : vector<1x192xi1>
    %cst_157 = arith.constant 0.000000e+00 : f32
    %352 = vector.shape_cast %351 : vector<1x192xi1> to vector<1x192xi1>
    %353 = vector.broadcast %352 : vector<1x192xi1> to vector<8x192xi1>
    %354 = vector.broadcast %cst_157 : f32 to vector<8x192xf32>
    %355 = arith.select %353, %344, %354 : vector<8x192xi1>, vector<8x192xf32>
    %c0_158 = arith.constant 0 : index
    %c112 = arith.constant 112 : index
    %356 = vector.load %arg13[%c0_158, %c112] : memref<8x512xf32, #tpu.memory_space<vmem>>, vector<8x192xf32>
    %c0_i32_159 = arith.constant 0 : i32
    %357 = vector.broadcast %c0_i32_159 : i32 to vector<1x192xi32>
    %358 = arith.addi %0, %357 : vector<1x192xi32>
    %c0_i32_160 = arith.constant 0 : i32
    %359 = vector.broadcast %c0_i32_160 : i32 to vector<1x192xi32>
    %360 = arith.cmpi sge, %358, %359 : vector<1x192xi32>
    %c16_i32_161 = arith.constant 16 : i32
    %361 = vector.broadcast %c16_i32_161 : i32 to vector<1x192xi32>
    %362 = arith.cmpi slt, %358, %361 : vector<1x192xi32>
    %363 = arith.andi %360, %362 : vector<1x192xi1>
    %cst_162 = arith.constant 0.000000e+00 : f32
    %364 = vector.shape_cast %363 : vector<1x192xi1> to vector<1x192xi1>
    %365 = vector.broadcast %364 : vector<1x192xi1> to vector<8x192xi1>
    %366 = vector.broadcast %cst_162 : f32 to vector<8x192xf32>
    %367 = arith.select %365, %356, %366 : vector<8x192xi1>, vector<8x192xf32>
    %c0_163 = arith.constant 0 : index
    %c113 = arith.constant 113 : index
    %368 = vector.load %arg13[%c0_163, %c113] : memref<8x512xf32, #tpu.memory_space<vmem>>, vector<8x192xf32>
    %c1_i32_164 = arith.constant 1 : i32
    %369 = vector.broadcast %c1_i32_164 : i32 to vector<1x192xi32>
    %370 = arith.addi %0, %369 : vector<1x192xi32>
    %c0_i32_165 = arith.constant 0 : i32
    %371 = vector.broadcast %c0_i32_165 : i32 to vector<1x192xi32>
    %372 = arith.cmpi sge, %370, %371 : vector<1x192xi32>
    %c16_i32_166 = arith.constant 16 : i32
    %373 = vector.broadcast %c16_i32_166 : i32 to vector<1x192xi32>
    %374 = arith.cmpi slt, %370, %373 : vector<1x192xi32>
    %375 = arith.andi %372, %374 : vector<1x192xi1>
    %cst_167 = arith.constant 0.000000e+00 : f32
    %376 = vector.shape_cast %375 : vector<1x192xi1> to vector<1x192xi1>
    %377 = vector.broadcast %376 : vector<1x192xi1> to vector<8x192xi1>
    %378 = vector.broadcast %cst_167 : f32 to vector<8x192xf32>
    %379 = arith.select %377, %368, %378 : vector<8x192xi1>, vector<8x192xf32>
    %c0_168 = arith.constant 0 : index
    %c114 = arith.constant 114 : index
    %380 = vector.load %arg13[%c0_168, %c114] : memref<8x512xf32, #tpu.memory_space<vmem>>, vector<8x192xf32>
    %c2_i32_169 = arith.constant 2 : i32
    %381 = vector.broadcast %c2_i32_169 : i32 to vector<1x192xi32>
    %382 = arith.addi %0, %381 : vector<1x192xi32>
    %c0_i32_170 = arith.constant 0 : i32
    %383 = vector.broadcast %c0_i32_170 : i32 to vector<1x192xi32>
    %384 = arith.cmpi sge, %382, %383 : vector<1x192xi32>
    %c16_i32_171 = arith.constant 16 : i32
    %385 = vector.broadcast %c16_i32_171 : i32 to vector<1x192xi32>
    %386 = arith.cmpi slt, %382, %385 : vector<1x192xi32>
    %387 = arith.andi %384, %386 : vector<1x192xi1>
    %cst_172 = arith.constant 0.000000e+00 : f32
    %388 = vector.shape_cast %387 : vector<1x192xi1> to vector<1x192xi1>
    %389 = vector.broadcast %388 : vector<1x192xi1> to vector<8x192xi1>
    %390 = vector.broadcast %cst_172 : f32 to vector<8x192xf32>
    %391 = arith.select %389, %380, %390 : vector<8x192xi1>, vector<8x192xf32>
    %c0_173 = arith.constant 0 : index
    %c115 = arith.constant 115 : index
    %392 = vector.load %arg13[%c0_173, %c115] : memref<8x512xf32, #tpu.memory_space<vmem>>, vector<8x192xf32>
    %c3_i32_174 = arith.constant 3 : i32
    %393 = vector.broadcast %c3_i32_174 : i32 to vector<1x192xi32>
    %394 = arith.addi %0, %393 : vector<1x192xi32>
    %c0_i32_175 = arith.constant 0 : i32
    %395 = vector.broadcast %c0_i32_175 : i32 to vector<1x192xi32>
    %396 = arith.cmpi sge, %394, %395 : vector<1x192xi32>
    %c16_i32_176 = arith.constant 16 : i32
    %397 = vector.broadcast %c16_i32_176 : i32 to vector<1x192xi32>
    %398 = arith.cmpi slt, %394, %397 : vector<1x192xi32>
    %399 = arith.andi %396, %398 : vector<1x192xi1>
    %cst_177 = arith.constant 0.000000e+00 : f32
    %400 = vector.shape_cast %399 : vector<1x192xi1> to vector<1x192xi1>
    %401 = vector.broadcast %400 : vector<1x192xi1> to vector<8x192xi1>
    %402 = vector.broadcast %cst_177 : f32 to vector<8x192xf32>
    %403 = arith.select %401, %392, %402 : vector<8x192xi1>, vector<8x192xf32>
    %c0_178 = arith.constant 0 : index
    %c116 = arith.constant 116 : index
    %404 = vector.load %arg13[%c0_178, %c116] : memref<8x512xf32, #tpu.memory_space<vmem>>, vector<8x192xf32>
    %c4_i32_179 = arith.constant 4 : i32
    %405 = vector.broadcast %c4_i32_179 : i32 to vector<1x192xi32>
    %406 = arith.addi %0, %405 : vector<1x192xi32>
    %c0_i32_180 = arith.constant 0 : i32
    %407 = vector.broadcast %c0_i32_180 : i32 to vector<1x192xi32>
    %408 = arith.cmpi sge, %406, %407 : vector<1x192xi32>
    %c16_i32_181 = arith.constant 16 : i32
    %409 = vector.broadcast %c16_i32_181 : i32 to vector<1x192xi32>
    %410 = arith.cmpi slt, %406, %409 : vector<1x192xi32>
    %411 = arith.andi %408, %410 : vector<1x192xi1>
    %cst_182 = arith.constant 0.000000e+00 : f32
    %412 = vector.shape_cast %411 : vector<1x192xi1> to vector<1x192xi1>
    %413 = vector.broadcast %412 : vector<1x192xi1> to vector<8x192xi1>
    %414 = vector.broadcast %cst_182 : f32 to vector<8x192xf32>
    %415 = arith.select %413, %404, %414 : vector<8x192xi1>, vector<8x192xf32>
    %c0_183 = arith.constant 0 : index
    %c117 = arith.constant 117 : index
    %416 = vector.load %arg13[%c0_183, %c117] : memref<8x512xf32, #tpu.memory_space<vmem>>, vector<8x192xf32>
    %c5_i32 = arith.constant 5 : i32
    %417 = vector.broadcast %c5_i32 : i32 to vector<1x192xi32>
    %418 = arith.addi %0, %417 : vector<1x192xi32>
    %c0_i32_184 = arith.constant 0 : i32
    %419 = vector.broadcast %c0_i32_184 : i32 to vector<1x192xi32>
    %420 = arith.cmpi sge, %418, %419 : vector<1x192xi32>
    %c16_i32_185 = arith.constant 16 : i32
    %421 = vector.broadcast %c16_i32_185 : i32 to vector<1x192xi32>
    %422 = arith.cmpi slt, %418, %421 : vector<1x192xi32>
    %423 = arith.andi %420, %422 : vector<1x192xi1>
    %cst_186 = arith.constant 0.000000e+00 : f32
    %424 = vector.shape_cast %423 : vector<1x192xi1> to vector<1x192xi1>
    %425 = vector.broadcast %424 : vector<1x192xi1> to vector<8x192xi1>
    %426 = vector.broadcast %cst_186 : f32 to vector<8x192xf32>
    %427 = arith.select %425, %416, %426 : vector<8x192xi1>, vector<8x192xf32>
    %428 = tpu.concatenate %355, %367, %379, %391, %403, %415, %427 in 0 : vector<8x192xf32>, vector<8x192xf32>, vector<8x192xf32>, vector<8x192xf32>, vector<8x192xf32>, vector<8x192xf32>, vector<8x192xf32> -> vector<56x192xf32>
    %c0_187 = arith.constant 0 : index
    %c0_188 = arith.constant 0 : index
    %c0_189 = arith.constant 0 : index
    %429 = vector.load %arg5[%c0_187, %c0_188, %c0_189] : memref<7x8x56xf32, #tpu.memory_space<vmem>>, vector<1x8x56xf32>
    %430 = vector.shape_cast %429 : vector<1x8x56xf32> to vector<8x56xf32>
    %cst_190 = arith.constant dense<0.000000e+00> : vector<8x192xf32>
    %431 = tpu.matmul %430, %428, %cst_190 {dimension_numbers = #tpu.dot_dimension_numbers<[1], [0], [0], [1], [0, 0, 1, 1], [], []>} : vector<8x56xf32>, vector<56x192xf32>, vector<8x192xf32> -> vector<8x192xf32>
    %432 = arith.addf %343, %431 : vector<8x192xf32>
    %c0_191 = arith.constant 0 : index
    %c127 = arith.constant 127 : index
    %433 = vector.load %arg13[%c0_191, %c127] : memref<8x512xf32, #tpu.memory_space<vmem>>, vector<8x192xf32>
    %c-1_i32_192 = arith.constant -1 : i32
    %434 = vector.broadcast %c-1_i32_192 : i32 to vector<1x192xi32>
    %435 = arith.addi %0, %434 : vector<1x192xi32>
    %c0_i32_193 = arith.constant 0 : i32
    %436 = vector.broadcast %c0_i32_193 : i32 to vector<1x192xi32>
    %437 = arith.cmpi sge, %435, %436 : vector<1x192xi32>
    %c16_i32_194 = arith.constant 16 : i32
    %438 = vector.broadcast %c16_i32_194 : i32 to vector<1x192xi32>
    %439 = arith.cmpi slt, %435, %438 : vector<1x192xi32>
    %440 = arith.andi %437, %439 : vector<1x192xi1>
    %cst_195 = arith.constant 0.000000e+00 : f32
    %441 = vector.shape_cast %440 : vector<1x192xi1> to vector<1x192xi1>
    %442 = vector.broadcast %441 : vector<1x192xi1> to vector<8x192xi1>
    %443 = vector.broadcast %cst_195 : f32 to vector<8x192xf32>
    %444 = arith.select %442, %433, %443 : vector<8x192xi1>, vector<8x192xf32>
    %c0_196 = arith.constant 0 : index
    %c128_197 = arith.constant 128 : index
    %445 = vector.load %arg13[%c0_196, %c128_197] : memref<8x512xf32, #tpu.memory_space<vmem>>, vector<8x192xf32>
    %c0_i32_198 = arith.constant 0 : i32
    %446 = vector.broadcast %c0_i32_198 : i32 to vector<1x192xi32>
    %447 = arith.addi %0, %446 : vector<1x192xi32>
    %c0_i32_199 = arith.constant 0 : i32
    %448 = vector.broadcast %c0_i32_199 : i32 to vector<1x192xi32>
    %449 = arith.cmpi sge, %447, %448 : vector<1x192xi32>
    %c16_i32_200 = arith.constant 16 : i32
    %450 = vector.broadcast %c16_i32_200 : i32 to vector<1x192xi32>
    %451 = arith.cmpi slt, %447, %450 : vector<1x192xi32>
    %452 = arith.andi %449, %451 : vector<1x192xi1>
    %cst_201 = arith.constant 0.000000e+00 : f32
    %453 = vector.shape_cast %452 : vector<1x192xi1> to vector<1x192xi1>
    %454 = vector.broadcast %453 : vector<1x192xi1> to vector<8x192xi1>
    %455 = vector.broadcast %cst_201 : f32 to vector<8x192xf32>
    %456 = arith.select %454, %445, %455 : vector<8x192xi1>, vector<8x192xf32>
    %c0_202 = arith.constant 0 : index
    %c129_203 = arith.constant 129 : index
    %457 = vector.load %arg13[%c0_202, %c129_203] : memref<8x512xf32, #tpu.memory_space<vmem>>, vector<8x192xf32>
    %c1_i32_204 = arith.constant 1 : i32
    %458 = vector.broadcast %c1_i32_204 : i32 to vector<1x192xi32>
    %459 = arith.addi %0, %458 : vector<1x192xi32>
    %c0_i32_205 = arith.constant 0 : i32
    %460 = vector.broadcast %c0_i32_205 : i32 to vector<1x192xi32>
    %461 = arith.cmpi sge, %459, %460 : vector<1x192xi32>
    %c16_i32_206 = arith.constant 16 : i32
    %462 = vector.broadcast %c16_i32_206 : i32 to vector<1x192xi32>
    %463 = arith.cmpi slt, %459, %462 : vector<1x192xi32>
    %464 = arith.andi %461, %463 : vector<1x192xi1>
    %cst_207 = arith.constant 0.000000e+00 : f32
    %465 = vector.shape_cast %464 : vector<1x192xi1> to vector<1x192xi1>
    %466 = vector.broadcast %465 : vector<1x192xi1> to vector<8x192xi1>
    %467 = vector.broadcast %cst_207 : f32 to vector<8x192xf32>
    %468 = arith.select %466, %457, %467 : vector<8x192xi1>, vector<8x192xf32>
    %c0_208 = arith.constant 0 : index
    %c130_209 = arith.constant 130 : index
    %469 = vector.load %arg13[%c0_208, %c130_209] : memref<8x512xf32, #tpu.memory_space<vmem>>, vector<8x192xf32>
    %c2_i32_210 = arith.constant 2 : i32
    %470 = vector.broadcast %c2_i32_210 : i32 to vector<1x192xi32>
    %471 = arith.addi %0, %470 : vector<1x192xi32>
    %c0_i32_211 = arith.constant 0 : i32
    %472 = vector.broadcast %c0_i32_211 : i32 to vector<1x192xi32>
    %473 = arith.cmpi sge, %471, %472 : vector<1x192xi32>
    %c16_i32_212 = arith.constant 16 : i32
    %474 = vector.broadcast %c16_i32_212 : i32 to vector<1x192xi32>
    %475 = arith.cmpi slt, %471, %474 : vector<1x192xi32>
    %476 = arith.andi %473, %475 : vector<1x192xi1>
    %cst_213 = arith.constant 0.000000e+00 : f32
    %477 = vector.shape_cast %476 : vector<1x192xi1> to vector<1x192xi1>
    %478 = vector.broadcast %477 : vector<1x192xi1> to vector<8x192xi1>
    %479 = vector.broadcast %cst_213 : f32 to vector<8x192xf32>
    %480 = arith.select %478, %469, %479 : vector<8x192xi1>, vector<8x192xf32>
    %c0_214 = arith.constant 0 : index
    %c131_215 = arith.constant 131 : index
    %481 = vector.load %arg13[%c0_214, %c131_215] : memref<8x512xf32, #tpu.memory_space<vmem>>, vector<8x192xf32>
    %c3_i32_216 = arith.constant 3 : i32
    %482 = vector.broadcast %c3_i32_216 : i32 to vector<1x192xi32>
    %483 = arith.addi %0, %482 : vector<1x192xi32>
    %c0_i32_217 = arith.constant 0 : i32
    %484 = vector.broadcast %c0_i32_217 : i32 to vector<1x192xi32>
    %485 = arith.cmpi sge, %483, %484 : vector<1x192xi32>
    %c16_i32_218 = arith.constant 16 : i32
    %486 = vector.broadcast %c16_i32_218 : i32 to vector<1x192xi32>
    %487 = arith.cmpi slt, %483, %486 : vector<1x192xi32>
    %488 = arith.andi %485, %487 : vector<1x192xi1>
    %cst_219 = arith.constant 0.000000e+00 : f32
    %489 = vector.shape_cast %488 : vector<1x192xi1> to vector<1x192xi1>
    %490 = vector.broadcast %489 : vector<1x192xi1> to vector<8x192xi1>
    %491 = vector.broadcast %cst_219 : f32 to vector<8x192xf32>
    %492 = arith.select %490, %481, %491 : vector<8x192xi1>, vector<8x192xf32>
    %c0_220 = arith.constant 0 : index
    %c132_221 = arith.constant 132 : index
    %493 = vector.load %arg13[%c0_220, %c132_221] : memref<8x512xf32, #tpu.memory_space<vmem>>, vector<8x192xf32>
    %c4_i32_222 = arith.constant 4 : i32
    %494 = vector.broadcast %c4_i32_222 : i32 to vector<1x192xi32>
    %495 = arith.addi %0, %494 : vector<1x192xi32>
    %c0_i32_223 = arith.constant 0 : i32
    %496 = vector.broadcast %c0_i32_223 : i32 to vector<1x192xi32>
    %497 = arith.cmpi sge, %495, %496 : vector<1x192xi32>
    %c16_i32_224 = arith.constant 16 : i32
    %498 = vector.broadcast %c16_i32_224 : i32 to vector<1x192xi32>
    %499 = arith.cmpi slt, %495, %498 : vector<1x192xi32>
    %500 = arith.andi %497, %499 : vector<1x192xi1>
    %cst_225 = arith.constant 0.000000e+00 : f32
    %501 = vector.shape_cast %500 : vector<1x192xi1> to vector<1x192xi1>
    %502 = vector.broadcast %501 : vector<1x192xi1> to vector<8x192xi1>
    %503 = vector.broadcast %cst_225 : f32 to vector<8x192xf32>
    %504 = arith.select %502, %493, %503 : vector<8x192xi1>, vector<8x192xf32>
    %c0_226 = arith.constant 0 : index
    %c133 = arith.constant 133 : index
    %505 = vector.load %arg13[%c0_226, %c133] : memref<8x512xf32, #tpu.memory_space<vmem>>, vector<8x192xf32>
    %c5_i32_227 = arith.constant 5 : i32
    %506 = vector.broadcast %c5_i32_227 : i32 to vector<1x192xi32>
    %507 = arith.addi %0, %506 : vector<1x192xi32>
    %c0_i32_228 = arith.constant 0 : i32
    %508 = vector.broadcast %c0_i32_228 : i32 to vector<1x192xi32>
    %509 = arith.cmpi sge, %507, %508 : vector<1x192xi32>
    %c16_i32_229 = arith.constant 16 : i32
    %510 = vector.broadcast %c16_i32_229 : i32 to vector<1x192xi32>
    %511 = arith.cmpi slt, %507, %510 : vector<1x192xi32>
    %512 = arith.andi %509, %511 : vector<1x192xi1>
    %cst_230 = arith.constant 0.000000e+00 : f32
    %513 = vector.shape_cast %512 : vector<1x192xi1> to vector<1x192xi1>
    %514 = vector.broadcast %513 : vector<1x192xi1> to vector<8x192xi1>
    %515 = vector.broadcast %cst_230 : f32 to vector<8x192xf32>
    %516 = arith.select %514, %505, %515 : vector<8x192xi1>, vector<8x192xf32>
    %517 = tpu.concatenate %444, %456, %468, %480, %492, %504, %516 in 0 : vector<8x192xf32>, vector<8x192xf32>, vector<8x192xf32>, vector<8x192xf32>, vector<8x192xf32>, vector<8x192xf32>, vector<8x192xf32> -> vector<56x192xf32>
    %c1_231 = arith.constant 1 : index
    %c0_232 = arith.constant 0 : index
    %c0_233 = arith.constant 0 : index
    %518 = vector.load %arg5[%c1_231, %c0_232, %c0_233] : memref<7x8x56xf32, #tpu.memory_space<vmem>>, vector<1x8x56xf32>
    %519 = vector.shape_cast %518 : vector<1x8x56xf32> to vector<8x56xf32>
    %cst_234 = arith.constant dense<0.000000e+00> : vector<8x192xf32>
    %520 = tpu.matmul %519, %517, %cst_234 {dimension_numbers = #tpu.dot_dimension_numbers<[1], [0], [0], [1], [0, 0, 1, 1], [], []>} : vector<8x56xf32>, vector<56x192xf32>, vector<8x192xf32> -> vector<8x192xf32>
    %521 = arith.addf %432, %520 : vector<8x192xf32>
    %c0_235 = arith.constant 0 : index
    %c143 = arith.constant 143 : index
    %522 = vector.load %arg13[%c0_235, %c143] : memref<8x512xf32, #tpu.memory_space<vmem>>, vector<8x192xf32>
    %c-1_i32_236 = arith.constant -1 : i32
    %523 = vector.broadcast %c-1_i32_236 : i32 to vector<1x192xi32>
    %524 = arith.addi %0, %523 : vector<1x192xi32>
    %c0_i32_237 = arith.constant 0 : i32
    %525 = vector.broadcast %c0_i32_237 : i32 to vector<1x192xi32>
    %526 = arith.cmpi sge, %524, %525 : vector<1x192xi32>
    %c16_i32_238 = arith.constant 16 : i32
    %527 = vector.broadcast %c16_i32_238 : i32 to vector<1x192xi32>
    %528 = arith.cmpi slt, %524, %527 : vector<1x192xi32>
    %529 = arith.andi %526, %528 : vector<1x192xi1>
    %cst_239 = arith.constant 0.000000e+00 : f32
    %530 = vector.shape_cast %529 : vector<1x192xi1> to vector<1x192xi1>
    %531 = vector.broadcast %530 : vector<1x192xi1> to vector<8x192xi1>
    %532 = vector.broadcast %cst_239 : f32 to vector<8x192xf32>
    %533 = arith.select %531, %522, %532 : vector<8x192xi1>, vector<8x192xf32>
    %c0_240 = arith.constant 0 : index
    %c144_241 = arith.constant 144 : index
    %534 = vector.load %arg13[%c0_240, %c144_241] : memref<8x512xf32, #tpu.memory_space<vmem>>, vector<8x192xf32>
    %c0_i32_242 = arith.constant 0 : i32
    %535 = vector.broadcast %c0_i32_242 : i32 to vector<1x192xi32>
    %536 = arith.addi %0, %535 : vector<1x192xi32>
    %c0_i32_243 = arith.constant 0 : i32
    %537 = vector.broadcast %c0_i32_243 : i32 to vector<1x192xi32>
    %538 = arith.cmpi sge, %536, %537 : vector<1x192xi32>
    %c16_i32_244 = arith.constant 16 : i32
    %539 = vector.broadcast %c16_i32_244 : i32 to vector<1x192xi32>
    %540 = arith.cmpi slt, %536, %539 : vector<1x192xi32>
    %541 = arith.andi %538, %540 : vector<1x192xi1>
    %cst_245 = arith.constant 0.000000e+00 : f32
    %542 = vector.shape_cast %541 : vector<1x192xi1> to vector<1x192xi1>
    %543 = vector.broadcast %542 : vector<1x192xi1> to vector<8x192xi1>
    %544 = vector.broadcast %cst_245 : f32 to vector<8x192xf32>
    %545 = arith.select %543, %534, %544 : vector<8x192xi1>, vector<8x192xf32>
    %c0_246 = arith.constant 0 : index
    %c145_247 = arith.constant 145 : index
    %546 = vector.load %arg13[%c0_246, %c145_247] : memref<8x512xf32, #tpu.memory_space<vmem>>, vector<8x192xf32>
    %c1_i32_248 = arith.constant 1 : i32
    %547 = vector.broadcast %c1_i32_248 : i32 to vector<1x192xi32>
    %548 = arith.addi %0, %547 : vector<1x192xi32>
    %c0_i32_249 = arith.constant 0 : i32
    %549 = vector.broadcast %c0_i32_249 : i32 to vector<1x192xi32>
    %550 = arith.cmpi sge, %548, %549 : vector<1x192xi32>
    %c16_i32_250 = arith.constant 16 : i32
    %551 = vector.broadcast %c16_i32_250 : i32 to vector<1x192xi32>
    %552 = arith.cmpi slt, %548, %551 : vector<1x192xi32>
    %553 = arith.andi %550, %552 : vector<1x192xi1>
    %cst_251 = arith.constant 0.000000e+00 : f32
    %554 = vector.shape_cast %553 : vector<1x192xi1> to vector<1x192xi1>
    %555 = vector.broadcast %554 : vector<1x192xi1> to vector<8x192xi1>
    %556 = vector.broadcast %cst_251 : f32 to vector<8x192xf32>
    %557 = arith.select %555, %546, %556 : vector<8x192xi1>, vector<8x192xf32>
    %c0_252 = arith.constant 0 : index
    %c146_253 = arith.constant 146 : index
    %558 = vector.load %arg13[%c0_252, %c146_253] : memref<8x512xf32, #tpu.memory_space<vmem>>, vector<8x192xf32>
    %c2_i32_254 = arith.constant 2 : i32
    %559 = vector.broadcast %c2_i32_254 : i32 to vector<1x192xi32>
    %560 = arith.addi %0, %559 : vector<1x192xi32>
    %c0_i32_255 = arith.constant 0 : i32
    %561 = vector.broadcast %c0_i32_255 : i32 to vector<1x192xi32>
    %562 = arith.cmpi sge, %560, %561 : vector<1x192xi32>
    %c16_i32_256 = arith.constant 16 : i32
    %563 = vector.broadcast %c16_i32_256 : i32 to vector<1x192xi32>
    %564 = arith.cmpi slt, %560, %563 : vector<1x192xi32>
    %565 = arith.andi %562, %564 : vector<1x192xi1>
    %cst_257 = arith.constant 0.000000e+00 : f32
    %566 = vector.shape_cast %565 : vector<1x192xi1> to vector<1x192xi1>
    %567 = vector.broadcast %566 : vector<1x192xi1> to vector<8x192xi1>
    %568 = vector.broadcast %cst_257 : f32 to vector<8x192xf32>
    %569 = arith.select %567, %558, %568 : vector<8x192xi1>, vector<8x192xf32>
    %c0_258 = arith.constant 0 : index
    %c147_259 = arith.constant 147 : index
    %570 = vector.load %arg13[%c0_258, %c147_259] : memref<8x512xf32, #tpu.memory_space<vmem>>, vector<8x192xf32>
    %c3_i32_260 = arith.constant 3 : i32
    %571 = vector.broadcast %c3_i32_260 : i32 to vector<1x192xi32>
    %572 = arith.addi %0, %571 : vector<1x192xi32>
    %c0_i32_261 = arith.constant 0 : i32
    %573 = vector.broadcast %c0_i32_261 : i32 to vector<1x192xi32>
    %574 = arith.cmpi sge, %572, %573 : vector<1x192xi32>
    %c16_i32_262 = arith.constant 16 : i32
    %575 = vector.broadcast %c16_i32_262 : i32 to vector<1x192xi32>
    %576 = arith.cmpi slt, %572, %575 : vector<1x192xi32>
    %577 = arith.andi %574, %576 : vector<1x192xi1>
    %cst_263 = arith.constant 0.000000e+00 : f32
    %578 = vector.shape_cast %577 : vector<1x192xi1> to vector<1x192xi1>
    %579 = vector.broadcast %578 : vector<1x192xi1> to vector<8x192xi1>
    %580 = vector.broadcast %cst_263 : f32 to vector<8x192xf32>
    %581 = arith.select %579, %570, %580 : vector<8x192xi1>, vector<8x192xf32>
    %c0_264 = arith.constant 0 : index
    %c148_265 = arith.constant 148 : index
    %582 = vector.load %arg13[%c0_264, %c148_265] : memref<8x512xf32, #tpu.memory_space<vmem>>, vector<8x192xf32>
    %c4_i32_266 = arith.constant 4 : i32
    %583 = vector.broadcast %c4_i32_266 : i32 to vector<1x192xi32>
    %584 = arith.addi %0, %583 : vector<1x192xi32>
    %c0_i32_267 = arith.constant 0 : i32
    %585 = vector.broadcast %c0_i32_267 : i32 to vector<1x192xi32>
    %586 = arith.cmpi sge, %584, %585 : vector<1x192xi32>
    %c16_i32_268 = arith.constant 16 : i32
    %587 = vector.broadcast %c16_i32_268 : i32 to vector<1x192xi32>
    %588 = arith.cmpi slt, %584, %587 : vector<1x192xi32>
    %589 = arith.andi %586, %588 : vector<1x192xi1>
    %cst_269 = arith.constant 0.000000e+00 : f32
    %590 = vector.shape_cast %589 : vector<1x192xi1> to vector<1x192xi1>
    %591 = vector.broadcast %590 : vector<1x192xi1> to vector<8x192xi1>
    %592 = vector.broadcast %cst_269 : f32 to vector<8x192xf32>
    %593 = arith.select %591, %582, %592 : vector<8x192xi1>, vector<8x192xf32>
    %c0_270 = arith.constant 0 : index
    %c149 = arith.constant 149 : index
    %594 = vector.load %arg13[%c0_270, %c149] : memref<8x512xf32, #tpu.memory_space<vmem>>, vector<8x192xf32>
    %c5_i32_271 = arith.constant 5 : i32
    %595 = vector.broadcast %c5_i32_271 : i32 to vector<1x192xi32>
    %596 = arith.addi %0, %595 : vector<1x192xi32>
    %c0_i32_272 = arith.constant 0 : i32
    %597 = vector.broadcast %c0_i32_272 : i32 to vector<1x192xi32>
    %598 = arith.cmpi sge, %596, %597 : vector<1x192xi32>
    %c16_i32_273 = arith.constant 16 : i32
    %599 = vector.broadcast %c16_i32_273 : i32 to vector<1x192xi32>
    %600 = arith.cmpi slt, %596, %599 : vector<1x192xi32>
    %601 = arith.andi %598, %600 : vector<1x192xi1>
    %cst_274 = arith.constant 0.000000e+00 : f32
    %602 = vector.shape_cast %601 : vector<1x192xi1> to vector<1x192xi1>
    %603 = vector.broadcast %602 : vector<1x192xi1> to vector<8x192xi1>
    %604 = vector.broadcast %cst_274 : f32 to vector<8x192xf32>
    %605 = arith.select %603, %594, %604 : vector<8x192xi1>, vector<8x192xf32>
    %606 = tpu.concatenate %533, %545, %557, %569, %581, %593, %605 in 0 : vector<8x192xf32>, vector<8x192xf32>, vector<8x192xf32>, vector<8x192xf32>, vector<8x192xf32>, vector<8x192xf32>, vector<8x192xf32> -> vector<56x192xf32>
    %c2_275 = arith.constant 2 : index
    %c0_276 = arith.constant 0 : index
    %c0_277 = arith.constant 0 : index
    %607 = vector.load %arg5[%c2_275, %c0_276, %c0_277] : memref<7x8x56xf32, #tpu.memory_space<vmem>>, vector<1x8x56xf32>
    %608 = vector.shape_cast %607 : vector<1x8x56xf32> to vector<8x56xf32>
    %cst_278 = arith.constant dense<0.000000e+00> : vector<8x192xf32>
    %609 = tpu.matmul %608, %606, %cst_278 {dimension_numbers = #tpu.dot_dimension_numbers<[1], [0], [0], [1], [0, 0, 1, 1], [], []>} : vector<8x56xf32>, vector<56x192xf32>, vector<8x192xf32> -> vector<8x192xf32>
    %610 = arith.addf %521, %609 : vector<8x192xf32>
    %c0_279 = arith.constant 0 : index
    %c159 = arith.constant 159 : index
    %611 = vector.load %arg13[%c0_279, %c159] : memref<8x512xf32, #tpu.memory_space<vmem>>, vector<8x192xf32>
    %c-1_i32_280 = arith.constant -1 : i32
    %612 = vector.broadcast %c-1_i32_280 : i32 to vector<1x192xi32>
    %613 = arith.addi %0, %612 : vector<1x192xi32>
    %c0_i32_281 = arith.constant 0 : i32
    %614 = vector.broadcast %c0_i32_281 : i32 to vector<1x192xi32>
    %615 = arith.cmpi sge, %613, %614 : vector<1x192xi32>
    %c16_i32_282 = arith.constant 16 : i32
    %616 = vector.broadcast %c16_i32_282 : i32 to vector<1x192xi32>
    %617 = arith.cmpi slt, %613, %616 : vector<1x192xi32>
    %618 = arith.andi %615, %617 : vector<1x192xi1>
    %cst_283 = arith.constant 0.000000e+00 : f32
    %619 = vector.shape_cast %618 : vector<1x192xi1> to vector<1x192xi1>
    %620 = vector.broadcast %619 : vector<1x192xi1> to vector<8x192xi1>
    %621 = vector.broadcast %cst_283 : f32 to vector<8x192xf32>
    %622 = arith.select %620, %611, %621 : vector<8x192xi1>, vector<8x192xf32>
    %c0_284 = arith.constant 0 : index
    %c160_285 = arith.constant 160 : index
    %623 = vector.load %arg13[%c0_284, %c160_285] : memref<8x512xf32, #tpu.memory_space<vmem>>, vector<8x192xf32>
    %c0_i32_286 = arith.constant 0 : i32
    %624 = vector.broadcast %c0_i32_286 : i32 to vector<1x192xi32>
    %625 = arith.addi %0, %624 : vector<1x192xi32>
    %c0_i32_287 = arith.constant 0 : i32
    %626 = vector.broadcast %c0_i32_287 : i32 to vector<1x192xi32>
    %627 = arith.cmpi sge, %625, %626 : vector<1x192xi32>
    %c16_i32_288 = arith.constant 16 : i32
    %628 = vector.broadcast %c16_i32_288 : i32 to vector<1x192xi32>
    %629 = arith.cmpi slt, %625, %628 : vector<1x192xi32>
    %630 = arith.andi %627, %629 : vector<1x192xi1>
    %cst_289 = arith.constant 0.000000e+00 : f32
    %631 = vector.shape_cast %630 : vector<1x192xi1> to vector<1x192xi1>
    %632 = vector.broadcast %631 : vector<1x192xi1> to vector<8x192xi1>
    %633 = vector.broadcast %cst_289 : f32 to vector<8x192xf32>
    %634 = arith.select %632, %623, %633 : vector<8x192xi1>, vector<8x192xf32>
    %c0_290 = arith.constant 0 : index
    %c161_291 = arith.constant 161 : index
    %635 = vector.load %arg13[%c0_290, %c161_291] : memref<8x512xf32, #tpu.memory_space<vmem>>, vector<8x192xf32>
    %c1_i32_292 = arith.constant 1 : i32
    %636 = vector.broadcast %c1_i32_292 : i32 to vector<1x192xi32>
    %637 = arith.addi %0, %636 : vector<1x192xi32>
    %c0_i32_293 = arith.constant 0 : i32
    %638 = vector.broadcast %c0_i32_293 : i32 to vector<1x192xi32>
    %639 = arith.cmpi sge, %637, %638 : vector<1x192xi32>
    %c16_i32_294 = arith.constant 16 : i32
    %640 = vector.broadcast %c16_i32_294 : i32 to vector<1x192xi32>
    %641 = arith.cmpi slt, %637, %640 : vector<1x192xi32>
    %642 = arith.andi %639, %641 : vector<1x192xi1>
    %cst_295 = arith.constant 0.000000e+00 : f32
    %643 = vector.shape_cast %642 : vector<1x192xi1> to vector<1x192xi1>
    %644 = vector.broadcast %643 : vector<1x192xi1> to vector<8x192xi1>
    %645 = vector.broadcast %cst_295 : f32 to vector<8x192xf32>
    %646 = arith.select %644, %635, %645 : vector<8x192xi1>, vector<8x192xf32>
    %c0_296 = arith.constant 0 : index
    %c162_297 = arith.constant 162 : index
    %647 = vector.load %arg13[%c0_296, %c162_297] : memref<8x512xf32, #tpu.memory_space<vmem>>, vector<8x192xf32>
    %c2_i32_298 = arith.constant 2 : i32
    %648 = vector.broadcast %c2_i32_298 : i32 to vector<1x192xi32>
    %649 = arith.addi %0, %648 : vector<1x192xi32>
    %c0_i32_299 = arith.constant 0 : i32
    %650 = vector.broadcast %c0_i32_299 : i32 to vector<1x192xi32>
    %651 = arith.cmpi sge, %649, %650 : vector<1x192xi32>
    %c16_i32_300 = arith.constant 16 : i32
    %652 = vector.broadcast %c16_i32_300 : i32 to vector<1x192xi32>
    %653 = arith.cmpi slt, %649, %652 : vector<1x192xi32>
    %654 = arith.andi %651, %653 : vector<1x192xi1>
    %cst_301 = arith.constant 0.000000e+00 : f32
    %655 = vector.shape_cast %654 : vector<1x192xi1> to vector<1x192xi1>
    %656 = vector.broadcast %655 : vector<1x192xi1> to vector<8x192xi1>
    %657 = vector.broadcast %cst_301 : f32 to vector<8x192xf32>
    %658 = arith.select %656, %647, %657 : vector<8x192xi1>, vector<8x192xf32>
    %c0_302 = arith.constant 0 : index
    %c163_303 = arith.constant 163 : index
    %659 = vector.load %arg13[%c0_302, %c163_303] : memref<8x512xf32, #tpu.memory_space<vmem>>, vector<8x192xf32>
    %c3_i32_304 = arith.constant 3 : i32
    %660 = vector.broadcast %c3_i32_304 : i32 to vector<1x192xi32>
    %661 = arith.addi %0, %660 : vector<1x192xi32>
    %c0_i32_305 = arith.constant 0 : i32
    %662 = vector.broadcast %c0_i32_305 : i32 to vector<1x192xi32>
    %663 = arith.cmpi sge, %661, %662 : vector<1x192xi32>
    %c16_i32_306 = arith.constant 16 : i32
    %664 = vector.broadcast %c16_i32_306 : i32 to vector<1x192xi32>
    %665 = arith.cmpi slt, %661, %664 : vector<1x192xi32>
    %666 = arith.andi %663, %665 : vector<1x192xi1>
    %cst_307 = arith.constant 0.000000e+00 : f32
    %667 = vector.shape_cast %666 : vector<1x192xi1> to vector<1x192xi1>
    %668 = vector.broadcast %667 : vector<1x192xi1> to vector<8x192xi1>
    %669 = vector.broadcast %cst_307 : f32 to vector<8x192xf32>
    %670 = arith.select %668, %659, %669 : vector<8x192xi1>, vector<8x192xf32>
    %c0_308 = arith.constant 0 : index
    %c164_309 = arith.constant 164 : index
    %671 = vector.load %arg13[%c0_308, %c164_309] : memref<8x512xf32, #tpu.memory_space<vmem>>, vector<8x192xf32>
    %c4_i32_310 = arith.constant 4 : i32
    %672 = vector.broadcast %c4_i32_310 : i32 to vector<1x192xi32>
    %673 = arith.addi %0, %672 : vector<1x192xi32>
    %c0_i32_311 = arith.constant 0 : i32
    %674 = vector.broadcast %c0_i32_311 : i32 to vector<1x192xi32>
    %675 = arith.cmpi sge, %673, %674 : vector<1x192xi32>
    %c16_i32_312 = arith.constant 16 : i32
    %676 = vector.broadcast %c16_i32_312 : i32 to vector<1x192xi32>
    %677 = arith.cmpi slt, %673, %676 : vector<1x192xi32>
    %678 = arith.andi %675, %677 : vector<1x192xi1>
    %cst_313 = arith.constant 0.000000e+00 : f32
    %679 = vector.shape_cast %678 : vector<1x192xi1> to vector<1x192xi1>
    %680 = vector.broadcast %679 : vector<1x192xi1> to vector<8x192xi1>
    %681 = vector.broadcast %cst_313 : f32 to vector<8x192xf32>
    %682 = arith.select %680, %671, %681 : vector<8x192xi1>, vector<8x192xf32>
    %c0_314 = arith.constant 0 : index
    %c165 = arith.constant 165 : index
    %683 = vector.load %arg13[%c0_314, %c165] : memref<8x512xf32, #tpu.memory_space<vmem>>, vector<8x192xf32>
    %c5_i32_315 = arith.constant 5 : i32
    %684 = vector.broadcast %c5_i32_315 : i32 to vector<1x192xi32>
    %685 = arith.addi %0, %684 : vector<1x192xi32>
    %c0_i32_316 = arith.constant 0 : i32
    %686 = vector.broadcast %c0_i32_316 : i32 to vector<1x192xi32>
    %687 = arith.cmpi sge, %685, %686 : vector<1x192xi32>
    %c16_i32_317 = arith.constant 16 : i32
    %688 = vector.broadcast %c16_i32_317 : i32 to vector<1x192xi32>
    %689 = arith.cmpi slt, %685, %688 : vector<1x192xi32>
    %690 = arith.andi %687, %689 : vector<1x192xi1>
    %cst_318 = arith.constant 0.000000e+00 : f32
    %691 = vector.shape_cast %690 : vector<1x192xi1> to vector<1x192xi1>
    %692 = vector.broadcast %691 : vector<1x192xi1> to vector<8x192xi1>
    %693 = vector.broadcast %cst_318 : f32 to vector<8x192xf32>
    %694 = arith.select %692, %683, %693 : vector<8x192xi1>, vector<8x192xf32>
    %695 = tpu.concatenate %622, %634, %646, %658, %670, %682, %694 in 0 : vector<8x192xf32>, vector<8x192xf32>, vector<8x192xf32>, vector<8x192xf32>, vector<8x192xf32>, vector<8x192xf32>, vector<8x192xf32> -> vector<56x192xf32>
    %c3_319 = arith.constant 3 : index
    %c0_320 = arith.constant 0 : index
    %c0_321 = arith.constant 0 : index
    %696 = vector.load %arg5[%c3_319, %c0_320, %c0_321] : memref<7x8x56xf32, #tpu.memory_space<vmem>>, vector<1x8x56xf32>
    %697 = vector.shape_cast %696 : vector<1x8x56xf32> to vector<8x56xf32>
    %cst_322 = arith.constant dense<0.000000e+00> : vector<8x192xf32>
    %698 = tpu.matmul %697, %695, %cst_322 {dimension_numbers = #tpu.dot_dimension_numbers<[1], [0], [0], [1], [0, 0, 1, 1], [], []>} : vector<8x56xf32>, vector<56x192xf32>, vector<8x192xf32> -> vector<8x192xf32>
    %699 = arith.addf %610, %698 : vector<8x192xf32>
    %c0_323 = arith.constant 0 : index
    %c175 = arith.constant 175 : index
    %700 = vector.load %arg13[%c0_323, %c175] : memref<8x512xf32, #tpu.memory_space<vmem>>, vector<8x192xf32>
    %c-1_i32_324 = arith.constant -1 : i32
    %701 = vector.broadcast %c-1_i32_324 : i32 to vector<1x192xi32>
    %702 = arith.addi %0, %701 : vector<1x192xi32>
    %c0_i32_325 = arith.constant 0 : i32
    %703 = vector.broadcast %c0_i32_325 : i32 to vector<1x192xi32>
    %704 = arith.cmpi sge, %702, %703 : vector<1x192xi32>
    %c16_i32_326 = arith.constant 16 : i32
    %705 = vector.broadcast %c16_i32_326 : i32 to vector<1x192xi32>
    %706 = arith.cmpi slt, %702, %705 : vector<1x192xi32>
    %707 = arith.andi %704, %706 : vector<1x192xi1>
    %cst_327 = arith.constant 0.000000e+00 : f32
    %708 = vector.shape_cast %707 : vector<1x192xi1> to vector<1x192xi1>
    %709 = vector.broadcast %708 : vector<1x192xi1> to vector<8x192xi1>
    %710 = vector.broadcast %cst_327 : f32 to vector<8x192xf32>
    %711 = arith.select %709, %700, %710 : vector<8x192xi1>, vector<8x192xf32>
    %c0_328 = arith.constant 0 : index
    %c176_329 = arith.constant 176 : index
    %712 = vector.load %arg13[%c0_328, %c176_329] : memref<8x512xf32, #tpu.memory_space<vmem>>, vector<8x192xf32>
    %c0_i32_330 = arith.constant 0 : i32
    %713 = vector.broadcast %c0_i32_330 : i32 to vector<1x192xi32>
    %714 = arith.addi %0, %713 : vector<1x192xi32>
    %c0_i32_331 = arith.constant 0 : i32
    %715 = vector.broadcast %c0_i32_331 : i32 to vector<1x192xi32>
    %716 = arith.cmpi sge, %714, %715 : vector<1x192xi32>
    %c16_i32_332 = arith.constant 16 : i32
    %717 = vector.broadcast %c16_i32_332 : i32 to vector<1x192xi32>
    %718 = arith.cmpi slt, %714, %717 : vector<1x192xi32>
    %719 = arith.andi %716, %718 : vector<1x192xi1>
    %cst_333 = arith.constant 0.000000e+00 : f32
    %720 = vector.shape_cast %719 : vector<1x192xi1> to vector<1x192xi1>
    %721 = vector.broadcast %720 : vector<1x192xi1> to vector<8x192xi1>
    %722 = vector.broadcast %cst_333 : f32 to vector<8x192xf32>
    %723 = arith.select %721, %712, %722 : vector<8x192xi1>, vector<8x192xf32>
    %c0_334 = arith.constant 0 : index
    %c177_335 = arith.constant 177 : index
    %724 = vector.load %arg13[%c0_334, %c177_335] : memref<8x512xf32, #tpu.memory_space<vmem>>, vector<8x192xf32>
    %c1_i32_336 = arith.constant 1 : i32
    %725 = vector.broadcast %c1_i32_336 : i32 to vector<1x192xi32>
    %726 = arith.addi %0, %725 : vector<1x192xi32>
    %c0_i32_337 = arith.constant 0 : i32
    %727 = vector.broadcast %c0_i32_337 : i32 to vector<1x192xi32>
    %728 = arith.cmpi sge, %726, %727 : vector<1x192xi32>
    %c16_i32_338 = arith.constant 16 : i32
    %729 = vector.broadcast %c16_i32_338 : i32 to vector<1x192xi32>
    %730 = arith.cmpi slt, %726, %729 : vector<1x192xi32>
    %731 = arith.andi %728, %730 : vector<1x192xi1>
    %cst_339 = arith.constant 0.000000e+00 : f32
    %732 = vector.shape_cast %731 : vector<1x192xi1> to vector<1x192xi1>
    %733 = vector.broadcast %732 : vector<1x192xi1> to vector<8x192xi1>
    %734 = vector.broadcast %cst_339 : f32 to vector<8x192xf32>
    %735 = arith.select %733, %724, %734 : vector<8x192xi1>, vector<8x192xf32>
    %c0_340 = arith.constant 0 : index
    %c178_341 = arith.constant 178 : index
    %736 = vector.load %arg13[%c0_340, %c178_341] : memref<8x512xf32, #tpu.memory_space<vmem>>, vector<8x192xf32>
    %c2_i32_342 = arith.constant 2 : i32
    %737 = vector.broadcast %c2_i32_342 : i32 to vector<1x192xi32>
    %738 = arith.addi %0, %737 : vector<1x192xi32>
    %c0_i32_343 = arith.constant 0 : i32
    %739 = vector.broadcast %c0_i32_343 : i32 to vector<1x192xi32>
    %740 = arith.cmpi sge, %738, %739 : vector<1x192xi32>
    %c16_i32_344 = arith.constant 16 : i32
    %741 = vector.broadcast %c16_i32_344 : i32 to vector<1x192xi32>
    %742 = arith.cmpi slt, %738, %741 : vector<1x192xi32>
    %743 = arith.andi %740, %742 : vector<1x192xi1>
    %cst_345 = arith.constant 0.000000e+00 : f32
    %744 = vector.shape_cast %743 : vector<1x192xi1> to vector<1x192xi1>
    %745 = vector.broadcast %744 : vector<1x192xi1> to vector<8x192xi1>
    %746 = vector.broadcast %cst_345 : f32 to vector<8x192xf32>
    %747 = arith.select %745, %736, %746 : vector<8x192xi1>, vector<8x192xf32>
    %c0_346 = arith.constant 0 : index
    %c179_347 = arith.constant 179 : index
    %748 = vector.load %arg13[%c0_346, %c179_347] : memref<8x512xf32, #tpu.memory_space<vmem>>, vector<8x192xf32>
    %c3_i32_348 = arith.constant 3 : i32
    %749 = vector.broadcast %c3_i32_348 : i32 to vector<1x192xi32>
    %750 = arith.addi %0, %749 : vector<1x192xi32>
    %c0_i32_349 = arith.constant 0 : i32
    %751 = vector.broadcast %c0_i32_349 : i32 to vector<1x192xi32>
    %752 = arith.cmpi sge, %750, %751 : vector<1x192xi32>
    %c16_i32_350 = arith.constant 16 : i32
    %753 = vector.broadcast %c16_i32_350 : i32 to vector<1x192xi32>
    %754 = arith.cmpi slt, %750, %753 : vector<1x192xi32>
    %755 = arith.andi %752, %754 : vector<1x192xi1>
    %cst_351 = arith.constant 0.000000e+00 : f32
    %756 = vector.shape_cast %755 : vector<1x192xi1> to vector<1x192xi1>
    %757 = vector.broadcast %756 : vector<1x192xi1> to vector<8x192xi1>
    %758 = vector.broadcast %cst_351 : f32 to vector<8x192xf32>
    %759 = arith.select %757, %748, %758 : vector<8x192xi1>, vector<8x192xf32>
    %c0_352 = arith.constant 0 : index
    %c180_353 = arith.constant 180 : index
    %760 = vector.load %arg13[%c0_352, %c180_353] : memref<8x512xf32, #tpu.memory_space<vmem>>, vector<8x192xf32>
    %c4_i32_354 = arith.constant 4 : i32
    %761 = vector.broadcast %c4_i32_354 : i32 to vector<1x192xi32>
    %762 = arith.addi %0, %761 : vector<1x192xi32>
    %c0_i32_355 = arith.constant 0 : i32
    %763 = vector.broadcast %c0_i32_355 : i32 to vector<1x192xi32>
    %764 = arith.cmpi sge, %762, %763 : vector<1x192xi32>
    %c16_i32_356 = arith.constant 16 : i32
    %765 = vector.broadcast %c16_i32_356 : i32 to vector<1x192xi32>
    %766 = arith.cmpi slt, %762, %765 : vector<1x192xi32>
    %767 = arith.andi %764, %766 : vector<1x192xi1>
    %cst_357 = arith.constant 0.000000e+00 : f32
    %768 = vector.shape_cast %767 : vector<1x192xi1> to vector<1x192xi1>
    %769 = vector.broadcast %768 : vector<1x192xi1> to vector<8x192xi1>
    %770 = vector.broadcast %cst_357 : f32 to vector<8x192xf32>
    %771 = arith.select %769, %760, %770 : vector<8x192xi1>, vector<8x192xf32>
    %c0_358 = arith.constant 0 : index
    %c181 = arith.constant 181 : index
    %772 = vector.load %arg13[%c0_358, %c181] : memref<8x512xf32, #tpu.memory_space<vmem>>, vector<8x192xf32>
    %c5_i32_359 = arith.constant 5 : i32
    %773 = vector.broadcast %c5_i32_359 : i32 to vector<1x192xi32>
    %774 = arith.addi %0, %773 : vector<1x192xi32>
    %c0_i32_360 = arith.constant 0 : i32
    %775 = vector.broadcast %c0_i32_360 : i32 to vector<1x192xi32>
    %776 = arith.cmpi sge, %774, %775 : vector<1x192xi32>
    %c16_i32_361 = arith.constant 16 : i32
    %777 = vector.broadcast %c16_i32_361 : i32 to vector<1x192xi32>
    %778 = arith.cmpi slt, %774, %777 : vector<1x192xi32>
    %779 = arith.andi %776, %778 : vector<1x192xi1>
    %cst_362 = arith.constant 0.000000e+00 : f32
    %780 = vector.shape_cast %779 : vector<1x192xi1> to vector<1x192xi1>
    %781 = vector.broadcast %780 : vector<1x192xi1> to vector<8x192xi1>
    %782 = vector.broadcast %cst_362 : f32 to vector<8x192xf32>
    %783 = arith.select %781, %772, %782 : vector<8x192xi1>, vector<8x192xf32>
    %784 = tpu.concatenate %711, %723, %735, %747, %759, %771, %783 in 0 : vector<8x192xf32>, vector<8x192xf32>, vector<8x192xf32>, vector<8x192xf32>, vector<8x192xf32>, vector<8x192xf32>, vector<8x192xf32> -> vector<56x192xf32>
    %c4_363 = arith.constant 4 : index
    %c0_364 = arith.constant 0 : index
    %c0_365 = arith.constant 0 : index
    %785 = vector.load %arg5[%c4_363, %c0_364, %c0_365] : memref<7x8x56xf32, #tpu.memory_space<vmem>>, vector<1x8x56xf32>
    %786 = vector.shape_cast %785 : vector<1x8x56xf32> to vector<8x56xf32>
    %cst_366 = arith.constant dense<0.000000e+00> : vector<8x192xf32>
    %787 = tpu.matmul %786, %784, %cst_366 {dimension_numbers = #tpu.dot_dimension_numbers<[1], [0], [0], [1], [0, 0, 1, 1], [], []>} : vector<8x56xf32>, vector<56x192xf32>, vector<8x192xf32> -> vector<8x192xf32>
    %788 = arith.addf %699, %787 : vector<8x192xf32>
    %c0_367 = arith.constant 0 : index
    %c191 = arith.constant 191 : index
    %789 = vector.load %arg13[%c0_367, %c191] : memref<8x512xf32, #tpu.memory_space<vmem>>, vector<8x192xf32>
    %c-1_i32_368 = arith.constant -1 : i32
    %790 = vector.broadcast %c-1_i32_368 : i32 to vector<1x192xi32>
    %791 = arith.addi %0, %790 : vector<1x192xi32>
    %c0_i32_369 = arith.constant 0 : i32
    %792 = vector.broadcast %c0_i32_369 : i32 to vector<1x192xi32>
    %793 = arith.cmpi sge, %791, %792 : vector<1x192xi32>
    %c16_i32_370 = arith.constant 16 : i32
    %794 = vector.broadcast %c16_i32_370 : i32 to vector<1x192xi32>
    %795 = arith.cmpi slt, %791, %794 : vector<1x192xi32>
    %796 = arith.andi %793, %795 : vector<1x192xi1>
    %cst_371 = arith.constant 0.000000e+00 : f32
    %797 = vector.shape_cast %796 : vector<1x192xi1> to vector<1x192xi1>
    %798 = vector.broadcast %797 : vector<1x192xi1> to vector<8x192xi1>
    %799 = vector.broadcast %cst_371 : f32 to vector<8x192xf32>
    %800 = arith.select %798, %789, %799 : vector<8x192xi1>, vector<8x192xf32>
    %c0_372 = arith.constant 0 : index
    %c192_373 = arith.constant 192 : index
    %801 = vector.load %arg13[%c0_372, %c192_373] : memref<8x512xf32, #tpu.memory_space<vmem>>, vector<8x192xf32>
    %c0_i32_374 = arith.constant 0 : i32
    %802 = vector.broadcast %c0_i32_374 : i32 to vector<1x192xi32>
    %803 = arith.addi %0, %802 : vector<1x192xi32>
    %c0_i32_375 = arith.constant 0 : i32
    %804 = vector.broadcast %c0_i32_375 : i32 to vector<1x192xi32>
    %805 = arith.cmpi sge, %803, %804 : vector<1x192xi32>
    %c16_i32_376 = arith.constant 16 : i32
    %806 = vector.broadcast %c16_i32_376 : i32 to vector<1x192xi32>
    %807 = arith.cmpi slt, %803, %806 : vector<1x192xi32>
    %808 = arith.andi %805, %807 : vector<1x192xi1>
    %cst_377 = arith.constant 0.000000e+00 : f32
    %809 = vector.shape_cast %808 : vector<1x192xi1> to vector<1x192xi1>
    %810 = vector.broadcast %809 : vector<1x192xi1> to vector<8x192xi1>
    %811 = vector.broadcast %cst_377 : f32 to vector<8x192xf32>
    %812 = arith.select %810, %801, %811 : vector<8x192xi1>, vector<8x192xf32>
    %c0_378 = arith.constant 0 : index
    %c193_379 = arith.constant 193 : index
    %813 = vector.load %arg13[%c0_378, %c193_379] : memref<8x512xf32, #tpu.memory_space<vmem>>, vector<8x192xf32>
    %c1_i32_380 = arith.constant 1 : i32
    %814 = vector.broadcast %c1_i32_380 : i32 to vector<1x192xi32>
    %815 = arith.addi %0, %814 : vector<1x192xi32>
    %c0_i32_381 = arith.constant 0 : i32
    %816 = vector.broadcast %c0_i32_381 : i32 to vector<1x192xi32>
    %817 = arith.cmpi sge, %815, %816 : vector<1x192xi32>
    %c16_i32_382 = arith.constant 16 : i32
    %818 = vector.broadcast %c16_i32_382 : i32 to vector<1x192xi32>
    %819 = arith.cmpi slt, %815, %818 : vector<1x192xi32>
    %820 = arith.andi %817, %819 : vector<1x192xi1>
    %cst_383 = arith.constant 0.000000e+00 : f32
    %821 = vector.shape_cast %820 : vector<1x192xi1> to vector<1x192xi1>
    %822 = vector.broadcast %821 : vector<1x192xi1> to vector<8x192xi1>
    %823 = vector.broadcast %cst_383 : f32 to vector<8x192xf32>
    %824 = arith.select %822, %813, %823 : vector<8x192xi1>, vector<8x192xf32>
    %c0_384 = arith.constant 0 : index
    %c194_385 = arith.constant 194 : index
    %825 = vector.load %arg13[%c0_384, %c194_385] : memref<8x512xf32, #tpu.memory_space<vmem>>, vector<8x192xf32>
    %c2_i32_386 = arith.constant 2 : i32
    %826 = vector.broadcast %c2_i32_386 : i32 to vector<1x192xi32>
    %827 = arith.addi %0, %826 : vector<1x192xi32>
    %c0_i32_387 = arith.constant 0 : i32
    %828 = vector.broadcast %c0_i32_387 : i32 to vector<1x192xi32>
    %829 = arith.cmpi sge, %827, %828 : vector<1x192xi32>
    %c16_i32_388 = arith.constant 16 : i32
    %830 = vector.broadcast %c16_i32_388 : i32 to vector<1x192xi32>
    %831 = arith.cmpi slt, %827, %830 : vector<1x192xi32>
    %832 = arith.andi %829, %831 : vector<1x192xi1>
    %cst_389 = arith.constant 0.000000e+00 : f32
    %833 = vector.shape_cast %832 : vector<1x192xi1> to vector<1x192xi1>
    %834 = vector.broadcast %833 : vector<1x192xi1> to vector<8x192xi1>
    %835 = vector.broadcast %cst_389 : f32 to vector<8x192xf32>
    %836 = arith.select %834, %825, %835 : vector<8x192xi1>, vector<8x192xf32>
    %c0_390 = arith.constant 0 : index
    %c195_391 = arith.constant 195 : index
    %837 = vector.load %arg13[%c0_390, %c195_391] : memref<8x512xf32, #tpu.memory_space<vmem>>, vector<8x192xf32>
    %c3_i32_392 = arith.constant 3 : i32
    %838 = vector.broadcast %c3_i32_392 : i32 to vector<1x192xi32>
    %839 = arith.addi %0, %838 : vector<1x192xi32>
    %c0_i32_393 = arith.constant 0 : i32
    %840 = vector.broadcast %c0_i32_393 : i32 to vector<1x192xi32>
    %841 = arith.cmpi sge, %839, %840 : vector<1x192xi32>
    %c16_i32_394 = arith.constant 16 : i32
    %842 = vector.broadcast %c16_i32_394 : i32 to vector<1x192xi32>
    %843 = arith.cmpi slt, %839, %842 : vector<1x192xi32>
    %844 = arith.andi %841, %843 : vector<1x192xi1>
    %cst_395 = arith.constant 0.000000e+00 : f32
    %845 = vector.shape_cast %844 : vector<1x192xi1> to vector<1x192xi1>
    %846 = vector.broadcast %845 : vector<1x192xi1> to vector<8x192xi1>
    %847 = vector.broadcast %cst_395 : f32 to vector<8x192xf32>
    %848 = arith.select %846, %837, %847 : vector<8x192xi1>, vector<8x192xf32>
    %c0_396 = arith.constant 0 : index
    %c196_397 = arith.constant 196 : index
    %849 = vector.load %arg13[%c0_396, %c196_397] : memref<8x512xf32, #tpu.memory_space<vmem>>, vector<8x192xf32>
    %c4_i32_398 = arith.constant 4 : i32
    %850 = vector.broadcast %c4_i32_398 : i32 to vector<1x192xi32>
    %851 = arith.addi %0, %850 : vector<1x192xi32>
    %c0_i32_399 = arith.constant 0 : i32
    %852 = vector.broadcast %c0_i32_399 : i32 to vector<1x192xi32>
    %853 = arith.cmpi sge, %851, %852 : vector<1x192xi32>
    %c16_i32_400 = arith.constant 16 : i32
    %854 = vector.broadcast %c16_i32_400 : i32 to vector<1x192xi32>
    %855 = arith.cmpi slt, %851, %854 : vector<1x192xi32>
    %856 = arith.andi %853, %855 : vector<1x192xi1>
    %cst_401 = arith.constant 0.000000e+00 : f32
    %857 = vector.shape_cast %856 : vector<1x192xi1> to vector<1x192xi1>
    %858 = vector.broadcast %857 : vector<1x192xi1> to vector<8x192xi1>
    %859 = vector.broadcast %cst_401 : f32 to vector<8x192xf32>
    %860 = arith.select %858, %849, %859 : vector<8x192xi1>, vector<8x192xf32>
    %c0_402 = arith.constant 0 : index
    %c197 = arith.constant 197 : index
    %861 = vector.load %arg13[%c0_402, %c197] : memref<8x512xf32, #tpu.memory_space<vmem>>, vector<8x192xf32>
    %c5_i32_403 = arith.constant 5 : i32
    %862 = vector.broadcast %c5_i32_403 : i32 to vector<1x192xi32>
    %863 = arith.addi %0, %862 : vector<1x192xi32>
    %c0_i32_404 = arith.constant 0 : i32
    %864 = vector.broadcast %c0_i32_404 : i32 to vector<1x192xi32>
    %865 = arith.cmpi sge, %863, %864 : vector<1x192xi32>
    %c16_i32_405 = arith.constant 16 : i32
    %866 = vector.broadcast %c16_i32_405 : i32 to vector<1x192xi32>
    %867 = arith.cmpi slt, %863, %866 : vector<1x192xi32>
    %868 = arith.andi %865, %867 : vector<1x192xi1>
    %cst_406 = arith.constant 0.000000e+00 : f32
    %869 = vector.shape_cast %868 : vector<1x192xi1> to vector<1x192xi1>
    %870 = vector.broadcast %869 : vector<1x192xi1> to vector<8x192xi1>
    %871 = vector.broadcast %cst_406 : f32 to vector<8x192xf32>
    %872 = arith.select %870, %861, %871 : vector<8x192xi1>, vector<8x192xf32>
    %873 = tpu.concatenate %800, %812, %824, %836, %848, %860, %872 in 0 : vector<8x192xf32>, vector<8x192xf32>, vector<8x192xf32>, vector<8x192xf32>, vector<8x192xf32>, vector<8x192xf32>, vector<8x192xf32> -> vector<56x192xf32>
    %c5 = arith.constant 5 : index
    %c0_407 = arith.constant 0 : index
    %c0_408 = arith.constant 0 : index
    %874 = vector.load %arg5[%c5, %c0_407, %c0_408] : memref<7x8x56xf32, #tpu.memory_space<vmem>>, vector<1x8x56xf32>
    %875 = vector.shape_cast %874 : vector<1x8x56xf32> to vector<8x56xf32>
    %cst_409 = arith.constant dense<0.000000e+00> : vector<8x192xf32>
    %876 = tpu.matmul %875, %873, %cst_409 {dimension_numbers = #tpu.dot_dimension_numbers<[1], [0], [0], [1], [0, 0, 1, 1], [], []>} : vector<8x56xf32>, vector<56x192xf32>, vector<8x192xf32> -> vector<8x192xf32>
    %877 = arith.addf %788, %876 : vector<8x192xf32>
    %c0_410 = arith.constant 0 : index
    %c207 = arith.constant 207 : index
    %878 = vector.load %arg13[%c0_410, %c207] : memref<8x512xf32, #tpu.memory_space<vmem>>, vector<8x192xf32>
    %c-1_i32_411 = arith.constant -1 : i32
    %879 = vector.broadcast %c-1_i32_411 : i32 to vector<1x192xi32>
    %880 = arith.addi %0, %879 : vector<1x192xi32>
    %c0_i32_412 = arith.constant 0 : i32
    %881 = vector.broadcast %c0_i32_412 : i32 to vector<1x192xi32>
    %882 = arith.cmpi sge, %880, %881 : vector<1x192xi32>
    %c16_i32_413 = arith.constant 16 : i32
    %883 = vector.broadcast %c16_i32_413 : i32 to vector<1x192xi32>
    %884 = arith.cmpi slt, %880, %883 : vector<1x192xi32>
    %885 = arith.andi %882, %884 : vector<1x192xi1>
    %cst_414 = arith.constant 0.000000e+00 : f32
    %886 = vector.shape_cast %885 : vector<1x192xi1> to vector<1x192xi1>
    %887 = vector.broadcast %886 : vector<1x192xi1> to vector<8x192xi1>
    %888 = vector.broadcast %cst_414 : f32 to vector<8x192xf32>
    %889 = arith.select %887, %878, %888 : vector<8x192xi1>, vector<8x192xf32>
    %c0_415 = arith.constant 0 : index
    %c208 = arith.constant 208 : index
    %890 = vector.load %arg13[%c0_415, %c208] : memref<8x512xf32, #tpu.memory_space<vmem>>, vector<8x192xf32>
    %c0_i32_416 = arith.constant 0 : i32
    %891 = vector.broadcast %c0_i32_416 : i32 to vector<1x192xi32>
    %892 = arith.addi %0, %891 : vector<1x192xi32>
    %c0_i32_417 = arith.constant 0 : i32
    %893 = vector.broadcast %c0_i32_417 : i32 to vector<1x192xi32>
    %894 = arith.cmpi sge, %892, %893 : vector<1x192xi32>
    %c16_i32_418 = arith.constant 16 : i32
    %895 = vector.broadcast %c16_i32_418 : i32 to vector<1x192xi32>
    %896 = arith.cmpi slt, %892, %895 : vector<1x192xi32>
    %897 = arith.andi %894, %896 : vector<1x192xi1>
    %cst_419 = arith.constant 0.000000e+00 : f32
    %898 = vector.shape_cast %897 : vector<1x192xi1> to vector<1x192xi1>
    %899 = vector.broadcast %898 : vector<1x192xi1> to vector<8x192xi1>
    %900 = vector.broadcast %cst_419 : f32 to vector<8x192xf32>
    %901 = arith.select %899, %890, %900 : vector<8x192xi1>, vector<8x192xf32>
    %c0_420 = arith.constant 0 : index
    %c209 = arith.constant 209 : index
    %902 = vector.load %arg13[%c0_420, %c209] : memref<8x512xf32, #tpu.memory_space<vmem>>, vector<8x192xf32>
    %c1_i32_421 = arith.constant 1 : i32
    %903 = vector.broadcast %c1_i32_421 : i32 to vector<1x192xi32>
    %904 = arith.addi %0, %903 : vector<1x192xi32>
    %c0_i32_422 = arith.constant 0 : i32
    %905 = vector.broadcast %c0_i32_422 : i32 to vector<1x192xi32>
    %906 = arith.cmpi sge, %904, %905 : vector<1x192xi32>
    %c16_i32_423 = arith.constant 16 : i32
    %907 = vector.broadcast %c16_i32_423 : i32 to vector<1x192xi32>
    %908 = arith.cmpi slt, %904, %907 : vector<1x192xi32>
    %909 = arith.andi %906, %908 : vector<1x192xi1>
    %cst_424 = arith.constant 0.000000e+00 : f32
    %910 = vector.shape_cast %909 : vector<1x192xi1> to vector<1x192xi1>
    %911 = vector.broadcast %910 : vector<1x192xi1> to vector<8x192xi1>
    %912 = vector.broadcast %cst_424 : f32 to vector<8x192xf32>
    %913 = arith.select %911, %902, %912 : vector<8x192xi1>, vector<8x192xf32>
    %c0_425 = arith.constant 0 : index
    %c210 = arith.constant 210 : index
    %914 = vector.load %arg13[%c0_425, %c210] : memref<8x512xf32, #tpu.memory_space<vmem>>, vector<8x192xf32>
    %c2_i32_426 = arith.constant 2 : i32
    %915 = vector.broadcast %c2_i32_426 : i32 to vector<1x192xi32>
    %916 = arith.addi %0, %915 : vector<1x192xi32>
    %c0_i32_427 = arith.constant 0 : i32
    %917 = vector.broadcast %c0_i32_427 : i32 to vector<1x192xi32>
    %918 = arith.cmpi sge, %916, %917 : vector<1x192xi32>
    %c16_i32_428 = arith.constant 16 : i32
    %919 = vector.broadcast %c16_i32_428 : i32 to vector<1x192xi32>
    %920 = arith.cmpi slt, %916, %919 : vector<1x192xi32>
    %921 = arith.andi %918, %920 : vector<1x192xi1>
    %cst_429 = arith.constant 0.000000e+00 : f32
    %922 = vector.shape_cast %921 : vector<1x192xi1> to vector<1x192xi1>
    %923 = vector.broadcast %922 : vector<1x192xi1> to vector<8x192xi1>
    %924 = vector.broadcast %cst_429 : f32 to vector<8x192xf32>
    %925 = arith.select %923, %914, %924 : vector<8x192xi1>, vector<8x192xf32>
    %c0_430 = arith.constant 0 : index
    %c211 = arith.constant 211 : index
    %926 = vector.load %arg13[%c0_430, %c211] : memref<8x512xf32, #tpu.memory_space<vmem>>, vector<8x192xf32>
    %c3_i32_431 = arith.constant 3 : i32
    %927 = vector.broadcast %c3_i32_431 : i32 to vector<1x192xi32>
    %928 = arith.addi %0, %927 : vector<1x192xi32>
    %c0_i32_432 = arith.constant 0 : i32
    %929 = vector.broadcast %c0_i32_432 : i32 to vector<1x192xi32>
    %930 = arith.cmpi sge, %928, %929 : vector<1x192xi32>
    %c16_i32_433 = arith.constant 16 : i32
    %931 = vector.broadcast %c16_i32_433 : i32 to vector<1x192xi32>
    %932 = arith.cmpi slt, %928, %931 : vector<1x192xi32>
    %933 = arith.andi %930, %932 : vector<1x192xi1>
    %cst_434 = arith.constant 0.000000e+00 : f32
    %934 = vector.shape_cast %933 : vector<1x192xi1> to vector<1x192xi1>
    %935 = vector.broadcast %934 : vector<1x192xi1> to vector<8x192xi1>
    %936 = vector.broadcast %cst_434 : f32 to vector<8x192xf32>
    %937 = arith.select %935, %926, %936 : vector<8x192xi1>, vector<8x192xf32>
    %c0_435 = arith.constant 0 : index
    %c212 = arith.constant 212 : index
    %938 = vector.load %arg13[%c0_435, %c212] : memref<8x512xf32, #tpu.memory_space<vmem>>, vector<8x192xf32>
    %c4_i32_436 = arith.constant 4 : i32
    %939 = vector.broadcast %c4_i32_436 : i32 to vector<1x192xi32>
    %940 = arith.addi %0, %939 : vector<1x192xi32>
    %c0_i32_437 = arith.constant 0 : i32
    %941 = vector.broadcast %c0_i32_437 : i32 to vector<1x192xi32>
    %942 = arith.cmpi sge, %940, %941 : vector<1x192xi32>
    %c16_i32_438 = arith.constant 16 : i32
    %943 = vector.broadcast %c16_i32_438 : i32 to vector<1x192xi32>
    %944 = arith.cmpi slt, %940, %943 : vector<1x192xi32>
    %945 = arith.andi %942, %944 : vector<1x192xi1>
    %cst_439 = arith.constant 0.000000e+00 : f32
    %946 = vector.shape_cast %945 : vector<1x192xi1> to vector<1x192xi1>
    %947 = vector.broadcast %946 : vector<1x192xi1> to vector<8x192xi1>
    %948 = vector.broadcast %cst_439 : f32 to vector<8x192xf32>
    %949 = arith.select %947, %938, %948 : vector<8x192xi1>, vector<8x192xf32>
    %c0_440 = arith.constant 0 : index
    %c213 = arith.constant 213 : index
    %950 = vector.load %arg13[%c0_440, %c213] : memref<8x512xf32, #tpu.memory_space<vmem>>, vector<8x192xf32>
    %c5_i32_441 = arith.constant 5 : i32
    %951 = vector.broadcast %c5_i32_441 : i32 to vector<1x192xi32>
    %952 = arith.addi %0, %951 : vector<1x192xi32>
    %c0_i32_442 = arith.constant 0 : i32
    %953 = vector.broadcast %c0_i32_442 : i32 to vector<1x192xi32>
    %954 = arith.cmpi sge, %952, %953 : vector<1x192xi32>
    %c16_i32_443 = arith.constant 16 : i32
    %955 = vector.broadcast %c16_i32_443 : i32 to vector<1x192xi32>
    %956 = arith.cmpi slt, %952, %955 : vector<1x192xi32>
    %957 = arith.andi %954, %956 : vector<1x192xi1>
    %cst_444 = arith.constant 0.000000e+00 : f32
    %958 = vector.shape_cast %957 : vector<1x192xi1> to vector<1x192xi1>
    %959 = vector.broadcast %958 : vector<1x192xi1> to vector<8x192xi1>
    %960 = vector.broadcast %cst_444 : f32 to vector<8x192xf32>
    %961 = arith.select %959, %950, %960 : vector<8x192xi1>, vector<8x192xf32>
    %962 = tpu.concatenate %889, %901, %913, %925, %937, %949, %961 in 0 : vector<8x192xf32>, vector<8x192xf32>, vector<8x192xf32>, vector<8x192xf32>, vector<8x192xf32>, vector<8x192xf32>, vector<8x192xf32> -> vector<56x192xf32>
    %c6 = arith.constant 6 : index
    %c0_445 = arith.constant 0 : index
    %c0_446 = arith.constant 0 : index
    %963 = vector.load %arg5[%c6, %c0_445, %c0_446] : memref<7x8x56xf32, #tpu.memory_space<vmem>>, vector<1x8x56xf32>
    %964 = vector.shape_cast %963 : vector<1x8x56xf32> to vector<8x56xf32>
    %cst_447 = arith.constant dense<0.000000e+00> : vector<8x192xf32>
    %965 = tpu.matmul %964, %962, %cst_447 {dimension_numbers = #tpu.dot_dimension_numbers<[1], [0], [0], [1], [0, 0, 1, 1], [], []>} : vector<8x56xf32>, vector<56x192xf32>, vector<8x192xf32> -> vector<8x192xf32>
    %966 = arith.addf %877, %965 : vector<8x192xf32>
    %c0_448 = arith.constant 0 : index
    %c0_449 = arith.constant 0 : index
    %967 = vector.load %arg6[%c0_448, %c0_449] : memref<8x1xf32, #tpu.memory_space<vmem>>, vector<8x1xf32>
    %968 = vector.broadcast %967 : vector<8x1xf32> to vector<8x192xf32>
    %969 = arith.addf %966, %968 : vector<8x192xf32>
    %cst_450 = arith.constant 0.000000e+00 : f32
    %970 = vector.broadcast %cst_450 : f32 to vector<8x192xf32>
    %971 = arith.cmpf ogt, %969, %970 : vector<8x192xf32>
    %cst_451 = arith.constant 0.00999999977 : f32
    %972 = vector.broadcast %cst_451 : f32 to vector<8x192xf32>
    %973 = arith.mulf %972, %969 : vector<8x192xf32>
    %974 = arith.select %971, %969, %973 : vector<8x192xi1>, vector<8x192xf32>
    %cst_452 = arith.constant 0.000000e+00 : f32
    %975 = vector.broadcast %cst_452 : f32 to vector<8x512xf32>
    %c0_453 = arith.constant 0 : index
    %c0_454 = arith.constant 0 : index
    %976 = vector.load %arg13[%c0_453, %c0_454] : memref<8x512xf32, #tpu.memory_space<vmem>>, vector<8x512xf32>
    tpu.vector_store %arg13[%c0_453, %c0_454], %975 {strides = array<i32>} : memref<8x512xf32, #tpu.memory_space<vmem>>, vector<8x512xf32>,
    %c0_455 = arith.constant 0 : index
    %c128_456 = arith.constant 128 : index
    %977 = vector.load %arg13[%c0_455, %c128_456] : memref<8x512xf32, #tpu.memory_space<vmem>>, vector<8x192xf32>
    tpu.vector_store %arg13[%c0_455, %c128_456], %974 {strides = array<i32>} : memref<8x512xf32, #tpu.memory_space<vmem>>, vector<8x192xf32>,
    %cst_457 = arith.constant 0.000000e+00 : f32
    %978 = vector.broadcast %cst_457 : f32 to vector<8x192xf32>
    %c0_458 = arith.constant 0 : index
    %c94 = arith.constant 94 : index
    %979 = vector.load %arg13[%c0_458, %c94] : memref<8x512xf32, #tpu.memory_space<vmem>>, vector<8x192xf32>
    %c-2_i32 = arith.constant -2 : i32
    %980 = vector.broadcast %c-2_i32 : i32 to vector<1x192xi32>
    %981 = arith.addi %0, %980 : vector<1x192xi32>
    %c0_i32_459 = arith.constant 0 : i32
    %982 = vector.broadcast %c0_i32_459 : i32 to vector<1x192xi32>
    %983 = arith.cmpi sge, %981, %982 : vector<1x192xi32>
    %c12_i32 = arith.constant 12 : i32
    %984 = vector.broadcast %c12_i32 : i32 to vector<1x192xi32>
    %985 = arith.cmpi slt, %981, %984 : vector<1x192xi32>
    %986 = arith.andi %983, %985 : vector<1x192xi1>
    %cst_460 = arith.constant 0.000000e+00 : f32
    %987 = vector.shape_cast %986 : vector<1x192xi1> to vector<1x192xi1>
    %988 = vector.broadcast %987 : vector<1x192xi1> to vector<8x192xi1>
    %989 = vector.broadcast %cst_460 : f32 to vector<8x192xf32>
    %990 = arith.select %988, %979, %989 : vector<8x192xi1>, vector<8x192xf32>
    %c0_461 = arith.constant 0 : index
    %c95 = arith.constant 95 : index
    %991 = vector.load %arg13[%c0_461, %c95] : memref<8x512xf32, #tpu.memory_space<vmem>>, vector<8x192xf32>
    %c-1_i32_462 = arith.constant -1 : i32
    %992 = vector.broadcast %c-1_i32_462 : i32 to vector<1x192xi32>
    %993 = arith.addi %0, %992 : vector<1x192xi32>
    %c0_i32_463 = arith.constant 0 : i32
    %994 = vector.broadcast %c0_i32_463 : i32 to vector<1x192xi32>
    %995 = arith.cmpi sge, %993, %994 : vector<1x192xi32>
    %c12_i32_464 = arith.constant 12 : i32
    %996 = vector.broadcast %c12_i32_464 : i32 to vector<1x192xi32>
    %997 = arith.cmpi slt, %993, %996 : vector<1x192xi32>
    %998 = arith.andi %995, %997 : vector<1x192xi1>
    %cst_465 = arith.constant 0.000000e+00 : f32
    %999 = vector.shape_cast %998 : vector<1x192xi1> to vector<1x192xi1>
    %1000 = vector.broadcast %999 : vector<1x192xi1> to vector<8x192xi1>
    %1001 = vector.broadcast %cst_465 : f32 to vector<8x192xf32>
    %1002 = arith.select %1000, %991, %1001 : vector<8x192xi1>, vector<8x192xf32>
    %c0_466 = arith.constant 0 : index
    %c96 = arith.constant 96 : index
    %1003 = vector.load %arg13[%c0_466, %c96] : memref<8x512xf32, #tpu.memory_space<vmem>>, vector<8x192xf32>
    %c0_i32_467 = arith.constant 0 : i32
    %1004 = vector.broadcast %c0_i32_467 : i32 to vector<1x192xi32>
    %1005 = arith.addi %0, %1004 : vector<1x192xi32>
    %c0_i32_468 = arith.constant 0 : i32
    %1006 = vector.broadcast %c0_i32_468 : i32 to vector<1x192xi32>
    %1007 = arith.cmpi sge, %1005, %1006 : vector<1x192xi32>
    %c12_i32_469 = arith.constant 12 : i32
    %1008 = vector.broadcast %c12_i32_469 : i32 to vector<1x192xi32>
    %1009 = arith.cmpi slt, %1005, %1008 : vector<1x192xi32>
    %1010 = arith.andi %1007, %1009 : vector<1x192xi1>
    %cst_470 = arith.constant 0.000000e+00 : f32
    %1011 = vector.shape_cast %1010 : vector<1x192xi1> to vector<1x192xi1>
    %1012 = vector.broadcast %1011 : vector<1x192xi1> to vector<8x192xi1>
    %1013 = vector.broadcast %cst_470 : f32 to vector<8x192xf32>
    %1014 = arith.select %1012, %1003, %1013 : vector<8x192xi1>, vector<8x192xf32>
    %c0_471 = arith.constant 0 : index
    %c97 = arith.constant 97 : index
    %1015 = vector.load %arg13[%c0_471, %c97] : memref<8x512xf32, #tpu.memory_space<vmem>>, vector<8x192xf32>
    %c1_i32_472 = arith.constant 1 : i32
    %1016 = vector.broadcast %c1_i32_472 : i32 to vector<1x192xi32>
    %1017 = arith.addi %0, %1016 : vector<1x192xi32>
    %c0_i32_473 = arith.constant 0 : i32
    %1018 = vector.broadcast %c0_i32_473 : i32 to vector<1x192xi32>
    %1019 = arith.cmpi sge, %1017, %1018 : vector<1x192xi32>
    %c12_i32_474 = arith.constant 12 : i32
    %1020 = vector.broadcast %c12_i32_474 : i32 to vector<1x192xi32>
    %1021 = arith.cmpi slt, %1017, %1020 : vector<1x192xi32>
    %1022 = arith.andi %1019, %1021 : vector<1x192xi1>
    %cst_475 = arith.constant 0.000000e+00 : f32
    %1023 = vector.shape_cast %1022 : vector<1x192xi1> to vector<1x192xi1>
    %1024 = vector.broadcast %1023 : vector<1x192xi1> to vector<8x192xi1>
    %1025 = vector.broadcast %cst_475 : f32 to vector<8x192xf32>
    %1026 = arith.select %1024, %1015, %1025 : vector<8x192xi1>, vector<8x192xf32>
    %c0_476 = arith.constant 0 : index
    %c98 = arith.constant 98 : index
    %1027 = vector.load %arg13[%c0_476, %c98] : memref<8x512xf32, #tpu.memory_space<vmem>>, vector<8x192xf32>
    %c2_i32_477 = arith.constant 2 : i32
    %1028 = vector.broadcast %c2_i32_477 : i32 to vector<1x192xi32>
    %1029 = arith.addi %0, %1028 : vector<1x192xi32>
    %c0_i32_478 = arith.constant 0 : i32
    %1030 = vector.broadcast %c0_i32_478 : i32 to vector<1x192xi32>
    %1031 = arith.cmpi sge, %1029, %1030 : vector<1x192xi32>
    %c12_i32_479 = arith.constant 12 : i32
    %1032 = vector.broadcast %c12_i32_479 : i32 to vector<1x192xi32>
    %1033 = arith.cmpi slt, %1029, %1032 : vector<1x192xi32>
    %1034 = arith.andi %1031, %1033 : vector<1x192xi1>
    %cst_480 = arith.constant 0.000000e+00 : f32
    %1035 = vector.shape_cast %1034 : vector<1x192xi1> to vector<1x192xi1>
    %1036 = vector.broadcast %1035 : vector<1x192xi1> to vector<8x192xi1>
    %1037 = vector.broadcast %cst_480 : f32 to vector<8x192xf32>
    %1038 = arith.select %1036, %1027, %1037 : vector<8x192xi1>, vector<8x192xf32>
    %1039 = tpu.concatenate %990, %1002, %1014, %1026, %1038 in 0 : vector<8x192xf32>, vector<8x192xf32>, vector<8x192xf32>, vector<8x192xf32>, vector<8x192xf32> -> vector<40x192xf32>
    %c0_481 = arith.constant 0 : index
    %c0_482 = arith.constant 0 : index
    %c0_483 = arith.constant 0 : index
    %1040 = vector.load %arg7[%c0_481, %c0_482, %c0_483] : memref<5x8x40xf32, #tpu.memory_space<vmem>>, vector<1x8x40xf32>
    %1041 = vector.shape_cast %1040 : vector<1x8x40xf32> to vector<8x40xf32>
    %cst_484 = arith.constant dense<0.000000e+00> : vector<8x192xf32>
    %1042 = tpu.matmul %1041, %1039, %cst_484 {dimension_numbers = #tpu.dot_dimension_numbers<[1], [0], [0], [1], [0, 0, 1, 1], [], []>} : vector<8x40xf32>, vector<40x192xf32>, vector<8x192xf32> -> vector<8x192xf32>
    %1043 = arith.addf %978, %1042 : vector<8x192xf32>
    %c0_485 = arith.constant 0 : index
    %c110 = arith.constant 110 : index
    %1044 = vector.load %arg13[%c0_485, %c110] : memref<8x512xf32, #tpu.memory_space<vmem>>, vector<8x192xf32>
    %c-2_i32_486 = arith.constant -2 : i32
    %1045 = vector.broadcast %c-2_i32_486 : i32 to vector<1x192xi32>
    %1046 = arith.addi %0, %1045 : vector<1x192xi32>
    %c0_i32_487 = arith.constant 0 : i32
    %1047 = vector.broadcast %c0_i32_487 : i32 to vector<1x192xi32>
    %1048 = arith.cmpi sge, %1046, %1047 : vector<1x192xi32>
    %c12_i32_488 = arith.constant 12 : i32
    %1049 = vector.broadcast %c12_i32_488 : i32 to vector<1x192xi32>
    %1050 = arith.cmpi slt, %1046, %1049 : vector<1x192xi32>
    %1051 = arith.andi %1048, %1050 : vector<1x192xi1>
    %cst_489 = arith.constant 0.000000e+00 : f32
    %1052 = vector.shape_cast %1051 : vector<1x192xi1> to vector<1x192xi1>
    %1053 = vector.broadcast %1052 : vector<1x192xi1> to vector<8x192xi1>
    %1054 = vector.broadcast %cst_489 : f32 to vector<8x192xf32>
    %1055 = arith.select %1053, %1044, %1054 : vector<8x192xi1>, vector<8x192xf32>
    %c0_490 = arith.constant 0 : index
    %c111_491 = arith.constant 111 : index
    %1056 = vector.load %arg13[%c0_490, %c111_491] : memref<8x512xf32, #tpu.memory_space<vmem>>, vector<8x192xf32>
    %c-1_i32_492 = arith.constant -1 : i32
    %1057 = vector.broadcast %c-1_i32_492 : i32 to vector<1x192xi32>
    %1058 = arith.addi %0, %1057 : vector<1x192xi32>
    %c0_i32_493 = arith.constant 0 : i32
    %1059 = vector.broadcast %c0_i32_493 : i32 to vector<1x192xi32>
    %1060 = arith.cmpi sge, %1058, %1059 : vector<1x192xi32>
    %c12_i32_494 = arith.constant 12 : i32
    %1061 = vector.broadcast %c12_i32_494 : i32 to vector<1x192xi32>
    %1062 = arith.cmpi slt, %1058, %1061 : vector<1x192xi32>
    %1063 = arith.andi %1060, %1062 : vector<1x192xi1>
    %cst_495 = arith.constant 0.000000e+00 : f32
    %1064 = vector.shape_cast %1063 : vector<1x192xi1> to vector<1x192xi1>
    %1065 = vector.broadcast %1064 : vector<1x192xi1> to vector<8x192xi1>
    %1066 = vector.broadcast %cst_495 : f32 to vector<8x192xf32>
    %1067 = arith.select %1065, %1056, %1066 : vector<8x192xi1>, vector<8x192xf32>
    %c0_496 = arith.constant 0 : index
    %c112_497 = arith.constant 112 : index
    %1068 = vector.load %arg13[%c0_496, %c112_497] : memref<8x512xf32, #tpu.memory_space<vmem>>, vector<8x192xf32>
    %c0_i32_498 = arith.constant 0 : i32
    %1069 = vector.broadcast %c0_i32_498 : i32 to vector<1x192xi32>
    %1070 = arith.addi %0, %1069 : vector<1x192xi32>
    %c0_i32_499 = arith.constant 0 : i32
    %1071 = vector.broadcast %c0_i32_499 : i32 to vector<1x192xi32>
    %1072 = arith.cmpi sge, %1070, %1071 : vector<1x192xi32>
    %c12_i32_500 = arith.constant 12 : i32
    %1073 = vector.broadcast %c12_i32_500 : i32 to vector<1x192xi32>
    %1074 = arith.cmpi slt, %1070, %1073 : vector<1x192xi32>
    %1075 = arith.andi %1072, %1074 : vector<1x192xi1>
    %cst_501 = arith.constant 0.000000e+00 : f32
    %1076 = vector.shape_cast %1075 : vector<1x192xi1> to vector<1x192xi1>
    %1077 = vector.broadcast %1076 : vector<1x192xi1> to vector<8x192xi1>
    %1078 = vector.broadcast %cst_501 : f32 to vector<8x192xf32>
    %1079 = arith.select %1077, %1068, %1078 : vector<8x192xi1>, vector<8x192xf32>
    %c0_502 = arith.constant 0 : index
    %c113_503 = arith.constant 113 : index
    %1080 = vector.load %arg13[%c0_502, %c113_503] : memref<8x512xf32, #tpu.memory_space<vmem>>, vector<8x192xf32>
    %c1_i32_504 = arith.constant 1 : i32
    %1081 = vector.broadcast %c1_i32_504 : i32 to vector<1x192xi32>
    %1082 = arith.addi %0, %1081 : vector<1x192xi32>
    %c0_i32_505 = arith.constant 0 : i32
    %1083 = vector.broadcast %c0_i32_505 : i32 to vector<1x192xi32>
    %1084 = arith.cmpi sge, %1082, %1083 : vector<1x192xi32>
    %c12_i32_506 = arith.constant 12 : i32
    %1085 = vector.broadcast %c12_i32_506 : i32 to vector<1x192xi32>
    %1086 = arith.cmpi slt, %1082, %1085 : vector<1x192xi32>
    %1087 = arith.andi %1084, %1086 : vector<1x192xi1>
    %cst_507 = arith.constant 0.000000e+00 : f32
    %1088 = vector.shape_cast %1087 : vector<1x192xi1> to vector<1x192xi1>
    %1089 = vector.broadcast %1088 : vector<1x192xi1> to vector<8x192xi1>
    %1090 = vector.broadcast %cst_507 : f32 to vector<8x192xf32>
    %1091 = arith.select %1089, %1080, %1090 : vector<8x192xi1>, vector<8x192xf32>
    %c0_508 = arith.constant 0 : index
    %c114_509 = arith.constant 114 : index
    %1092 = vector.load %arg13[%c0_508, %c114_509] : memref<8x512xf32, #tpu.memory_space<vmem>>, vector<8x192xf32>
    %c2_i32_510 = arith.constant 2 : i32
    %1093 = vector.broadcast %c2_i32_510 : i32 to vector<1x192xi32>
    %1094 = arith.addi %0, %1093 : vector<1x192xi32>
    %c0_i32_511 = arith.constant 0 : i32
    %1095 = vector.broadcast %c0_i32_511 : i32 to vector<1x192xi32>
    %1096 = arith.cmpi sge, %1094, %1095 : vector<1x192xi32>
    %c12_i32_512 = arith.constant 12 : i32
    %1097 = vector.broadcast %c12_i32_512 : i32 to vector<1x192xi32>
    %1098 = arith.cmpi slt, %1094, %1097 : vector<1x192xi32>
    %1099 = arith.andi %1096, %1098 : vector<1x192xi1>
    %cst_513 = arith.constant 0.000000e+00 : f32
    %1100 = vector.shape_cast %1099 : vector<1x192xi1> to vector<1x192xi1>
    %1101 = vector.broadcast %1100 : vector<1x192xi1> to vector<8x192xi1>
    %1102 = vector.broadcast %cst_513 : f32 to vector<8x192xf32>
    %1103 = arith.select %1101, %1092, %1102 : vector<8x192xi1>, vector<8x192xf32>
    %1104 = tpu.concatenate %1055, %1067, %1079, %1091, %1103 in 0 : vector<8x192xf32>, vector<8x192xf32>, vector<8x192xf32>, vector<8x192xf32>, vector<8x192xf32> -> vector<40x192xf32>
    %c1_514 = arith.constant 1 : index
    %c0_515 = arith.constant 0 : index
    %c0_516 = arith.constant 0 : index
    %1105 = vector.load %arg7[%c1_514, %c0_515, %c0_516] : memref<5x8x40xf32, #tpu.memory_space<vmem>>, vector<1x8x40xf32>
    %1106 = vector.shape_cast %1105 : vector<1x8x40xf32> to vector<8x40xf32>
    %cst_517 = arith.constant dense<0.000000e+00> : vector<8x192xf32>
    %1107 = tpu.matmul %1106, %1104, %cst_517 {dimension_numbers = #tpu.dot_dimension_numbers<[1], [0], [0], [1], [0, 0, 1, 1], [], []>} : vector<8x40xf32>, vector<40x192xf32>, vector<8x192xf32> -> vector<8x192xf32>
    %1108 = arith.addf %1043, %1107 : vector<8x192xf32>
    %c0_518 = arith.constant 0 : index
    %c126 = arith.constant 126 : index
    %1109 = vector.load %arg13[%c0_518, %c126] : memref<8x512xf32, #tpu.memory_space<vmem>>, vector<8x192xf32>
    %c-2_i32_519 = arith.constant -2 : i32
    %1110 = vector.broadcast %c-2_i32_519 : i32 to vector<1x192xi32>
    %1111 = arith.addi %0, %1110 : vector<1x192xi32>
    %c0_i32_520 = arith.constant 0 : i32
    %1112 = vector.broadcast %c0_i32_520 : i32 to vector<1x192xi32>
    %1113 = arith.cmpi sge, %1111, %1112 : vector<1x192xi32>
    %c12_i32_521 = arith.constant 12 : i32
    %1114 = vector.broadcast %c12_i32_521 : i32 to vector<1x192xi32>
    %1115 = arith.cmpi slt, %1111, %1114 : vector<1x192xi32>
    %1116 = arith.andi %1113, %1115 : vector<1x192xi1>
    %cst_522 = arith.constant 0.000000e+00 : f32
    %1117 = vector.shape_cast %1116 : vector<1x192xi1> to vector<1x192xi1>
    %1118 = vector.broadcast %1117 : vector<1x192xi1> to vector<8x192xi1>
    %1119 = vector.broadcast %cst_522 : f32 to vector<8x192xf32>
    %1120 = arith.select %1118, %1109, %1119 : vector<8x192xi1>, vector<8x192xf32>
    %c0_523 = arith.constant 0 : index
    %c127_524 = arith.constant 127 : index
    %1121 = vector.load %arg13[%c0_523, %c127_524] : memref<8x512xf32, #tpu.memory_space<vmem>>, vector<8x192xf32>
    %c-1_i32_525 = arith.constant -1 : i32
    %1122 = vector.broadcast %c-1_i32_525 : i32 to vector<1x192xi32>
    %1123 = arith.addi %0, %1122 : vector<1x192xi32>
    %c0_i32_526 = arith.constant 0 : i32
    %1124 = vector.broadcast %c0_i32_526 : i32 to vector<1x192xi32>
    %1125 = arith.cmpi sge, %1123, %1124 : vector<1x192xi32>
    %c12_i32_527 = arith.constant 12 : i32
    %1126 = vector.broadcast %c12_i32_527 : i32 to vector<1x192xi32>
    %1127 = arith.cmpi slt, %1123, %1126 : vector<1x192xi32>
    %1128 = arith.andi %1125, %1127 : vector<1x192xi1>
    %cst_528 = arith.constant 0.000000e+00 : f32
    %1129 = vector.shape_cast %1128 : vector<1x192xi1> to vector<1x192xi1>
    %1130 = vector.broadcast %1129 : vector<1x192xi1> to vector<8x192xi1>
    %1131 = vector.broadcast %cst_528 : f32 to vector<8x192xf32>
    %1132 = arith.select %1130, %1121, %1131 : vector<8x192xi1>, vector<8x192xf32>
    %c0_529 = arith.constant 0 : index
    %c128_530 = arith.constant 128 : index
    %1133 = vector.load %arg13[%c0_529, %c128_530] : memref<8x512xf32, #tpu.memory_space<vmem>>, vector<8x192xf32>
    %c0_i32_531 = arith.constant 0 : i32
    %1134 = vector.broadcast %c0_i32_531 : i32 to vector<1x192xi32>
    %1135 = arith.addi %0, %1134 : vector<1x192xi32>
    %c0_i32_532 = arith.constant 0 : i32
    %1136 = vector.broadcast %c0_i32_532 : i32 to vector<1x192xi32>
    %1137 = arith.cmpi sge, %1135, %1136 : vector<1x192xi32>
    %c12_i32_533 = arith.constant 12 : i32
    %1138 = vector.broadcast %c12_i32_533 : i32 to vector<1x192xi32>
    %1139 = arith.cmpi slt, %1135, %1138 : vector<1x192xi32>
    %1140 = arith.andi %1137, %1139 : vector<1x192xi1>
    %cst_534 = arith.constant 0.000000e+00 : f32
    %1141 = vector.shape_cast %1140 : vector<1x192xi1> to vector<1x192xi1>
    %1142 = vector.broadcast %1141 : vector<1x192xi1> to vector<8x192xi1>
    %1143 = vector.broadcast %cst_534 : f32 to vector<8x192xf32>
    %1144 = arith.select %1142, %1133, %1143 : vector<8x192xi1>, vector<8x192xf32>
    %c0_535 = arith.constant 0 : index
    %c129_536 = arith.constant 129 : index
    %1145 = vector.load %arg13[%c0_535, %c129_536] : memref<8x512xf32, #tpu.memory_space<vmem>>, vector<8x192xf32>
    %c1_i32_537 = arith.constant 1 : i32
    %1146 = vector.broadcast %c1_i32_537 : i32 to vector<1x192xi32>
    %1147 = arith.addi %0, %1146 : vector<1x192xi32>
    %c0_i32_538 = arith.constant 0 : i32
    %1148 = vector.broadcast %c0_i32_538 : i32 to vector<1x192xi32>
    %1149 = arith.cmpi sge, %1147, %1148 : vector<1x192xi32>
    %c12_i32_539 = arith.constant 12 : i32
    %1150 = vector.broadcast %c12_i32_539 : i32 to vector<1x192xi32>
    %1151 = arith.cmpi slt, %1147, %1150 : vector<1x192xi32>
    %1152 = arith.andi %1149, %1151 : vector<1x192xi1>
    %cst_540 = arith.constant 0.000000e+00 : f32
    %1153 = vector.shape_cast %1152 : vector<1x192xi1> to vector<1x192xi1>
    %1154 = vector.broadcast %1153 : vector<1x192xi1> to vector<8x192xi1>
    %1155 = vector.broadcast %cst_540 : f32 to vector<8x192xf32>
    %1156 = arith.select %1154, %1145, %1155 : vector<8x192xi1>, vector<8x192xf32>
    %c0_541 = arith.constant 0 : index
    %c130_542 = arith.constant 130 : index
    %1157 = vector.load %arg13[%c0_541, %c130_542] : memref<8x512xf32, #tpu.memory_space<vmem>>, vector<8x192xf32>
    %c2_i32_543 = arith.constant 2 : i32
    %1158 = vector.broadcast %c2_i32_543 : i32 to vector<1x192xi32>
    %1159 = arith.addi %0, %1158 : vector<1x192xi32>
    %c0_i32_544 = arith.constant 0 : i32
    %1160 = vector.broadcast %c0_i32_544 : i32 to vector<1x192xi32>
    %1161 = arith.cmpi sge, %1159, %1160 : vector<1x192xi32>
    %c12_i32_545 = arith.constant 12 : i32
    %1162 = vector.broadcast %c12_i32_545 : i32 to vector<1x192xi32>
    %1163 = arith.cmpi slt, %1159, %1162 : vector<1x192xi32>
    %1164 = arith.andi %1161, %1163 : vector<1x192xi1>
    %cst_546 = arith.constant 0.000000e+00 : f32
    %1165 = vector.shape_cast %1164 : vector<1x192xi1> to vector<1x192xi1>
    %1166 = vector.broadcast %1165 : vector<1x192xi1> to vector<8x192xi1>
    %1167 = vector.broadcast %cst_546 : f32 to vector<8x192xf32>
    %1168 = arith.select %1166, %1157, %1167 : vector<8x192xi1>, vector<8x192xf32>
    %1169 = tpu.concatenate %1120, %1132, %1144, %1156, %1168 in 0 : vector<8x192xf32>, vector<8x192xf32>, vector<8x192xf32>, vector<8x192xf32>, vector<8x192xf32> -> vector<40x192xf32>
    %c2_547 = arith.constant 2 : index
    %c0_548 = arith.constant 0 : index
    %c0_549 = arith.constant 0 : index
    %1170 = vector.load %arg7[%c2_547, %c0_548, %c0_549] : memref<5x8x40xf32, #tpu.memory_space<vmem>>, vector<1x8x40xf32>
    %1171 = vector.shape_cast %1170 : vector<1x8x40xf32> to vector<8x40xf32>
    %cst_550 = arith.constant dense<0.000000e+00> : vector<8x192xf32>
    %1172 = tpu.matmul %1171, %1169, %cst_550 {dimension_numbers = #tpu.dot_dimension_numbers<[1], [0], [0], [1], [0, 0, 1, 1], [], []>} : vector<8x40xf32>, vector<40x192xf32>, vector<8x192xf32> -> vector<8x192xf32>
    %1173 = arith.addf %1108, %1172 : vector<8x192xf32>
    %c0_551 = arith.constant 0 : index
    %c142 = arith.constant 142 : index
    %1174 = vector.load %arg13[%c0_551, %c142] : memref<8x512xf32, #tpu.memory_space<vmem>>, vector<8x192xf32>
    %c-2_i32_552 = arith.constant -2 : i32
    %1175 = vector.broadcast %c-2_i32_552 : i32 to vector<1x192xi32>
    %1176 = arith.addi %0, %1175 : vector<1x192xi32>
    %c0_i32_553 = arith.constant 0 : i32
    %1177 = vector.broadcast %c0_i32_553 : i32 to vector<1x192xi32>
    %1178 = arith.cmpi sge, %1176, %1177 : vector<1x192xi32>
    %c12_i32_554 = arith.constant 12 : i32
    %1179 = vector.broadcast %c12_i32_554 : i32 to vector<1x192xi32>
    %1180 = arith.cmpi slt, %1176, %1179 : vector<1x192xi32>
    %1181 = arith.andi %1178, %1180 : vector<1x192xi1>
    %cst_555 = arith.constant 0.000000e+00 : f32
    %1182 = vector.shape_cast %1181 : vector<1x192xi1> to vector<1x192xi1>
    %1183 = vector.broadcast %1182 : vector<1x192xi1> to vector<8x192xi1>
    %1184 = vector.broadcast %cst_555 : f32 to vector<8x192xf32>
    %1185 = arith.select %1183, %1174, %1184 : vector<8x192xi1>, vector<8x192xf32>
    %c0_556 = arith.constant 0 : index
    %c143_557 = arith.constant 143 : index
    %1186 = vector.load %arg13[%c0_556, %c143_557] : memref<8x512xf32, #tpu.memory_space<vmem>>, vector<8x192xf32>
    %c-1_i32_558 = arith.constant -1 : i32
    %1187 = vector.broadcast %c-1_i32_558 : i32 to vector<1x192xi32>
    %1188 = arith.addi %0, %1187 : vector<1x192xi32>
    %c0_i32_559 = arith.constant 0 : i32
    %1189 = vector.broadcast %c0_i32_559 : i32 to vector<1x192xi32>
    %1190 = arith.cmpi sge, %1188, %1189 : vector<1x192xi32>
    %c12_i32_560 = arith.constant 12 : i32
    %1191 = vector.broadcast %c12_i32_560 : i32 to vector<1x192xi32>
    %1192 = arith.cmpi slt, %1188, %1191 : vector<1x192xi32>
    %1193 = arith.andi %1190, %1192 : vector<1x192xi1>
    %cst_561 = arith.constant 0.000000e+00 : f32
    %1194 = vector.shape_cast %1193 : vector<1x192xi1> to vector<1x192xi1>
    %1195 = vector.broadcast %1194 : vector<1x192xi1> to vector<8x192xi1>
    %1196 = vector.broadcast %cst_561 : f32 to vector<8x192xf32>
    %1197 = arith.select %1195, %1186, %1196 : vector<8x192xi1>, vector<8x192xf32>
    %c0_562 = arith.constant 0 : index
    %c144_563 = arith.constant 144 : index
    %1198 = vector.load %arg13[%c0_562, %c144_563] : memref<8x512xf32, #tpu.memory_space<vmem>>, vector<8x192xf32>
    %c0_i32_564 = arith.constant 0 : i32
    %1199 = vector.broadcast %c0_i32_564 : i32 to vector<1x192xi32>
    %1200 = arith.addi %0, %1199 : vector<1x192xi32>
    %c0_i32_565 = arith.constant 0 : i32
    %1201 = vector.broadcast %c0_i32_565 : i32 to vector<1x192xi32>
    %1202 = arith.cmpi sge, %1200, %1201 : vector<1x192xi32>
    %c12_i32_566 = arith.constant 12 : i32
    %1203 = vector.broadcast %c12_i32_566 : i32 to vector<1x192xi32>
    %1204 = arith.cmpi slt, %1200, %1203 : vector<1x192xi32>
    %1205 = arith.andi %1202, %1204 : vector<1x192xi1>
    %cst_567 = arith.constant 0.000000e+00 : f32
    %1206 = vector.shape_cast %1205 : vector<1x192xi1> to vector<1x192xi1>
    %1207 = vector.broadcast %1206 : vector<1x192xi1> to vector<8x192xi1>
    %1208 = vector.broadcast %cst_567 : f32 to vector<8x192xf32>
    %1209 = arith.select %1207, %1198, %1208 : vector<8x192xi1>, vector<8x192xf32>
    %c0_568 = arith.constant 0 : index
    %c145_569 = arith.constant 145 : index
    %1210 = vector.load %arg13[%c0_568, %c145_569] : memref<8x512xf32, #tpu.memory_space<vmem>>, vector<8x192xf32>
    %c1_i32_570 = arith.constant 1 : i32
    %1211 = vector.broadcast %c1_i32_570 : i32 to vector<1x192xi32>
    %1212 = arith.addi %0, %1211 : vector<1x192xi32>
    %c0_i32_571 = arith.constant 0 : i32
    %1213 = vector.broadcast %c0_i32_571 : i32 to vector<1x192xi32>
    %1214 = arith.cmpi sge, %1212, %1213 : vector<1x192xi32>
    %c12_i32_572 = arith.constant 12 : i32
    %1215 = vector.broadcast %c12_i32_572 : i32 to vector<1x192xi32>
    %1216 = arith.cmpi slt, %1212, %1215 : vector<1x192xi32>
    %1217 = arith.andi %1214, %1216 : vector<1x192xi1>
    %cst_573 = arith.constant 0.000000e+00 : f32
    %1218 = vector.shape_cast %1217 : vector<1x192xi1> to vector<1x192xi1>
    %1219 = vector.broadcast %1218 : vector<1x192xi1> to vector<8x192xi1>
    %1220 = vector.broadcast %cst_573 : f32 to vector<8x192xf32>
    %1221 = arith.select %1219, %1210, %1220 : vector<8x192xi1>, vector<8x192xf32>
    %c0_574 = arith.constant 0 : index
    %c146_575 = arith.constant 146 : index
    %1222 = vector.load %arg13[%c0_574, %c146_575] : memref<8x512xf32, #tpu.memory_space<vmem>>, vector<8x192xf32>
    %c2_i32_576 = arith.constant 2 : i32
    %1223 = vector.broadcast %c2_i32_576 : i32 to vector<1x192xi32>
    %1224 = arith.addi %0, %1223 : vector<1x192xi32>
    %c0_i32_577 = arith.constant 0 : i32
    %1225 = vector.broadcast %c0_i32_577 : i32 to vector<1x192xi32>
    %1226 = arith.cmpi sge, %1224, %1225 : vector<1x192xi32>
    %c12_i32_578 = arith.constant 12 : i32
    %1227 = vector.broadcast %c12_i32_578 : i32 to vector<1x192xi32>
    %1228 = arith.cmpi slt, %1224, %1227 : vector<1x192xi32>
    %1229 = arith.andi %1226, %1228 : vector<1x192xi1>
    %cst_579 = arith.constant 0.000000e+00 : f32
    %1230 = vector.shape_cast %1229 : vector<1x192xi1> to vector<1x192xi1>
    %1231 = vector.broadcast %1230 : vector<1x192xi1> to vector<8x192xi1>
    %1232 = vector.broadcast %cst_579 : f32 to vector<8x192xf32>
    %1233 = arith.select %1231, %1222, %1232 : vector<8x192xi1>, vector<8x192xf32>
    %1234 = tpu.concatenate %1185, %1197, %1209, %1221, %1233 in 0 : vector<8x192xf32>, vector<8x192xf32>, vector<8x192xf32>, vector<8x192xf32>, vector<8x192xf32> -> vector<40x192xf32>
    %c3_580 = arith.constant 3 : index
    %c0_581 = arith.constant 0 : index
    %c0_582 = arith.constant 0 : index
    %1235 = vector.load %arg7[%c3_580, %c0_581, %c0_582] : memref<5x8x40xf32, #tpu.memory_space<vmem>>, vector<1x8x40xf32>
    %1236 = vector.shape_cast %1235 : vector<1x8x40xf32> to vector<8x40xf32>
    %cst_583 = arith.constant dense<0.000000e+00> : vector<8x192xf32>
    %1237 = tpu.matmul %1236, %1234, %cst_583 {dimension_numbers = #tpu.dot_dimension_numbers<[1], [0], [0], [1], [0, 0, 1, 1], [], []>} : vector<8x40xf32>, vector<40x192xf32>, vector<8x192xf32> -> vector<8x192xf32>
    %1238 = arith.addf %1173, %1237 : vector<8x192xf32>
    %c0_584 = arith.constant 0 : index
    %c158 = arith.constant 158 : index
    %1239 = vector.load %arg13[%c0_584, %c158] : memref<8x512xf32, #tpu.memory_space<vmem>>, vector<8x192xf32>
    %c-2_i32_585 = arith.constant -2 : i32
    %1240 = vector.broadcast %c-2_i32_585 : i32 to vector<1x192xi32>
    %1241 = arith.addi %0, %1240 : vector<1x192xi32>
    %c0_i32_586 = arith.constant 0 : i32
    %1242 = vector.broadcast %c0_i32_586 : i32 to vector<1x192xi32>
    %1243 = arith.cmpi sge, %1241, %1242 : vector<1x192xi32>
    %c12_i32_587 = arith.constant 12 : i32
    %1244 = vector.broadcast %c12_i32_587 : i32 to vector<1x192xi32>
    %1245 = arith.cmpi slt, %1241, %1244 : vector<1x192xi32>
    %1246 = arith.andi %1243, %1245 : vector<1x192xi1>
    %cst_588 = arith.constant 0.000000e+00 : f32
    %1247 = vector.shape_cast %1246 : vector<1x192xi1> to vector<1x192xi1>
    %1248 = vector.broadcast %1247 : vector<1x192xi1> to vector<8x192xi1>
    %1249 = vector.broadcast %cst_588 : f32 to vector<8x192xf32>
    %1250 = arith.select %1248, %1239, %1249 : vector<8x192xi1>, vector<8x192xf32>
    %c0_589 = arith.constant 0 : index
    %c159_590 = arith.constant 159 : index
    %1251 = vector.load %arg13[%c0_589, %c159_590] : memref<8x512xf32, #tpu.memory_space<vmem>>, vector<8x192xf32>
    %c-1_i32_591 = arith.constant -1 : i32
    %1252 = vector.broadcast %c-1_i32_591 : i32 to vector<1x192xi32>
    %1253 = arith.addi %0, %1252 : vector<1x192xi32>
    %c0_i32_592 = arith.constant 0 : i32
    %1254 = vector.broadcast %c0_i32_592 : i32 to vector<1x192xi32>
    %1255 = arith.cmpi sge, %1253, %1254 : vector<1x192xi32>
    %c12_i32_593 = arith.constant 12 : i32
    %1256 = vector.broadcast %c12_i32_593 : i32 to vector<1x192xi32>
    %1257 = arith.cmpi slt, %1253, %1256 : vector<1x192xi32>
    %1258 = arith.andi %1255, %1257 : vector<1x192xi1>
    %cst_594 = arith.constant 0.000000e+00 : f32
    %1259 = vector.shape_cast %1258 : vector<1x192xi1> to vector<1x192xi1>
    %1260 = vector.broadcast %1259 : vector<1x192xi1> to vector<8x192xi1>
    %1261 = vector.broadcast %cst_594 : f32 to vector<8x192xf32>
    %1262 = arith.select %1260, %1251, %1261 : vector<8x192xi1>, vector<8x192xf32>
    %c0_595 = arith.constant 0 : index
    %c160_596 = arith.constant 160 : index
    %1263 = vector.load %arg13[%c0_595, %c160_596] : memref<8x512xf32, #tpu.memory_space<vmem>>, vector<8x192xf32>
    %c0_i32_597 = arith.constant 0 : i32
    %1264 = vector.broadcast %c0_i32_597 : i32 to vector<1x192xi32>
    %1265 = arith.addi %0, %1264 : vector<1x192xi32>
    %c0_i32_598 = arith.constant 0 : i32
    %1266 = vector.broadcast %c0_i32_598 : i32 to vector<1x192xi32>
    %1267 = arith.cmpi sge, %1265, %1266 : vector<1x192xi32>
    %c12_i32_599 = arith.constant 12 : i32
    %1268 = vector.broadcast %c12_i32_599 : i32 to vector<1x192xi32>
    %1269 = arith.cmpi slt, %1265, %1268 : vector<1x192xi32>
    %1270 = arith.andi %1267, %1269 : vector<1x192xi1>
    %cst_600 = arith.constant 0.000000e+00 : f32
    %1271 = vector.shape_cast %1270 : vector<1x192xi1> to vector<1x192xi1>
    %1272 = vector.broadcast %1271 : vector<1x192xi1> to vector<8x192xi1>
    %1273 = vector.broadcast %cst_600 : f32 to vector<8x192xf32>
    %1274 = arith.select %1272, %1263, %1273 : vector<8x192xi1>, vector<8x192xf32>
    %c0_601 = arith.constant 0 : index
    %c161_602 = arith.constant 161 : index
    %1275 = vector.load %arg13[%c0_601, %c161_602] : memref<8x512xf32, #tpu.memory_space<vmem>>, vector<8x192xf32>
    %c1_i32_603 = arith.constant 1 : i32
    %1276 = vector.broadcast %c1_i32_603 : i32 to vector<1x192xi32>
    %1277 = arith.addi %0, %1276 : vector<1x192xi32>
    %c0_i32_604 = arith.constant 0 : i32
    %1278 = vector.broadcast %c0_i32_604 : i32 to vector<1x192xi32>
    %1279 = arith.cmpi sge, %1277, %1278 : vector<1x192xi32>
    %c12_i32_605 = arith.constant 12 : i32
    %1280 = vector.broadcast %c12_i32_605 : i32 to vector<1x192xi32>
    %1281 = arith.cmpi slt, %1277, %1280 : vector<1x192xi32>
    %1282 = arith.andi %1279, %1281 : vector<1x192xi1>
    %cst_606 = arith.constant 0.000000e+00 : f32
    %1283 = vector.shape_cast %1282 : vector<1x192xi1> to vector<1x192xi1>
    %1284 = vector.broadcast %1283 : vector<1x192xi1> to vector<8x192xi1>
    %1285 = vector.broadcast %cst_606 : f32 to vector<8x192xf32>
    %1286 = arith.select %1284, %1275, %1285 : vector<8x192xi1>, vector<8x192xf32>
    %c0_607 = arith.constant 0 : index
    %c162_608 = arith.constant 162 : index
    %1287 = vector.load %arg13[%c0_607, %c162_608] : memref<8x512xf32, #tpu.memory_space<vmem>>, vector<8x192xf32>
    %c2_i32_609 = arith.constant 2 : i32
    %1288 = vector.broadcast %c2_i32_609 : i32 to vector<1x192xi32>
    %1289 = arith.addi %0, %1288 : vector<1x192xi32>
    %c0_i32_610 = arith.constant 0 : i32
    %1290 = vector.broadcast %c0_i32_610 : i32 to vector<1x192xi32>
    %1291 = arith.cmpi sge, %1289, %1290 : vector<1x192xi32>
    %c12_i32_611 = arith.constant 12 : i32
    %1292 = vector.broadcast %c12_i32_611 : i32 to vector<1x192xi32>
    %1293 = arith.cmpi slt, %1289, %1292 : vector<1x192xi32>
    %1294 = arith.andi %1291, %1293 : vector<1x192xi1>
    %cst_612 = arith.constant 0.000000e+00 : f32
    %1295 = vector.shape_cast %1294 : vector<1x192xi1> to vector<1x192xi1>
    %1296 = vector.broadcast %1295 : vector<1x192xi1> to vector<8x192xi1>
    %1297 = vector.broadcast %cst_612 : f32 to vector<8x192xf32>
    %1298 = arith.select %1296, %1287, %1297 : vector<8x192xi1>, vector<8x192xf32>
    %1299 = tpu.concatenate %1250, %1262, %1274, %1286, %1298 in 0 : vector<8x192xf32>, vector<8x192xf32>, vector<8x192xf32>, vector<8x192xf32>, vector<8x192xf32> -> vector<40x192xf32>
    %c4_613 = arith.constant 4 : index
    %c0_614 = arith.constant 0 : index
    %c0_615 = arith.constant 0 : index
    %1300 = vector.load %arg7[%c4_613, %c0_614, %c0_615] : memref<5x8x40xf32, #tpu.memory_space<vmem>>, vector<1x8x40xf32>
    %1301 = vector.shape_cast %1300 : vector<1x8x40xf32> to vector<8x40xf32>
    %cst_616 = arith.constant dense<0.000000e+00> : vector<8x192xf32>
    %1302 = tpu.matmul %1301, %1299, %cst_616 {dimension_numbers = #tpu.dot_dimension_numbers<[1], [0], [0], [1], [0, 0, 1, 1], [], []>} : vector<8x40xf32>, vector<40x192xf32>, vector<8x192xf32> -> vector<8x192xf32>
    %1303 = arith.addf %1238, %1302 : vector<8x192xf32>
    %c0_617 = arith.constant 0 : index
    %c0_618 = arith.constant 0 : index
    %1304 = vector.load %arg8[%c0_617, %c0_618] : memref<8x1xf32, #tpu.memory_space<vmem>>, vector<8x1xf32>
    %1305 = vector.broadcast %1304 : vector<8x1xf32> to vector<8x192xf32>
    %1306 = arith.addf %1303, %1305 : vector<8x192xf32>
    %cst_619 = arith.constant 0.000000e+00 : f32
    %1307 = vector.broadcast %cst_619 : f32 to vector<8x192xf32>
    %1308 = arith.cmpf ogt, %1306, %1307 : vector<8x192xf32>
    %cst_620 = arith.constant 0.00999999977 : f32
    %1309 = vector.broadcast %cst_620 : f32 to vector<8x192xf32>
    %1310 = arith.mulf %1309, %1306 : vector<8x192xf32>
    %1311 = arith.select %1308, %1306, %1310 : vector<8x192xi1>, vector<8x192xf32>
    %cst_621 = arith.constant 0.000000e+00 : f32
    %1312 = vector.broadcast %cst_621 : f32 to vector<8x512xf32>
    %c0_622 = arith.constant 0 : index
    %c0_623 = arith.constant 0 : index
    %1313 = vector.load %arg13[%c0_622, %c0_623] : memref<8x512xf32, #tpu.memory_space<vmem>>, vector<8x512xf32>
    tpu.vector_store %arg13[%c0_622, %c0_623], %1312 {strides = array<i32>} : memref<8x512xf32, #tpu.memory_space<vmem>>, vector<8x512xf32>,
    %c0_624 = arith.constant 0 : index
    %c128_625 = arith.constant 128 : index
    %1314 = vector.load %arg13[%c0_624, %c128_625] : memref<8x512xf32, #tpu.memory_space<vmem>>, vector<8x192xf32>
    tpu.vector_store %arg13[%c0_624, %c128_625], %1311 {strides = array<i32>} : memref<8x512xf32, #tpu.memory_space<vmem>>, vector<8x192xf32>,
    %cst_626 = arith.constant 0.000000e+00 : f32
    %1315 = vector.broadcast %cst_626 : f32 to vector<8x192xf32>
    %c0_627 = arith.constant 0 : index
    %c111_628 = arith.constant 111 : index
    %1316 = vector.load %arg13[%c0_627, %c111_628] : memref<8x512xf32, #tpu.memory_space<vmem>>, vector<8x192xf32>
    %c-1_i32_629 = arith.constant -1 : i32
    %1317 = vector.broadcast %c-1_i32_629 : i32 to vector<1x192xi32>
    %1318 = arith.addi %0, %1317 : vector<1x192xi32>
    %c0_i32_630 = arith.constant 0 : i32
    %1319 = vector.broadcast %c0_i32_630 : i32 to vector<1x192xi32>
    %1320 = arith.cmpi sge, %1318, %1319 : vector<1x192xi32>
    %c12_i32_631 = arith.constant 12 : i32
    %1321 = vector.broadcast %c12_i32_631 : i32 to vector<1x192xi32>
    %1322 = arith.cmpi slt, %1318, %1321 : vector<1x192xi32>
    %1323 = arith.andi %1320, %1322 : vector<1x192xi1>
    %cst_632 = arith.constant 0.000000e+00 : f32
    %1324 = vector.shape_cast %1323 : vector<1x192xi1> to vector<1x192xi1>
    %1325 = vector.broadcast %1324 : vector<1x192xi1> to vector<8x192xi1>
    %1326 = vector.broadcast %cst_632 : f32 to vector<8x192xf32>
    %1327 = arith.select %1325, %1316, %1326 : vector<8x192xi1>, vector<8x192xf32>
    %c0_633 = arith.constant 0 : index
    %c112_634 = arith.constant 112 : index
    %1328 = vector.load %arg13[%c0_633, %c112_634] : memref<8x512xf32, #tpu.memory_space<vmem>>, vector<8x192xf32>
    %c0_i32_635 = arith.constant 0 : i32
    %1329 = vector.broadcast %c0_i32_635 : i32 to vector<1x192xi32>
    %1330 = arith.addi %0, %1329 : vector<1x192xi32>
    %c0_i32_636 = arith.constant 0 : i32
    %1331 = vector.broadcast %c0_i32_636 : i32 to vector<1x192xi32>
    %1332 = arith.cmpi sge, %1330, %1331 : vector<1x192xi32>
    %c12_i32_637 = arith.constant 12 : i32
    %1333 = vector.broadcast %c12_i32_637 : i32 to vector<1x192xi32>
    %1334 = arith.cmpi slt, %1330, %1333 : vector<1x192xi32>
    %1335 = arith.andi %1332, %1334 : vector<1x192xi1>
    %cst_638 = arith.constant 0.000000e+00 : f32
    %1336 = vector.shape_cast %1335 : vector<1x192xi1> to vector<1x192xi1>
    %1337 = vector.broadcast %1336 : vector<1x192xi1> to vector<8x192xi1>
    %1338 = vector.broadcast %cst_638 : f32 to vector<8x192xf32>
    %1339 = arith.select %1337, %1328, %1338 : vector<8x192xi1>, vector<8x192xf32>
    %c0_639 = arith.constant 0 : index
    %c113_640 = arith.constant 113 : index
    %1340 = vector.load %arg13[%c0_639, %c113_640] : memref<8x512xf32, #tpu.memory_space<vmem>>, vector<8x192xf32>
    %c1_i32_641 = arith.constant 1 : i32
    %1341 = vector.broadcast %c1_i32_641 : i32 to vector<1x192xi32>
    %1342 = arith.addi %0, %1341 : vector<1x192xi32>
    %c0_i32_642 = arith.constant 0 : i32
    %1343 = vector.broadcast %c0_i32_642 : i32 to vector<1x192xi32>
    %1344 = arith.cmpi sge, %1342, %1343 : vector<1x192xi32>
    %c12_i32_643 = arith.constant 12 : i32
    %1345 = vector.broadcast %c12_i32_643 : i32 to vector<1x192xi32>
    %1346 = arith.cmpi slt, %1342, %1345 : vector<1x192xi32>
    %1347 = arith.andi %1344, %1346 : vector<1x192xi1>
    %cst_644 = arith.constant 0.000000e+00 : f32
    %1348 = vector.shape_cast %1347 : vector<1x192xi1> to vector<1x192xi1>
    %1349 = vector.broadcast %1348 : vector<1x192xi1> to vector<8x192xi1>
    %1350 = vector.broadcast %cst_644 : f32 to vector<8x192xf32>
    %1351 = arith.select %1349, %1340, %1350 : vector<8x192xi1>, vector<8x192xf32>
    %1352 = tpu.concatenate %1327, %1339, %1351 in 0 : vector<8x192xf32>, vector<8x192xf32>, vector<8x192xf32> -> vector<24x192xf32>
    %c0_645 = arith.constant 0 : index
    %c0_646 = arith.constant 0 : index
    %c0_647 = arith.constant 0 : index
    %1353 = vector.load %arg9[%c0_645, %c0_646, %c0_647] : memref<3x8x24xf32, #tpu.memory_space<vmem>>, vector<1x8x24xf32>
    %1354 = vector.shape_cast %1353 : vector<1x8x24xf32> to vector<8x24xf32>
    %cst_648 = arith.constant dense<0.000000e+00> : vector<8x192xf32>
    %1355 = tpu.matmul %1354, %1352, %cst_648 {dimension_numbers = #tpu.dot_dimension_numbers<[1], [0], [0], [1], [0, 0, 1, 1], [], []>} : vector<8x24xf32>, vector<24x192xf32>, vector<8x192xf32> -> vector<8x192xf32>
    %1356 = arith.addf %1315, %1355 : vector<8x192xf32>
    %c0_649 = arith.constant 0 : index
    %c127_650 = arith.constant 127 : index
    %1357 = vector.load %arg13[%c0_649, %c127_650] : memref<8x512xf32, #tpu.memory_space<vmem>>, vector<8x192xf32>
    %c-1_i32_651 = arith.constant -1 : i32
    %1358 = vector.broadcast %c-1_i32_651 : i32 to vector<1x192xi32>
    %1359 = arith.addi %0, %1358 : vector<1x192xi32>
    %c0_i32_652 = arith.constant 0 : i32
    %1360 = vector.broadcast %c0_i32_652 : i32 to vector<1x192xi32>
    %1361 = arith.cmpi sge, %1359, %1360 : vector<1x192xi32>
    %c12_i32_653 = arith.constant 12 : i32
    %1362 = vector.broadcast %c12_i32_653 : i32 to vector<1x192xi32>
    %1363 = arith.cmpi slt, %1359, %1362 : vector<1x192xi32>
    %1364 = arith.andi %1361, %1363 : vector<1x192xi1>
    %cst_654 = arith.constant 0.000000e+00 : f32
    %1365 = vector.shape_cast %1364 : vector<1x192xi1> to vector<1x192xi1>
    %1366 = vector.broadcast %1365 : vector<1x192xi1> to vector<8x192xi1>
    %1367 = vector.broadcast %cst_654 : f32 to vector<8x192xf32>
    %1368 = arith.select %1366, %1357, %1367 : vector<8x192xi1>, vector<8x192xf32>
    %c0_655 = arith.constant 0 : index
    %c128_656 = arith.constant 128 : index
    %1369 = vector.load %arg13[%c0_655, %c128_656] : memref<8x512xf32, #tpu.memory_space<vmem>>, vector<8x192xf32>
    %c0_i32_657 = arith.constant 0 : i32
    %1370 = vector.broadcast %c0_i32_657 : i32 to vector<1x192xi32>
    %1371 = arith.addi %0, %1370 : vector<1x192xi32>
    %c0_i32_658 = arith.constant 0 : i32
    %1372 = vector.broadcast %c0_i32_658 : i32 to vector<1x192xi32>
    %1373 = arith.cmpi sge, %1371, %1372 : vector<1x192xi32>
    %c12_i32_659 = arith.constant 12 : i32
    %1374 = vector.broadcast %c12_i32_659 : i32 to vector<1x192xi32>
    %1375 = arith.cmpi slt, %1371, %1374 : vector<1x192xi32>
    %1376 = arith.andi %1373, %1375 : vector<1x192xi1>
    %cst_660 = arith.constant 0.000000e+00 : f32
    %1377 = vector.shape_cast %1376 : vector<1x192xi1> to vector<1x192xi1>
    %1378 = vector.broadcast %1377 : vector<1x192xi1> to vector<8x192xi1>
    %1379 = vector.broadcast %cst_660 : f32 to vector<8x192xf32>
    %1380 = arith.select %1378, %1369, %1379 : vector<8x192xi1>, vector<8x192xf32>
    %c0_661 = arith.constant 0 : index
    %c129_662 = arith.constant 129 : index
    %1381 = vector.load %arg13[%c0_661, %c129_662] : memref<8x512xf32, #tpu.memory_space<vmem>>, vector<8x192xf32>
    %c1_i32_663 = arith.constant 1 : i32
    %1382 = vector.broadcast %c1_i32_663 : i32 to vector<1x192xi32>
    %1383 = arith.addi %0, %1382 : vector<1x192xi32>
    %c0_i32_664 = arith.constant 0 : i32
    %1384 = vector.broadcast %c0_i32_664 : i32 to vector<1x192xi32>
    %1385 = arith.cmpi sge, %1383, %1384 : vector<1x192xi32>
    %c12_i32_665 = arith.constant 12 : i32
    %1386 = vector.broadcast %c12_i32_665 : i32 to vector<1x192xi32>
    %1387 = arith.cmpi slt, %1383, %1386 : vector<1x192xi32>
    %1388 = arith.andi %1385, %1387 : vector<1x192xi1>
    %cst_666 = arith.constant 0.000000e+00 : f32
    %1389 = vector.shape_cast %1388 : vector<1x192xi1> to vector<1x192xi1>
    %1390 = vector.broadcast %1389 : vector<1x192xi1> to vector<8x192xi1>
    %1391 = vector.broadcast %cst_666 : f32 to vector<8x192xf32>
    %1392 = arith.select %1390, %1381, %1391 : vector<8x192xi1>, vector<8x192xf32>
    %1393 = tpu.concatenate %1368, %1380, %1392 in 0 : vector<8x192xf32>, vector<8x192xf32>, vector<8x192xf32> -> vector<24x192xf32>
    %c1_667 = arith.constant 1 : index
    %c0_668 = arith.constant 0 : index
    %c0_669 = arith.constant 0 : index
    %1394 = vector.load %arg9[%c1_667, %c0_668, %c0_669] : memref<3x8x24xf32, #tpu.memory_space<vmem>>, vector<1x8x24xf32>
    %1395 = vector.shape_cast %1394 : vector<1x8x24xf32> to vector<8x24xf32>
    %cst_670 = arith.constant dense<0.000000e+00> : vector<8x192xf32>
    %1396 = tpu.matmul %1395, %1393, %cst_670 {dimension_numbers = #tpu.dot_dimension_numbers<[1], [0], [0], [1], [0, 0, 1, 1], [], []>} : vector<8x24xf32>, vector<24x192xf32>, vector<8x192xf32> -> vector<8x192xf32>
    %1397 = arith.addf %1356, %1396 : vector<8x192xf32>
    %c0_671 = arith.constant 0 : index
    %c143_672 = arith.constant 143 : index
    %1398 = vector.load %arg13[%c0_671, %c143_672] : memref<8x512xf32, #tpu.memory_space<vmem>>, vector<8x192xf32>
    %c-1_i32_673 = arith.constant -1 : i32
    %1399 = vector.broadcast %c-1_i32_673 : i32 to vector<1x192xi32>
    %1400 = arith.addi %0, %1399 : vector<1x192xi32>
    %c0_i32_674 = arith.constant 0 : i32
    %1401 = vector.broadcast %c0_i32_674 : i32 to vector<1x192xi32>
    %1402 = arith.cmpi sge, %1400, %1401 : vector<1x192xi32>
    %c12_i32_675 = arith.constant 12 : i32
    %1403 = vector.broadcast %c12_i32_675 : i32 to vector<1x192xi32>
    %1404 = arith.cmpi slt, %1400, %1403 : vector<1x192xi32>
    %1405 = arith.andi %1402, %1404 : vector<1x192xi1>
    %cst_676 = arith.constant 0.000000e+00 : f32
    %1406 = vector.shape_cast %1405 : vector<1x192xi1> to vector<1x192xi1>
    %1407 = vector.broadcast %1406 : vector<1x192xi1> to vector<8x192xi1>
    %1408 = vector.broadcast %cst_676 : f32 to vector<8x192xf32>
    %1409 = arith.select %1407, %1398, %1408 : vector<8x192xi1>, vector<8x192xf32>
    %c0_677 = arith.constant 0 : index
    %c144_678 = arith.constant 144 : index
    %1410 = vector.load %arg13[%c0_677, %c144_678] : memref<8x512xf32, #tpu.memory_space<vmem>>, vector<8x192xf32>
    %c0_i32_679 = arith.constant 0 : i32
    %1411 = vector.broadcast %c0_i32_679 : i32 to vector<1x192xi32>
    %1412 = arith.addi %0, %1411 : vector<1x192xi32>
    %c0_i32_680 = arith.constant 0 : i32
    %1413 = vector.broadcast %c0_i32_680 : i32 to vector<1x192xi32>
    %1414 = arith.cmpi sge, %1412, %1413 : vector<1x192xi32>
    %c12_i32_681 = arith.constant 12 : i32
    %1415 = vector.broadcast %c12_i32_681 : i32 to vector<1x192xi32>
    %1416 = arith.cmpi slt, %1412, %1415 : vector<1x192xi32>
    %1417 = arith.andi %1414, %1416 : vector<1x192xi1>
    %cst_682 = arith.constant 0.000000e+00 : f32
    %1418 = vector.shape_cast %1417 : vector<1x192xi1> to vector<1x192xi1>
    %1419 = vector.broadcast %1418 : vector<1x192xi1> to vector<8x192xi1>
    %1420 = vector.broadcast %cst_682 : f32 to vector<8x192xf32>
    %1421 = arith.select %1419, %1410, %1420 : vector<8x192xi1>, vector<8x192xf32>
    %c0_683 = arith.constant 0 : index
    %c145_684 = arith.constant 145 : index
    %1422 = vector.load %arg13[%c0_683, %c145_684] : memref<8x512xf32, #tpu.memory_space<vmem>>, vector<8x192xf32>
    %c1_i32_685 = arith.constant 1 : i32
    %1423 = vector.broadcast %c1_i32_685 : i32 to vector<1x192xi32>
    %1424 = arith.addi %0, %1423 : vector<1x192xi32>
    %c0_i32_686 = arith.constant 0 : i32
    %1425 = vector.broadcast %c0_i32_686 : i32 to vector<1x192xi32>
    %1426 = arith.cmpi sge, %1424, %1425 : vector<1x192xi32>
    %c12_i32_687 = arith.constant 12 : i32
    %1427 = vector.broadcast %c12_i32_687 : i32 to vector<1x192xi32>
    %1428 = arith.cmpi slt, %1424, %1427 : vector<1x192xi32>
    %1429 = arith.andi %1426, %1428 : vector<1x192xi1>
    %cst_688 = arith.constant 0.000000e+00 : f32
    %1430 = vector.shape_cast %1429 : vector<1x192xi1> to vector<1x192xi1>
    %1431 = vector.broadcast %1430 : vector<1x192xi1> to vector<8x192xi1>
    %1432 = vector.broadcast %cst_688 : f32 to vector<8x192xf32>
    %1433 = arith.select %1431, %1422, %1432 : vector<8x192xi1>, vector<8x192xf32>
    %1434 = tpu.concatenate %1409, %1421, %1433 in 0 : vector<8x192xf32>, vector<8x192xf32>, vector<8x192xf32> -> vector<24x192xf32>
    %c2_689 = arith.constant 2 : index
    %c0_690 = arith.constant 0 : index
    %c0_691 = arith.constant 0 : index
    %1435 = vector.load %arg9[%c2_689, %c0_690, %c0_691] : memref<3x8x24xf32, #tpu.memory_space<vmem>>, vector<1x8x24xf32>
    %1436 = vector.shape_cast %1435 : vector<1x8x24xf32> to vector<8x24xf32>
    %cst_692 = arith.constant dense<0.000000e+00> : vector<8x192xf32>
    %1437 = tpu.matmul %1436, %1434, %cst_692 {dimension_numbers = #tpu.dot_dimension_numbers<[1], [0], [0], [1], [0, 0, 1, 1], [], []>} : vector<8x24xf32>, vector<24x192xf32>, vector<8x192xf32> -> vector<8x192xf32>
    %1438 = arith.addf %1397, %1437 : vector<8x192xf32>
    %c0_693 = arith.constant 0 : index
    %c0_694 = arith.constant 0 : index
    %1439 = vector.load %arg10[%c0_693, %c0_694] : memref<8x1xf32, #tpu.memory_space<vmem>>, vector<8x1xf32>
    %1440 = vector.broadcast %1439 : vector<8x1xf32> to vector<8x192xf32>
    %1441 = arith.addf %1438, %1440 : vector<8x192xf32>
    %cst_695 = arith.constant 0.000000e+00 : f32
    %1442 = vector.broadcast %cst_695 : f32 to vector<8x192xf32>
    %1443 = arith.cmpf ogt, %1441, %1442 : vector<8x192xf32>
    %cst_696 = arith.constant 0.00999999977 : f32
    %1444 = vector.broadcast %cst_696 : f32 to vector<8x192xf32>
    %1445 = arith.mulf %1444, %1441 : vector<8x192xf32>
    %1446 = arith.select %1443, %1441, %1445 : vector<8x192xi1>, vector<8x192xf32>
    %1447 = arith.addf %339, %1446 : vector<8x192xf32>
    %cst_697 = arith.constant -1.000000e+09 : f32
    %1448 = vector.broadcast %cst_697 : f32 to vector<8x512xf32>
    %c0_698 = arith.constant 0 : index
    %c0_699 = arith.constant 0 : index
    %1449 = vector.load %arg13[%c0_698, %c0_699] : memref<8x512xf32, #tpu.memory_space<vmem>>, vector<8x512xf32>
    tpu.vector_store %arg13[%c0_698, %c0_699], %1448 {strides = array<i32>} : memref<8x512xf32, #tpu.memory_space<vmem>>, vector<8x512xf32>,
    %c0_700 = arith.constant 0 : index
    %c128_701 = arith.constant 128 : index
    %1450 = vector.load %arg13[%c0_700, %c128_701] : memref<8x512xf32, #tpu.memory_space<vmem>>, vector<8x192xf32>
    tpu.vector_store %arg13[%c0_700, %c128_701], %1447 {strides = array<i32>} : memref<8x512xf32, #tpu.memory_space<vmem>>, vector<8x192xf32>,
    %cst_702 = arith.constant -1.000000e+09 : f32
    %1451 = vector.broadcast %cst_702 : f32 to vector<8x192xf32>
    %c0_703 = arith.constant 0 : index
    %c111_704 = arith.constant 111 : index
    %1452 = vector.load %arg13[%c0_703, %c111_704] : memref<8x512xf32, #tpu.memory_space<vmem>>, vector<8x192xf32>
    %c-1_i32_705 = arith.constant -1 : i32
    %1453 = vector.broadcast %c-1_i32_705 : i32 to vector<1x192xi32>
    %1454 = arith.addi %0, %1453 : vector<1x192xi32>
    %c0_i32_706 = arith.constant 0 : i32
    %1455 = vector.broadcast %c0_i32_706 : i32 to vector<1x192xi32>
    %1456 = arith.cmpi sge, %1454, %1455 : vector<1x192xi32>
    %c12_i32_707 = arith.constant 12 : i32
    %1457 = vector.broadcast %c12_i32_707 : i32 to vector<1x192xi32>
    %1458 = arith.cmpi slt, %1454, %1457 : vector<1x192xi32>
    %1459 = arith.andi %1456, %1458 : vector<1x192xi1>
    %cst_708 = arith.constant -1.000000e+09 : f32
    %1460 = vector.shape_cast %1459 : vector<1x192xi1> to vector<1x192xi1>
    %1461 = vector.broadcast %1460 : vector<1x192xi1> to vector<8x192xi1>
    %1462 = vector.broadcast %cst_708 : f32 to vector<8x192xf32>
    %1463 = arith.select %1461, %1452, %1462 : vector<8x192xi1>, vector<8x192xf32>
    %1464 = arith.maximumf %1451, %1463 : vector<8x192xf32>
    %c0_709 = arith.constant 0 : index
    %c112_710 = arith.constant 112 : index
    %1465 = vector.load %arg13[%c0_709, %c112_710] : memref<8x512xf32, #tpu.memory_space<vmem>>, vector<8x192xf32>
    %c0_i32_711 = arith.constant 0 : i32
    %1466 = vector.broadcast %c0_i32_711 : i32 to vector<1x192xi32>
    %1467 = arith.addi %0, %1466 : vector<1x192xi32>
    %c0_i32_712 = arith.constant 0 : i32
    %1468 = vector.broadcast %c0_i32_712 : i32 to vector<1x192xi32>
    %1469 = arith.cmpi sge, %1467, %1468 : vector<1x192xi32>
    %c12_i32_713 = arith.constant 12 : i32
    %1470 = vector.broadcast %c12_i32_713 : i32 to vector<1x192xi32>
    %1471 = arith.cmpi slt, %1467, %1470 : vector<1x192xi32>
    %1472 = arith.andi %1469, %1471 : vector<1x192xi1>
    %cst_714 = arith.constant -1.000000e+09 : f32
    %1473 = vector.shape_cast %1472 : vector<1x192xi1> to vector<1x192xi1>
    %1474 = vector.broadcast %1473 : vector<1x192xi1> to vector<8x192xi1>
    %1475 = vector.broadcast %cst_714 : f32 to vector<8x192xf32>
    %1476 = arith.select %1474, %1465, %1475 : vector<8x192xi1>, vector<8x192xf32>
    %1477 = arith.maximumf %1464, %1476 : vector<8x192xf32>
    %c0_715 = arith.constant 0 : index
    %c113_716 = arith.constant 113 : index
    %1478 = vector.load %arg13[%c0_715, %c113_716] : memref<8x512xf32, #tpu.memory_space<vmem>>, vector<8x192xf32>
    %c1_i32_717 = arith.constant 1 : i32
    %1479 = vector.broadcast %c1_i32_717 : i32 to vector<1x192xi32>
    %1480 = arith.addi %0, %1479 : vector<1x192xi32>
    %c0_i32_718 = arith.constant 0 : i32
    %1481 = vector.broadcast %c0_i32_718 : i32 to vector<1x192xi32>
    %1482 = arith.cmpi sge, %1480, %1481 : vector<1x192xi32>
    %c12_i32_719 = arith.constant 12 : i32
    %1483 = vector.broadcast %c12_i32_719 : i32 to vector<1x192xi32>
    %1484 = arith.cmpi slt, %1480, %1483 : vector<1x192xi32>
    %1485 = arith.andi %1482, %1484 : vector<1x192xi1>
    %cst_720 = arith.constant -1.000000e+09 : f32
    %1486 = vector.shape_cast %1485 : vector<1x192xi1> to vector<1x192xi1>
    %1487 = vector.broadcast %1486 : vector<1x192xi1> to vector<8x192xi1>
    %1488 = vector.broadcast %cst_720 : f32 to vector<8x192xf32>
    %1489 = arith.select %1487, %1478, %1488 : vector<8x192xi1>, vector<8x192xf32>
    %1490 = arith.maximumf %1477, %1489 : vector<8x192xf32>
    %c0_721 = arith.constant 0 : index
    %c127_722 = arith.constant 127 : index
    %1491 = vector.load %arg13[%c0_721, %c127_722] : memref<8x512xf32, #tpu.memory_space<vmem>>, vector<8x192xf32>
    %c-1_i32_723 = arith.constant -1 : i32
    %1492 = vector.broadcast %c-1_i32_723 : i32 to vector<1x192xi32>
    %1493 = arith.addi %0, %1492 : vector<1x192xi32>
    %c0_i32_724 = arith.constant 0 : i32
    %1494 = vector.broadcast %c0_i32_724 : i32 to vector<1x192xi32>
    %1495 = arith.cmpi sge, %1493, %1494 : vector<1x192xi32>
    %c12_i32_725 = arith.constant 12 : i32
    %1496 = vector.broadcast %c12_i32_725 : i32 to vector<1x192xi32>
    %1497 = arith.cmpi slt, %1493, %1496 : vector<1x192xi32>
    %1498 = arith.andi %1495, %1497 : vector<1x192xi1>
    %cst_726 = arith.constant -1.000000e+09 : f32
    %1499 = vector.shape_cast %1498 : vector<1x192xi1> to vector<1x192xi1>
    %1500 = vector.broadcast %1499 : vector<1x192xi1> to vector<8x192xi1>
    %1501 = vector.broadcast %cst_726 : f32 to vector<8x192xf32>
    %1502 = arith.select %1500, %1491, %1501 : vector<8x192xi1>, vector<8x192xf32>
    %1503 = arith.maximumf %1490, %1502 : vector<8x192xf32>
    %c0_727 = arith.constant 0 : index
    %c128_728 = arith.constant 128 : index
    %1504 = vector.load %arg13[%c0_727, %c128_728] : memref<8x512xf32, #tpu.memory_space<vmem>>, vector<8x192xf32>
    %c0_i32_729 = arith.constant 0 : i32
    %1505 = vector.broadcast %c0_i32_729 : i32 to vector<1x192xi32>
    %1506 = arith.addi %0, %1505 : vector<1x192xi32>
    %c0_i32_730 = arith.constant 0 : i32
    %1507 = vector.broadcast %c0_i32_730 : i32 to vector<1x192xi32>
    %1508 = arith.cmpi sge, %1506, %1507 : vector<1x192xi32>
    %c12_i32_731 = arith.constant 12 : i32
    %1509 = vector.broadcast %c12_i32_731 : i32 to vector<1x192xi32>
    %1510 = arith.cmpi slt, %1506, %1509 : vector<1x192xi32>
    %1511 = arith.andi %1508, %1510 : vector<1x192xi1>
    %cst_732 = arith.constant -1.000000e+09 : f32
    %1512 = vector.shape_cast %1511 : vector<1x192xi1> to vector<1x192xi1>
    %1513 = vector.broadcast %1512 : vector<1x192xi1> to vector<8x192xi1>
    %1514 = vector.broadcast %cst_732 : f32 to vector<8x192xf32>
    %1515 = arith.select %1513, %1504, %1514 : vector<8x192xi1>, vector<8x192xf32>
    %1516 = arith.maximumf %1503, %1515 : vector<8x192xf32>
    %c0_733 = arith.constant 0 : index
    %c129_734 = arith.constant 129 : index
    %1517 = vector.load %arg13[%c0_733, %c129_734] : memref<8x512xf32, #tpu.memory_space<vmem>>, vector<8x192xf32>
    %c1_i32_735 = arith.constant 1 : i32
    %1518 = vector.broadcast %c1_i32_735 : i32 to vector<1x192xi32>
    %1519 = arith.addi %0, %1518 : vector<1x192xi32>
    %c0_i32_736 = arith.constant 0 : i32
    %1520 = vector.broadcast %c0_i32_736 : i32 to vector<1x192xi32>
    %1521 = arith.cmpi sge, %1519, %1520 : vector<1x192xi32>
    %c12_i32_737 = arith.constant 12 : i32
    %1522 = vector.broadcast %c12_i32_737 : i32 to vector<1x192xi32>
    %1523 = arith.cmpi slt, %1519, %1522 : vector<1x192xi32>
    %1524 = arith.andi %1521, %1523 : vector<1x192xi1>
    %cst_738 = arith.constant -1.000000e+09 : f32
    %1525 = vector.shape_cast %1524 : vector<1x192xi1> to vector<1x192xi1>
    %1526 = vector.broadcast %1525 : vector<1x192xi1> to vector<8x192xi1>
    %1527 = vector.broadcast %cst_738 : f32 to vector<8x192xf32>
    %1528 = arith.select %1526, %1517, %1527 : vector<8x192xi1>, vector<8x192xf32>
    %1529 = arith.maximumf %1516, %1528 : vector<8x192xf32>
    %c0_739 = arith.constant 0 : index
    %c143_740 = arith.constant 143 : index
    %1530 = vector.load %arg13[%c0_739, %c143_740] : memref<8x512xf32, #tpu.memory_space<vmem>>, vector<8x192xf32>
    %c-1_i32_741 = arith.constant -1 : i32
    %1531 = vector.broadcast %c-1_i32_741 : i32 to vector<1x192xi32>
    %1532 = arith.addi %0, %1531 : vector<1x192xi32>
    %c0_i32_742 = arith.constant 0 : i32
    %1533 = vector.broadcast %c0_i32_742 : i32 to vector<1x192xi32>
    %1534 = arith.cmpi sge, %1532, %1533 : vector<1x192xi32>
    %c12_i32_743 = arith.constant 12 : i32
    %1535 = vector.broadcast %c12_i32_743 : i32 to vector<1x192xi32>
    %1536 = arith.cmpi slt, %1532, %1535 : vector<1x192xi32>
    %1537 = arith.andi %1534, %1536 : vector<1x192xi1>
    %cst_744 = arith.constant -1.000000e+09 : f32
    %1538 = vector.shape_cast %1537 : vector<1x192xi1> to vector<1x192xi1>
    %1539 = vector.broadcast %1538 : vector<1x192xi1> to vector<8x192xi1>
    %1540 = vector.broadcast %cst_744 : f32 to vector<8x192xf32>
    %1541 = arith.select %1539, %1530, %1540 : vector<8x192xi1>, vector<8x192xf32>
    %1542 = arith.maximumf %1529, %1541 : vector<8x192xf32>
    %c0_745 = arith.constant 0 : index
    %c144_746 = arith.constant 144 : index
    %1543 = vector.load %arg13[%c0_745, %c144_746] : memref<8x512xf32, #tpu.memory_space<vmem>>, vector<8x192xf32>
    %c0_i32_747 = arith.constant 0 : i32
    %1544 = vector.broadcast %c0_i32_747 : i32 to vector<1x192xi32>
    %1545 = arith.addi %0, %1544 : vector<1x192xi32>
    %c0_i32_748 = arith.constant 0 : i32
    %1546 = vector.broadcast %c0_i32_748 : i32 to vector<1x192xi32>
    %1547 = arith.cmpi sge, %1545, %1546 : vector<1x192xi32>
    %c12_i32_749 = arith.constant 12 : i32
    %1548 = vector.broadcast %c12_i32_749 : i32 to vector<1x192xi32>
    %1549 = arith.cmpi slt, %1545, %1548 : vector<1x192xi32>
    %1550 = arith.andi %1547, %1549 : vector<1x192xi1>
    %cst_750 = arith.constant -1.000000e+09 : f32
    %1551 = vector.shape_cast %1550 : vector<1x192xi1> to vector<1x192xi1>
    %1552 = vector.broadcast %1551 : vector<1x192xi1> to vector<8x192xi1>
    %1553 = vector.broadcast %cst_750 : f32 to vector<8x192xf32>
    %1554 = arith.select %1552, %1543, %1553 : vector<8x192xi1>, vector<8x192xf32>
    %1555 = arith.maximumf %1542, %1554 : vector<8x192xf32>
    %c0_751 = arith.constant 0 : index
    %c145_752 = arith.constant 145 : index
    %1556 = vector.load %arg13[%c0_751, %c145_752] : memref<8x512xf32, #tpu.memory_space<vmem>>, vector<8x192xf32>
    %c1_i32_753 = arith.constant 1 : i32
    %1557 = vector.broadcast %c1_i32_753 : i32 to vector<1x192xi32>
    %1558 = arith.addi %0, %1557 : vector<1x192xi32>
    %c0_i32_754 = arith.constant 0 : i32
    %1559 = vector.broadcast %c0_i32_754 : i32 to vector<1x192xi32>
    %1560 = arith.cmpi sge, %1558, %1559 : vector<1x192xi32>
    %c12_i32_755 = arith.constant 12 : i32
    %1561 = vector.broadcast %c12_i32_755 : i32 to vector<1x192xi32>
    %1562 = arith.cmpi slt, %1558, %1561 : vector<1x192xi32>
    %1563 = arith.andi %1560, %1562 : vector<1x192xi1>
    %cst_756 = arith.constant -1.000000e+09 : f32
    %1564 = vector.shape_cast %1563 : vector<1x192xi1> to vector<1x192xi1>
    %1565 = vector.broadcast %1564 : vector<1x192xi1> to vector<8x192xi1>
    %1566 = vector.broadcast %cst_756 : f32 to vector<8x192xf32>
    %1567 = arith.select %1565, %1556, %1566 : vector<8x192xi1>, vector<8x192xf32>
    %1568 = arith.maximumf %1555, %1567 : vector<8x192xf32>
    %c0_757 = arith.constant 0 : index
    %c0_758 = arith.constant 0 : index
    %1569 = vector.load %arg11[%c0_757, %c0_758] : memref<192x36xf32, #tpu.memory_space<vmem>>, vector<192x36xf32>
    %cst_759 = arith.constant dense<0.000000e+00> : vector<8x36xf32>
    %1570 = tpu.matmul %1568, %1569, %cst_759 {dimension_numbers = #tpu.dot_dimension_numbers<[1], [0], [0], [1], [0, 0, 1, 1], [], []>} : vector<8x192xf32>, vector<192x36xf32>, vector<8x36xf32> -> vector<8x36xf32>
    %c0_760 = arith.constant 0 : index
    %c0_761 = arith.constant 0 : index
    %c0_762 = arith.constant 0 : index
    %1571 = vector.load %arg12[%c0_760, %c0_761, %c0_762] : memref<1x8x36xf32, #tpu.memory_space<vmem>>, vector<1x8x36xf32>
    %1572 = vector.shape_cast %1571 : vector<1x8x36xf32> to vector<8x36xf32>
    %1573 = vector.shape_cast %1570 : vector<8x36xf32> to vector<1x8x36xf32>
    tpu.vector_store %arg12[%c0_760, %c0_761, %c0_762], %1573 {strides = array<i32>} : memref<1x8x36xf32, #tpu.memory_space<vmem>>, vector<1x8x36xf32>,
    return
  }
  func.func @transform_0(%arg0: i32) -> (i32, i32, i32) {
    %c0_i32 = arith.constant 0 : i32
    %c0_i32_0 = arith.constant 0 : i32
    %c0_i32_1 = arith.constant 0 : i32
    return %arg0, %c0_i32, %c0_i32_0 : i32, i32, i32
  }
  func.func @transform_1(%arg0: i32) -> (i32, i32) {
    %c0_i32 = arith.constant 0 : i32
    %c0_i32_0 = arith.constant 0 : i32
    %c0_i32_1 = arith.constant 0 : i32
    return %c0_i32, %c0_i32_0 : i32, i32
  }
  func.func @transform_2(%arg0: i32) -> (i32, i32, i32) {
    %c0_i32 = arith.constant 0 : i32
    %c0_i32_0 = arith.constant 0 : i32
    %c0_i32_1 = arith.constant 0 : i32
    %c0_i32_2 = arith.constant 0 : i32
    return %c0_i32, %c0_i32_0, %c0_i32_1 : i32, i32, i32
  }
  func.func @transform_3(%arg0: i32) -> (i32, i32) {
    %c0_i32 = arith.constant 0 : i32
    %c0_i32_0 = arith.constant 0 : i32
    %c0_i32_1 = arith.constant 0 : i32
    return %c0_i32, %c0_i32_0 : i32, i32
  }
  func.func @transform_4(%arg0: i32) -> (i32, i32, i32) {
    %c0_i32 = arith.constant 0 : i32
    %c0_i32_0 = arith.constant 0 : i32
    %c0_i32_1 = arith.constant 0 : i32
    %c0_i32_2 = arith.constant 0 : i32
    return %c0_i32, %c0_i32_0, %c0_i32_1 : i32, i32, i32
  }
  func.func @transform_5(%arg0: i32) -> (i32, i32) {
    %c0_i32 = arith.constant 0 : i32
    %c0_i32_0 = arith.constant 0 : i32
    %c0_i32_1 = arith.constant 0 : i32
    return %c0_i32, %c0_i32_0 : i32, i32
  }
  func.func @transform_6(%arg0: i32) -> (i32, i32, i32) {
    %c0_i32 = arith.constant 0 : i32
    %c0_i32_0 = arith.constant 0 : i32
    %c0_i32_1 = arith.constant 0 : i32
    %c0_i32_2 = arith.constant 0 : i32
    return %c0_i32, %c0_i32_0, %c0_i32_1 : i32, i32, i32
  }
  func.func @transform_7(%arg0: i32) -> (i32, i32) {
    %c0_i32 = arith.constant 0 : i32
    %c0_i32_0 = arith.constant 0 : i32
    %c0_i32_1 = arith.constant 0 : i32
    return %c0_i32, %c0_i32_0 : i32, i32
  }
  func.func @transform_8(%arg0: i32) -> (i32, i32, i32) {
    %c0_i32 = arith.constant 0 : i32
    %c0_i32_0 = arith.constant 0 : i32
    %c0_i32_1 = arith.constant 0 : i32
    %c0_i32_2 = arith.constant 0 : i32
    return %c0_i32, %c0_i32_0, %c0_i32_1 : i32, i32, i32
  }
  func.func @transform_9(%arg0: i32) -> (i32, i32) {
    %c0_i32 = arith.constant 0 : i32
    %c0_i32_0 = arith.constant 0 : i32
    %c0_i32_1 = arith.constant 0 : i32
    return %c0_i32, %c0_i32_0 : i32, i32
  }
  func.func @transform_10(%arg0: i32) -> (i32, i32) {
    %c0_i32 = arith.constant 0 : i32
    %c0_i32_0 = arith.constant 0 : i32
    %c0_i32_1 = arith.constant 0 : i32
    return %c0_i32, %c0_i32_0 : i32, i32
  }
  func.func @transform_11(%arg0: i32) -> (i32, i32, i32) {
    %c0_i32 = arith.constant 0 : i32
    %c0_i32_0 = arith.constant 0 : i32
    %c0_i32_1 = arith.constant 0 : i32
    return %arg0, %c0_i32, %c0_i32_0 : i32, i32, i32
  }
}

</mosaic_0001>

<bundles_post_ra>
// kernel: second_feature_forward.1
= control target key start
LH: loop header
LB: loop body
LE: loop exit
PB: predicated region body
PF: predicated region fallthrough
CT: control target
= control target key end

     0   :  { %s4826_s17 = smov 0   ;;  %s6179_s0 = inlined_call_operand.vmem [shape: f32[2,8,256], index: 0, kind: input, shape index: {}]   ;;  %s6180_s1 = inlined_call_operand.vmem [shape: s32[1,192], index: 1, kind: input, shape index: {}]   ;;  %s6181_s2 = inlined_call_operand.vmem [shape: f32[5,8,40], index: 2, kind: input, shape index: {}]   ;;  %s6182_s3 = inlined_call_operand.vmem [shape: f32[8,1], index: 3, kind: input, shape index: {}]   ;;  %s6183_s4 = inlined_call_operand.vmem [shape: f32[7,8,56], index: 4, kind: input, shape index: {}]   ;;  %s6184_s5 = inlined_call_operand.vmem [shape: f32[8,1], index: 5, kind: input, shape index: {}]   ;;  %s6185_s6 = inlined_call_operand.vmem [shape: f32[5,8,40], index: 6, kind: input, shape index: {}]   ;;  %s6186_s7 = inlined_call_operand.vmem [shape: f32[8,1], index: 7, kind: input, shape index: {}]   ;;  %s6187_s8 = inlined_call_operand.vmem [shape: f32[3,8,24], index: 8, kind: input, shape index: {}]   ;;  %s6188_s9 = inlined_call_operand.vmem [shape: f32[8,1], index: 9, kind: input, shape index: {}]   ;;  %s6189_s10 = inlined_call_operand.vmem [shape: f32[192,36], index: 10, kind: input, shape index: {}]   ;;  %s6190_s11 = inlined_call_operand.vmem [shape: f32[2,8,36], index: 11, kind: output, shape index: {}]  }
   0x1 LB: > { %s3607_s18 = sadd.s32 4294967295, %s4703_s17   ;;  %p3611_p0 = scmp.ge.s32.totalorder %s4703_s17, 1  ;;  %s4703_s17 = sphi %s4826_s17, %s21_s17  }
   0x2   : > { %p337_p1 = scmp.lt.s32.totalorder %s4703_s17, 3 }
   0x4   : > { %p338_p2 = pnand %p3611_p0, %p337_p1 }
   0x5   : > { %p376_p3 = scmp.lt.s32.totalorder (!%p338_p2), %s3607_s18, 1  ;;  %v4705_v0 = vmov (!%p338_p2), 0.0   ;;  %v4706_v1 = vmov (!%p338_p2), 0   ;;  %v4850_v2 = vld [vmem:[%s6180_s1] sm:$0x3] (!%p338_p2)  ;;  %s6191_s25 = smov (!%p338_p2), 110   ;;  %v400_v10 = vlaneseq (!%p338_p2) }
   0x6   : > { %341 = sbr.rel (%p338_p2) target bundleno = 1655 (0x677), region = 64  ;;  %2256 = vst [vmem:[#allocation2 + $0x10] sm:$0xff] (!%p338_p2), %v4705_v0  ;;  %635 = vmatprep.mubr.f32.mxu1 (!%p338_p2), %v4705_v0  ;;  %4512 = vset.pattern.permute.xlu0 (!%p338_p2), %v4706_v1  ;;  %v4863_v6 = vadd.s32 (!%p338_p2), 1, %v4850_v2  ;;  %v4866_v7 = vadd.s32 (!%p338_p2), 4294967295, %v4850_v2  ;;  %s6196_s26 = smov (!%p338_p2), 112   ;;  %v6266_v8 = vmov (!%p338_p2), 0 }
   0x7   : > { %835 = vmatprep.mubr.f32.mxu0 (!%p338_p2), %v4705_v0  ;;  %4668 = vset.pattern.permute.xlu1 (!%p338_p2), %v4706_v1  ;;  %s4709_s27 = smov (!%p338_p2), 109   ;;  %s6194_s28 = smov (!%p338_p2), 111   ;;  %v6268_v9 = vmov (!%p338_p2), 0  ;;  %v4970_v11 = vadd.s32 (!%p338_p2), 2, %v4850_v2  ;;  %v464_v12 = vadd.s32 (!%p338_p2), 3, %v4850_v2  ;;  %vm6209_vm6 = vcmp.ge.s32.totalorder (!%p338_p2), %v4850_v2, 0 }
   0x8   : > { %vm2294_vm0 = vcmp.lt.s32.totalorder (!%p338_p2), %v4866_v7, 12  ;;  %vm2346_vm1 = vcmp.lt.s32.totalorder (!%p338_p2), %v4863_v6, 12  ;;  %vm6212_vm2 = vcmp.ge.s32.totalorder (!%p338_p2), %v4866_v7, 0  ;;  %vm413_vm3 = vcmp.ge.s32.totalorder (!%p338_p2), %v4863_v6, 0  ;;  %s4711_s29 = smov (!%p338_p2), 108   ;;  %s6202_s30 = smov (!%p338_p2), 127  }
   0x9   : > { %vm4878_vm4 = vmand (!%p338_p2), %vm6212_vm2, %vm2294_vm0  ;;  %s6200_s12 = smov (!%p338_p2), 126   ;;  %s4714_s13 = smov (!%p338_p2), 124   ;;  %vm397_vm7 = vcmp.lt.s32.totalorder (!%p338_p2), %v4850_v2, 16  ;;  %v401_v13 = vshrl.u32 (!%p338_p2), %v400_v10, 7  ;;  %vm414_vm8 = vcmp.lt.s32.totalorder (!%p338_p2), %v4863_v6, 16  ;;  %vm6208_vm9 = vcmp.ge.s32.totalorder (!%p338_p2), %v4970_v11, 0 }
   0xa   : > { %v6267_v8 = vsel (!%p338_p2), %vm4878_vm4, 4294967295, %v6266_v8  ;;  %vm4888_vm5 = vmand (!%p338_p2), %vm413_vm3, %vm2346_vm1  ;;  %s4715_s14 = smov (!%p338_p2), 125   ;;  %s6204_s15 = smov (!%p338_p2), 1   ;;  %vm441_vm10 = vcmp.lt.s32.totalorder (!%p338_p2), %v4970_v11, 16  ;;  %vm465_vm12 = vcmp.ge.s32.totalorder (!%p338_p2), %v464_v12, 0  ;;  %vm466_vm13 = vcmp.lt.s32.totalorder (!%p338_p2), %v464_v12, 16 }
   0xb   : > { %v6269_v9 = vsel (!%p338_p2), %vm4888_vm5, 4294967295, %v6268_v9  ;;  %s6222_s16 = smov (!%p338_p2), 17   ;;  %s4719_s20 = smov (!%p338_p2), 123   ;;  %vm398_vm11 = vmand (!%p338_p2), %vm6209_vm6, %vm397_vm7  ;;  %v4986_v14 = vsub.s32 (!%p338_p2), 1, %v401_v13  ;;  %v4995_v16 = vsub.s32 (!%p338_p2), 0, %v401_v13  ;;  %v489_v17 = vadd.s32 (!%p338_p2), 4, %v4850_v2 }
   0xc   : > { %s6220_s21 = smov (!%p338_p2), 15   ;;  %s6206_s23 = smov (!%p338_p2), 14   ;;  %vm415_vm14 = vmand (!%p338_p2), %vm413_vm3, %vm414_vm8  ;;  %v399_v15 = vsel (!%p338_p2), %vm398_vm11, 1, %v4706_v1  ;;  %vm6211_vm7 = vcmask (!%p338_p2), 916480   ;;  %vm6210_vm8 = vcmask (!%p338_p2), 908288   ;;  %v6282_v40 = vmov (!%p338_p2), 0 }
   0xd   : > { %s6462_s18 = smov (!%p376_p3, %s3607_s18), 1  ;;  %s4722_s24 = smov 13   ;;  %vm442_vm15 = vmand %vm6208_vm9, %vm441_vm10  ;;  %v416_v18 = vsel %vm415_vm14, 1, %v4706_v1  ;;  %v407_v20 = vrot.slane %v399_v15, %v4986_v14  ;;  %v403_v23 = vrot.slane %v399_v15, %v4995_v16  ;;  %vm490_vm1 = vcmp.ge.s32.totalorder %v489_v17, 0 }
   0xe   : > { %s3870_s19 = sshll.u32 %s6462_s18, 4  ;;  %vm467_vm0 = vmand %vm465_vm12, %vm466_vm13  ;;  %v443_v19 = vsel %vm442_vm15, 1, %v4706_v1  ;;  %v424_v22 = vrot.slane %v416_v18, %v4986_v14  ;;  %vm491_vm3 = vcmp.lt.s32.totalorder %v489_v17, 16  ;;  %v420_v24 = vrot.slane %v416_v18, %v4995_v16 }
   0xf   : > { %s4845_s22 = scalar_lea.vmem %s6179_s0, %s3870_s19  ;;  %s6216_s19 = smov 16   ;;  %v468_v21 = vsel %vm467_vm0, 1, %v4706_v1  ;;  %v451_v25 = vrot.slane %v443_v19, %v4986_v14  ;;  %vm5009_vm10 = vmand %vm490_vm1, %vm491_vm3  ;;  %vm5020_vm11 = vcmp.eq.s32.totalorder %v407_v20, 1  ;;  %vm5028_vm13 = vcmp.eq.s32.totalorder %v403_v23, 1 }
  0x10   : > { %v4853_v3 = vld [vmem:[%s4845_s22] sm:$0xff]  ;;  %v4856_v4 = vld [vmem:[%s4845_s22 + $0x8] sm:$0xff]  ;;  %v476_v28 = vrot.slane %v468_v21, %v4986_v14  ;;  %vm5024_vm12 = vcmp.eq.s32.totalorder %v424_v22, 1  ;;  %vm5032_vm14 = vcmp.eq.s32.totalorder %v420_v24, 1  ;;  %v493_v41 = vsel %vm5009_vm10, 1, %v4706_v1 }
  0x11   : > { %v4860_v5 = vpack.i.bf16 %v4856_v4, %v4853_v3  ;;  %v5018_v30 = vpack.i.bf16 %v4705_v0, %v4856_v4  ;;  %vm5036_vm15 = vcmp.eq.s32.totalorder %v451_v25, 1  ;;  %v447_v42 = vrot.slane %v443_v19, %v4995_v16  ;;  %vm5057_vm10 = vmpackc.low %vm5024_vm12, %vm5020_vm11 }
  0x12   : > { %vm5040_vm0 = vcmp.eq.s32.totalorder %v476_v28, 1  ;;  %v472_v43 = vrot.slane %v468_v21, %v4995_v16  ;;  %vm6214_vm1 = vcmask 900096   ;;  %vm6213_vm3 = vcmask 891904   ;;  %vm5067_vm9 = vmpackc.low %vm5032_vm14, %vm5028_vm13 }
  0x13   : > { %4283 = vrot.lane.b32.xlu1 %v4860_v5, %s6191_s25  ;;  %4273 = vrot.lane.b32.xlu0 %v4860_v5, %s6196_s26  ;;  %v6283_v40 = vsel %vm5040_vm0, 4294967295, %v6282_v40  ;;  %v501_v58 = vrot.slane %v493_v41, %v4986_v14  ;;  %vm5076_vm6 = vmpackc.low %vm5040_vm0, %vm5036_vm15  ;;  %v6290_v60 = vmov 0  ;;  %v6292_v61 = vmov 0 }
  0x14   : > { %vm1143_vm2 = vcmp.lt.s32.totalorder %v4866_v7, 16  ;;  %v497_v10 = vrot.slane %v493_v41, %v4995_v16  ;;  %v6294_v12 = vmov 0  ;;  %v6297_v17 = vmov 0 }
  0x15   : > { %vm5112_vm4 = vcmp.eq.s32.totalorder %v501_v58, 1  ;;  %vm6230_vm0 = vcmask 1039360  }
  0x16   : > { %v6298_v17 = vsel %vm5112_vm4, 4294967295, %v6297_v17 }
  0x17   : > { %4288 = vrot.lane.b32.xlu1 %v4860_v5, %s4709_s27  ;;  %4278 = vrot.lane.b32.xlu0 %v4860_v5, %s6194_s28 }
  0x1b   : > { %555 = vrot.lane.b32.xlu1 %v4853_v3, %s4711_s29  ;;  %4293 = vrot.lane.b32.xlu0 %v4860_v5, %s6202_s30 }
  0x1f   : > { %4298 = vrot.lane.b32.xlu1 %v4860_v5, %s6200_s12  ;;  %557 = vrot.lane.b32.xlu0 %v4856_v4, %s4711_s29 }
  0x23   : > { %506 = vrot.lane.b32.xlu1 %v4856_v4, %s4714_s13  ;;  %4303 = vrot.lane.b32.xlu0 %v4860_v5, %s4715_s14 }
  0x27   : > { %504 = vrot.lane.b32.xlu0 %v4853_v3, %s4714_s13  ;;  %4308 = vrot.lane.b32.xlu1 %v4860_v5, %s6204_s15 }
  0x2b   : > { %1266 = vrot.lane.b32.xlu0 %v4705_v0, %s6204_s15  ;;  %4313 = vrot.lane.b32.xlu1 %v4860_v5, %s6202_s30  ;;  %s4740_s30 = smov 75   ;;  %s6235_s15 = smov 64  }
  0x2f   : > { %4318 = vrot.lane.b32.xlu0 %v4860_v5, %s6200_s12  ;;  %4323 = vrot.lane.b32.xlu1 %v4860_v5, %s4715_s14  ;;  %s4724_s14 = smov 11   ;;  %s4739_s12 = smov 76  }
  0x33   : > { %4328 = vrot.lane.b32.xlu0 %v4860_v5, %s4714_s13  ;;  %4333 = vrot.lane.b32.xlu1 %v4860_v5, %s6222_s16  ;;  %s4723_s13 = smov 12  }
  0x37   : > { %4338 = vrot.lane.b32.xlu0 %v4860_v5, %s6216_s19  ;;  %1159 = vrot.lane.b32.xlu1 %v4705_v0, %s6222_s16  ;;  %s4747_s16 = smov 59  }
  0x3b   : > { %1172 = vrot.lane.b32.xlu0 %v4705_v0, %s6216_s19  ;;  %1317 = vrot.lane.b32.xlu1 %v4853_v3, %s4719_s20  ;;  %s6233_s19 = smov 61  }
  0x3f   : > { %1319 = vrot.lane.b32.xlu0 %v4856_v4, %s4719_s20  ;;  %4343 = vrot.lane.b32.xlu1 %v4860_v5, %s6220_s21  ;;  %s6198_s20 = smov 113  }
  0x43   : > { %4348 = vrot.lane.b32.xlu0 %v4860_v5, %s6206_s23  ;;  %1185 = vrot.lane.b32.xlu1 %v4705_v0, %s6220_s21  ;;  %s6231_s21 = smov 60  }
  0x47   : > { %1198 = vrot.lane.b32.xlu0 %v4705_v0, %s6206_s23  ;;  %4353 = vrot.lane.b32.xlu1 %v4860_v5, %s4722_s24  ;;  %s6224_s23 = smov 62  }
  0x4b   : > { %4358 = vrot.lane.b32.xlu0 %v4860_v5, %s4723_s13  ;;  %1211 = vrot.lane.b32.xlu1 %v4705_v0, %s4722_s24  ;;  %s4726_s24 = smov 107  }
  0x4f   : > { %1224 = vrot.lane.b32.xlu0 %v4705_v0, %s4723_s13  ;;  %1254 = vrot.lane.b32.xlu1 %v4853_v3, %s4724_s14  ;;  %s6193_s13 = smov 97  }
  0x53   : > { %1256 = vrot.lane.b32.xlu0 %v4856_v4, %s4724_s14  ;;  %1252 = vrot.lane.b32.xlu1 %v4705_v0, %s4724_s14  ;;  %s4728_s14 = smov 96  }
  0x57   : > { %4363 = vrot.lane.b32.xlu0 %v4860_v5, %s6198_s20  ;;  %4368 = vrot.lane.b32.xlu1 %v4860_v5, %s6196_s26  ;;  %s4735_s26 = smov 80   ;;  %s4738_s20 = smov 77  }
  0x5b   : > { %4373 = vrot.lane.b32.xlu0 %v4860_v5, %s6194_s28  ;;  %4378 = vrot.lane.b32.xlu1 %v4860_v5, %s6191_s25  ;;  %s4729_s25 = smov 95   ;;  %s4734_s28 = smov 81  }
  0x5f   : > { %4383 = vrot.lane.b32.xlu0 %v4860_v5, %s4709_s27  ;;  %4388 = vrot.lane.b32.xlu1 %v4860_v5, %s4711_s29  ;;  %s4730_s27 = smov 94   ;;  %s4731_s29 = smov 93  }
  0x63   : > { %1533 = vrot.lane.b32.xlu0 %v4853_v3, %s4726_s24  ;;  %1535 = vrot.lane.b32.xlu1 %v4856_v4, %s4726_s24  ;;  %s4732_s24 = smov 92  }
  0x67   : > { %4393 = vrot.lane.b32.xlu0 %v4860_v5, %s6193_s13  ;;  %4398 = vrot.lane.b32.xlu1 %v4860_v5, %s4728_s14  ;;  %s4733_s13 = smov 91  }
  0x6b   : > { %4403 = vrot.lane.b32.xlu0 %v4860_v5, %s4729_s25  ;;  %4408 = vrot.lane.b32.xlu1 %v4860_v5, %s4730_s27 }
  0x6f   : > { %4413 = vrot.lane.b32.xlu0 %v4860_v5, %s4731_s29  ;;  %4418 = vrot.lane.b32.xlu1 %v4860_v5, %s4732_s24 }
  0x73   : > { %1676 = vrot.lane.b32.xlu0 %v4853_v3, %s4733_s13  ;;  %1678 = vrot.lane.b32.xlu1 %v4856_v4, %s4733_s13  ;;  %s4736_s13 = smov 79  }
  0x77   : > { %4423 = vrot.lane.b32.xlu0 %v4860_v5, %s4734_s28  ;;  %4428 = vrot.lane.b32.xlu1 %v4860_v5, %s4735_s26  ;;  %s4737_s28 = smov 78  }
  0x7b   : > { %4433 = vrot.lane.b32.xlu0 %v4860_v5, %s4736_s13  ;;  %4438 = vrot.lane.b32.xlu1 %v4860_v5, %s4737_s28 }
  0x7f   : > { %4443 = vrot.lane.b32.xlu0 %v4860_v5, %s4738_s20  ;;  %4448 = vrot.lane.b32.xlu1 %v4860_v5, %s4739_s12 }
  0x83   : > { %1819 = vrot.lane.b32.xlu0 %v4853_v3, %s4740_s30  ;;  %1821 = vrot.lane.b32.xlu1 %v4856_v4, %s4740_s30  ;;  %s4741_s30 = smov 65  }
  0x85   : > { %v4284_v26 = vpop.permute.xlu1 %4283  ;;  %v4274_v27 = vpop.permute.xlu0 %4273 }
  0x86   : > { %v4275_v34 = vunpack.i.l.bf16 %v4274_v27  ;;  %v4276_v35 = vunpack.i.h.bf16 %v4274_v27  ;;  %v4286_v48 = vunpack.i.h.bf16 %v4284_v26  ;;  %v4285_v50 = vunpack.i.l.bf16 %v4284_v26 }
  0x87   : > { %4453 = vrot.lane.b32.xlu0 %v4860_v5, %s4741_s30  ;;  %4458 = vrot.lane.b32.xlu1 %v4860_v5, %s6235_s15  ;;  %s4743_s30 = smov 63   ;;  %s4750_s15 = smov 47  }
  0x88   : > { %v520_v52 = vsel %vm6211_vm7, %v4275_v34, %v4276_v35  ;;  %vm5084_vm7 = vcmp.eq.s32.totalorder %v472_v43, 1  ;;  %v540_v6 = vsel %vm6214_vm1, %v4285_v50, %v4286_v48  ;;  %vm6296_vm1 = vcmp.ge.s32.totalorder %v4866_v7, 0  ;;  %v3615_v34 = vld [vmem:[%s6181_s2 + $0x8] sm:$0xff] }
  0x89   : > { %v4289_v38 = vpop.permute.xlu1 %4288  ;;  %v4279_v39 = vpop.permute.xlu0 %4278  ;;  %v6293_v61 = vsel %vm5084_vm7, 4294967295, %v6292_v61  ;;  %vm1144_vm5 = vmand %vm6296_vm1, %vm1143_vm2  ;;  %v6299_v7 = vmov 0  ;;  %vm6227_vm2 = vcmask 1022976   ;;  %vm6228_vm1 = vcmask 326656  }
  0x8a   : > { %v4291_v44 = vunpack.i.h.bf16 %v4289_v38  ;;  %v4290_v45 = vunpack.i.l.bf16 %v4289_v38  ;;  %v4280_v46 = vunpack.i.l.bf16 %v4279_v39  ;;  %v4281_v47 = vunpack.i.h.bf16 %v4279_v39 }
  0x8b   : > { %4463 = vrot.lane.b32.xlu0 %v5018_v30, %s4743_s30  ;;  %4468 = vrot.lane.b32.xlu1 %v5018_v30, %s6224_s23  ;;  %v1145_v21 = vsel %vm1144_vm5, 1, %v4706_v1  ;;  %vm6229_vm5 = vcmask 1031168  }
  0x8c   : > { %v3871_v51 = vpack.c.bf16 %v4281_v47, %v4276_v35  ;;  %v530_v53 = vsel %vm6210_vm8, %v4280_v46, %v4281_v47  ;;  %vm5080_vm8 = vcmp.eq.s32.totalorder %v447_v42, 1  ;;  %v550_v62 = vsel %vm6213_vm3, %v4290_v45, %v4291_v44 }
  0x8d   : > { %v556_v55 = vpop.permute.xlu1 %555  ;;  %v4294_v56 = vpop.permute.xlu0 %4293  ;;  %v3874_v57 = vpack.c.bf16 %v530_v53, %v520_v52  ;;  %v6291_v60 = vsel %vm5080_vm8, 4294967295, %v6290_v60  ;;  %v3877_v63 = vpack.c.bf16 %v4291_v44, %v4286_v48  ;;  %vm5106_vm3 = vmpackc.low %vm5084_vm7, %vm5080_vm8  ;;  %v3880_v20 = vpack.c.bf16 %v550_v62, %v540_v6 }
  0x8e   : > { %3873 = vmatprep.subr.msk.bf16.mxu1 %vm5057_vm10, %v3871_v51  ;;  %v6295_v12 = vsel %vm5106_vm3, 4294967295, %v6294_v12  ;;  %v4296_v13 = vunpack.i.h.bf16 %v4294_v56  ;;  %v4295_v15 = vunpack.i.l.bf16 %v4294_v56  ;;  %vm6226_vm7 = vcmask 883712  }
  0x8f   : > { %3876 = vmatpush1.bf16.msk.msra.mxu1 %vm5067_vm9, %v3874_v57  ;;  %1932 = vrot.lane.b32.xlu0 %v4853_v3, %s4743_s30  ;;  %vm5121_vm8 = vcmp.eq.s32.totalorder %v497_v10, 1  ;;  %v1153_v41 = vrot.slane %v1145_v21, %v4986_v14  ;;  %v1149_v47 = vrot.slane %v1145_v21, %v4995_v16  ;;  %v514_v10 = vld [vmem:[%s6181_s2] sm:$0xff] }
  0x90   : > { %1944 = vrot.lane.b32.xlu1 %v4853_v3, %s6224_s23  ;;  %3879 = vmatprep.subr.msk.bf16.mxu1 %vm5076_vm6, %v3877_v63  ;;  %v6300_v7 = vsel %vm5121_vm8, 4294967295, %v6299_v7  ;;  %v3883_v22 = vpack.c.bf16 %v4296_v13, %v4856_v4  ;;  %v434_v23 = vsel %vm6230_vm0, %v4295_v15, %v4296_v13  ;;  %s4748_s23 = smov 49  }
  0x91   : > { %v4299_v18 = vpop.permute.xlu1 %4298  ;;  %v558_v19 = vpop.permute.xlu0 %557  ;;  %v3886_v38 = vpack.c.bf16 %v434_v23, %v4853_v3 }
  0x92   : > { %v4301_v26 = vunpack.i.h.bf16 %v4299_v18  ;;  %v560_v29 = vsel %vm6226_vm7, %v556_v55, %v558_v19  ;;  %v4300_v35 = vunpack.i.l.bf16 %v4299_v18  ;;  %vm6236_vm7 = vcmask 7168  }
  0x93   : > { %3882 = vmatpush1.bf16.msk.msra.mxu1 %vm5106_vm3, %v3880_v20  ;;  %4473 = vrot.lane.b32.xlu0 %v5018_v30, %s6233_s19  ;;  %v1237_v55 = vadd.s32 5, %v4850_v2 }
  0x94   : > { %4478 = vrot.lane.b32.xlu1 %v5018_v30, %s6231_s21  ;;  %3624 = vmatprep.subr.msk.mxu1 %vm5112_vm4, %v558_v19  ;;  %v459_v48 = vsel %vm6229_vm5, %v4300_v35, %v4301_v26  ;;  %vm5162_vm5 = vcmp.eq.s32.totalorder %v1149_v47, 1 }
  0x95   : > { %v507_v24 = vpop.permute.xlu1 %506  ;;  %v4304_v25 = vpop.permute.xlu0 %4303 }
  0x96   : > { %v4306_v27 = vunpack.i.h.bf16 %v4304_v25  ;;  %v4305_v28 = vunpack.i.l.bf16 %v4304_v25 }
  0x97   : > { %3625 = vmatpush1.msk.msra.mxu1 %vm5121_vm8, %v560_v29  ;;  %1956 = vrot.lane.b32.xlu0 %v4853_v3, %s6233_s19  ;;  %s4751_s19 = smov 46  }
  0x98   : > { %v3889_v39 = vpack.c.bf16 %v4306_v27, %v4301_v26  ;;  %1968 = vrot.lane.b32.xlu1 %v4853_v3, %s6231_s21  ;;  %3885 = vmatprep.subr.msk.bf16.mxu1 %vm5057_vm10, %v3883_v22  ;;  %v484_v42 = vsel %vm6227_vm2, %v4305_v28, %v4306_v27  ;;  %vm1155_vm2 = vcmp.eq.s32.totalorder %v1153_v41, 1  ;;  %s4749_s21 = smov 48  }
  0x99   : > { %v505_v43 = vpop.permute.xlu0 %504  ;;  %3626 = vmatmul.mubr.msk.f32.vlgmr.msra.gmra.mrb[0].mxu1 %vm6228_vm1, %v3615_v34  ;;  %v4309_v44 = vpop.permute.xlu1 %4308  ;;  %v3892_v50 = vpack.c.bf16 %v484_v42, %v459_v48  ;;  %vm6237_vm1 = vcmask 1014784   ;;  %vm5172_vm0 = vmpackc.low %vm5020_vm11, %vm1155_vm2  ;;  %vm1238_vm2 = vcmp.ge.s32.totalorder %v1237_v55, 0 }
  0x9a   : > { %3888 = vmatpush1.bf16.msk.msra.mxu1 %vm5067_vm9, %v3886_v38  ;;  %v4311_v45 = vunpack.i.h.bf16 %v4309_v44  ;;  %v4310_v46 = vunpack.i.l.bf16 %v4309_v44  ;;  %709 = vmatprep.mubr.f32.mxu1 %v4705_v0  ;;  %v509_v13 = vsel %vm6237_vm1, %v505_v43, %v507_v24  ;;  %vm5187_vm11 = vmpackc.low %vm5028_vm13, %vm5162_vm5  ;;  %vm6309_vm13 = vcmask 1039360  }
  0x9b   : > { %3891 = vmatprep.subr.msk.bf16.mxu1 %vm5076_vm6, %v3889_v39  ;;  %1982 = vrot.lane.b32.xlu0 %v4856_v4, %s4747_s16  ;;  %vm5197_vm1 = vmpackc.low %vm5036_vm15, %vm5024_vm12  ;;  %vm6310_vm5 = vcmask 326656   ;;  %vm6312_vm15 = vnez %v6291_v60 }
  0x9c   : > { %v1274_v51 = vsel %vm6236_vm7, %v4310_v46, %v4311_v45  ;;  %1984 = vrot.lane.b32.xlu1 %v4705_v0, %s4747_s16 }
  0x9d   : > { %v1267_v52 = vpop.permute.xlu0 %1266  ;;  %v4314_v53 = vpop.permute.xlu1 %4313  ;;  %v3931_v62 = vpack.c.bf16 %v4856_v4, %v1274_v51 }
  0x9e   : > { %3894 = vmatpush1.bf16.msk.msra.mxu1 %vm5106_vm3, %v3892_v50  ;;  %v4316_v57 = vunpack.i.h.bf16 %v4314_v53  ;;  %v4315_v58 = vunpack.i.l.bf16 %v4314_v53  ;;  %v1273_v6 = vsel %vm6236_vm7, %v1267_v52, %v4310_v46  ;;  %vm1239_vm7 = vcmp.lt.s32.totalorder %v1237_v55, 16 }
  0x9f   : > { %3635 = vmatprep.subr.msk.mxu1 %vm5112_vm4, %v507_v24  ;;  %4483 = vrot.lane.b32.xlu0 %v5018_v30, %s4748_s23  ;;  %v3934_v33 = vpack.c.bf16 %v4853_v3, %v1273_v6  ;;  %vm6311_vm3 = vcmask 1031168   ;;  %vm1240_vm12 = vmand %vm1238_vm2, %vm1239_vm7  ;;  %vm6318_vm2 = vcmask 1022976  }
  0xa0   : > { %4488 = vrot.lane.b32.xlu1 %v5018_v30, %s4749_s21  ;;  %v1285_v22 = vsel %vm6309_vm13, %v4315_v58, %v4316_v57  ;;  %vm6315_vm13 = vnez %v6283_v40  ;;  %v1241_v39 = vsel %vm1240_vm12, 1, %v4706_v1  ;;  %vm6242_vm12 = vcmask 130048  }
  0xa1   : > { %v4319_v15 = vpop.permute.xlu0 %4318  ;;  %v4324_v18 = vpop.permute.xlu1 %4323  ;;  %vm5229_vm7 = vmpackc.low %vm5112_vm4, %vm6315_vm13  ;;  %v1249_v44 = vrot.slane %v1241_v39, %v4986_v14  ;;  %vm6243_vm13 = vcmask 138240   ;;  %vm6251_vm4 = vcmask 769024  }
  0xa2   : > { %3636 = vmatpush1.msk.msra.mxu1 %vm5121_vm8, %v509_v13  ;;  %v4321_v19 = vunpack.i.h.bf16 %v4319_v15  ;;  %v4320_v20 = vunpack.i.l.bf16 %v4319_v15  ;;  %v4326_v25 = vunpack.i.h.bf16 %v4324_v18  ;;  %v4325_v32 = vunpack.i.l.bf16 %v4324_v18 }
  0xa3   : > { %3933 = vmatprep.subr.msk.bf16.mxu1 %vm5172_vm0, %v3931_v62  ;;  %3637 = vmatmul.mubr.msk.f32.vlgmr.msra.gmra.mrb[0].mxu1 %vm6310_vm5, %v514_v10  ;;  %vm6319_vm5 = vcmask 1014784   ;;  %v3674_v10 = vld [vmem:[%s6183_s4 + $0x8] sm:$0xff] }
  0xa4   : > { %v1294_v23 = vsel %vm6311_vm3, %v4320_v20, %v4321_v19  ;;  %v3937_v24 = vpack.c.bf16 %v4321_v19, %v4316_v57  ;;  %1980 = vrot.lane.b32.xlu0 %v4853_v3, %s4747_s16  ;;  %2071 = vrot.lane.b32.xlu1 %v4853_v3, %s4748_s23  ;;  %vm5219_vm3 = vmpackc.low %vm6312_vm15, %vm5032_vm14  ;;  %v1303_v36 = vsel %vm6318_vm2, %v4325_v32, %v4326_v25  ;;  %vm1321_vm2 = vcmask 1006592   ;;  %s4761_s16 = smov 30   ;;  %s6365_s23 = smov 127  }
  0xa5   : > { %v3940_v37 = vpack.c.bf16 %v1294_v23, %v1285_v22  ;;  %3936 = vmatpush1.bf16.msk.msra.mxu1 %vm5187_vm11, %v3934_v33  ;;  %v4329_v26 = vpop.permute.xlu0 %4328  ;;  %v4334_v27 = vpop.permute.xlu1 %4333  ;;  %1397 = vmatprep.mubr.f32.mxu1 %v4705_v0  ;;  %vm6320_vm14 = vnez %v6293_v61  ;;  %v1245_v61 = vrot.slane %v1241_v39, %v4995_v16 }
  0xa6   : > { %v4331_v29 = vunpack.i.h.bf16 %v4329_v26  ;;  %v4330_v34 = vunpack.i.l.bf16 %v4329_v26  ;;  %3939 = vmatprep.subr.msk.bf16.mxu1 %vm5197_vm1, %v3937_v24  ;;  %vm5245_vm15 = vmpackc.low %vm5121_vm8, %vm6320_vm14  ;;  %v4336_v50 = vunpack.i.h.bf16 %v4334_v27  ;;  %v4335_v51 = vunpack.i.l.bf16 %v4334_v27 }
  0xa7   : > { %vm5264_vm14 = vcmp.eq.s32.totalorder %v1245_v61, 1  ;;  %vm1329_vm8 = vcmask 457728  }
  0xa8   : > { %v1312_v60 = vsel %vm6319_vm5, %v4330_v34, %v4331_v29  ;;  %v3943_v38 = vpack.c.bf16 %v4331_v29, %v4326_v25  ;;  %2084 = vrot.lane.b32.xlu0 %v4853_v3, %s4749_s21  ;;  %4493 = vrot.lane.b32.xlu1 %v5018_v30, %s4750_s15  ;;  %vm5257_vm5 = vcmp.eq.s32.totalorder %v1249_v44, 1  ;;  %s4752_s21 = smov 45   ;;  %v1167_v62 = vsel %vm6243_vm13, %v4335_v51, %v4336_v50 }
  0xa9   : > { %v3946_v40 = vpack.c.bf16 %v1312_v60, %v1303_v36  ;;  %3942 = vmatpush1.bf16.msk.msra.mxu1 %vm5219_vm3, %v3940_v37  ;;  %v4339_v41 = vpop.permute.xlu0 %4338  ;;  %v1160_v42 = vpop.permute.xlu1 %1159 }
  0xaa   : > { %3945 = vmatprep.subr.msk.bf16.mxu1 %vm5229_vm7, %v3943_v38  ;;  %v4341_v45 = vunpack.i.h.bf16 %v4339_v41  ;;  %v4340_v46 = vunpack.i.l.bf16 %v4339_v41  ;;  %v1166_v13 = vsel %vm6243_vm13, %v1160_v42, %v4335_v51  ;;  %vm1217_vm13 = vcmask 105472   ;;  %v2240_v41 = vld [vmem:[%s6184_s5] sm:$0xff] }
  0xac   : > { %4498 = vrot.lane.b32.xlu0 %v5018_v30, %s4751_s19  ;;  %2097 = vrot.lane.b32.xlu1 %v4853_v3, %s4750_s15  ;;  %v1180_v53 = vsel %vm6242_vm12, %v4340_v46, %v4341_v45  ;;  %s4753_s15 = smov 44  }
  0xad   : > { %3948 = vmatpush1.bf16.msk.msra.mxu1 %vm5245_vm15, %v3946_v40  ;;  %v1173_v47 = vpop.permute.xlu0 %1172  ;;  %v1318_v48 = vpop.permute.xlu1 %1317  ;;  %v3949_v15 = vpack.c.bf16 %v1180_v53, %v1167_v62  ;;  %v1265_v62 = vld [vmem:[%s6183_s4] sm:$0xff] }
  0xae   : > { %v1179_v56 = vsel %vm6242_vm12, %v1173_v47, %v4340_v46  ;;  %vm6244_vm12 = vcmask 113664  }
  0xaf   : > { %v3952_v18 = vpack.c.bf16 %v1179_v56, %v1166_v13 }
  0xb0   : > { %2110 = vrot.lane.b32.xlu0 %v4853_v3, %s4751_s19  ;;  %4503 = vrot.lane.b32.xlu1 %v5018_v30, %s4752_s21  ;;  %s4754_s19 = smov 43  }
  0xb1   : > { %v1320_v57 = vpop.permute.xlu0 %1319  ;;  %v4344_v58 = vpop.permute.xlu1 %4343 }
  0xb2   : > { %v1322_v6 = vsel %vm1321_vm2, %v1318_v48, %v1320_v57  ;;  %3687 = vmatprep.subr.msk.mxu1 %vm5257_vm5, %v1320_v57  ;;  %v4346_v19 = vunpack.i.h.bf16 %v4344_v58  ;;  %v4345_v20 = vunpack.i.l.bf16 %v4344_v58  ;;  %vm6245_vm2 = vcmask 121856  }
  0xb3   : > { %3688 = vmatpush1.msk.msra.mxu1 %vm5264_vm14, %v1322_v6 }
  0xb4   : > { %4508 = vrot.lane.b32.xlu0 %v5018_v30, %s4753_s15  ;;  %2123 = vrot.lane.b32.xlu1 %v4853_v3, %s4752_s21  ;;  %v1193_v25 = vsel %vm6245_vm2, %v4345_v20, %v4346_v19  ;;  %s4755_s21 = smov 18  }
  0xb5   : > { %3951 = vmatprep.subr.msk.bf16.mxu1 %vm5172_vm0, %v3949_v15  ;;  %v4349_v33 = vpop.permute.xlu0 %4348  ;;  %v1186_v22 = vpop.permute.xlu1 %1185  ;;  %3689 = vmatmul.mubr.msk.f32.vlgmr.msra.gmra.mrb[2].mxu1 %vm1329_vm8, %v3674_v10 }
  0xb6   : > { %v4351_v23 = vunpack.i.h.bf16 %v4349_v33  ;;  %v4350_v24 = vunpack.i.l.bf16 %v4349_v33  ;;  %3954 = vmatpush1.bf16.msk.msra.mxu1 %vm5187_vm11, %v3952_v18  ;;  %1471 = vmatprep.mubr.f32.mxu1 %v4705_v0  ;;  %v1192_v29 = vsel %vm6245_vm2, %v1186_v22, %v4345_v20  ;;  %vm1258_vm2 = vcmask 89088  }
  0xb8   : > { %2136 = vrot.lane.b32.xlu0 %v4853_v3, %s4753_s15  ;;  %2151 = vrot.lane.b32.xlu1 %v4856_v4, %s4754_s19  ;;  %v1206_v32 = vsel %vm6244_vm12, %v4350_v24, %v4351_v23  ;;  %s6338_s15 = smov 16  }
  0xb9   : > { %v1199_v37 = vpop.permute.xlu0 %1198  ;;  %v4354_v26 = vpop.permute.xlu1 %4353  ;;  %v3955_v27 = vpack.c.bf16 %v1206_v32, %v1193_v25 }
  0xba   : > { %v1205_v34 = vsel %vm6244_vm12, %v1199_v37, %v4350_v24  ;;  %v4356_v60 = vunpack.i.h.bf16 %v4354_v26  ;;  %v4355_v38 = vunpack.i.l.bf16 %v4354_v26  ;;  %vm1230_vm12 = vcmask 97280  }
  0xbb   : > { %v3958_v36 = vpack.c.bf16 %v1205_v34, %v1192_v29  ;;  %3957 = vmatprep.subr.msk.bf16.mxu1 %vm5197_vm1, %v3955_v27 }
  0xbc   : > { %2153 = vrot.lane.b32.xlu0 %v4705_v0, %s4754_s19  ;;  %2149 = vrot.lane.b32.xlu1 %v4853_v3, %s4754_s19  ;;  %v1219_v45 = vsel %vm1217_vm13, %v4355_v38, %v4356_v60  ;;  %s6337_s19 = smov 15  }
  0xbd   : > { %v4359_v39 = vpop.permute.xlu0 %4358  ;;  %v1212_v40 = vpop.permute.xlu1 %1211  ;;  %3960 = vmatpush1.bf16.msk.msra.mxu1 %vm5219_vm3, %v3958_v36 }
  0xbe   : > { %v4361_v42 = vunpack.i.h.bf16 %v4359_v39  ;;  %v4360_v44 = vunpack.i.l.bf16 %v4359_v39  ;;  %v1218_v50 = vsel %vm1217_vm13, %v1212_v40, %v4355_v38  ;;  %vm6327_vm13 = vcmask 916480  }
  0xc0   : > { %2243 = vperm.xlu0 %4512, %v2240_v41   ;;  %v1232_v46 = vsel %vm1230_vm12, %v4360_v44, %v4361_v42  ;;  %4514 = vrot.lane.b32.xlu1 %v4860_v5, %s4728_s14 }
  0xc1   : > { %v1225_v61 = vpop.permute.xlu0 %1224  ;;  %v3961_v47 = vpack.c.bf16 %v1232_v46, %v1219_v45  ;;  %v1255_v48 = vpop.permute.xlu1 %1254 }
  0xc2   : > { %v1231_v51 = vsel %vm1230_vm12, %v1225_v61, %v4360_v44  ;;  %vm6246_vm12 = vcmask 924672  }
  0xc3   : > { %v3964_v53 = vpack.c.bf16 %v1231_v51, %v1218_v50  ;;  %3963 = vmatprep.subr.msk.bf16.mxu1 %vm5229_vm7, %v3961_v47 }
  0xc4   : > { %4519 = vrot.lane.b32.xlu1 %v4860_v5, %s4729_s25  ;;  %4524 = vrot.lane.b32.xlu0 %v4860_v5, %s4730_s27 }
  0xc5   : > { %v1257_v56 = vpop.permute.xlu0 %1256  ;;  %v1253_v57 = vpop.permute.xlu1 %1252  ;;  %3966 = vmatpush1.bf16.msk.msra.mxu1 %vm5245_vm15, %v3964_v53 }
  0xc6   : > { %v1260_v58 = vsel %vm1258_vm2, %v1255_v48, %v1257_v56  ;;  %v1259_v6 = vsel %vm1258_vm2, %v1253_v57, %v1255_v48  ;;  %vm6328_vm2 = vcmask 908288  }
  0xc7   : > { %3702 = vmatprep.subr.msk.mxu1 %vm5257_vm5, %v1260_v58  ;;  %v3705_v58 = vld [vmem:[%s6183_s4 + $0x10] sm:$0xff] }
  0xc8   : > { %4529 = vrot.lane.b32.xlu1 %v4860_v5, %s4731_s29  ;;  %756 = vrot.lane.b32.xlu0 %v4853_v3, %s4732_s24  ;;  %s6332_s29 = smov 64  }
  0xc9   : > { %v4364_v10 = vpop.permute.xlu0 %4363  ;;  %v4369_v13 = vpop.permute.xlu1 %4368  ;;  %3703 = vmatpush1.msk.msra.mxu1 %vm5264_vm14, %v1259_v6 }
  0xca   : > { %v4366_v15 = vunpack.i.h.bf16 %v4364_v10  ;;  %v4365_v18 = vunpack.i.l.bf16 %v4364_v10  ;;  %v4371_v19 = vunpack.i.h.bf16 %v4369_v13  ;;  %v4370_v20 = vunpack.i.l.bf16 %v4369_v13  ;;  %3704 = vmatmul.mubr.msk.f32.vlgmr.msra.gmra.mrb[2].mxu1 %vm1329_vm8, %v1265_v62 }
  0xcb   : > { %1612 = vmatprep.mubr.f32.mxu1 %v4705_v0 }
  0xcc   : > { %v1483_v33 = vsel %vm6246_vm12, %v4365_v18, %v4366_v15  ;;  %v3967_v22 = vpack.c.bf16 %v4371_v19, %v4366_v15  ;;  %v1492_v23 = vsel %vm6327_vm13, %v4370_v20, %v4371_v19  ;;  %758 = vrot.lane.b32.xlu1 %v4856_v4, %s4732_s24  ;;  %4534 = vrot.lane.b32.xlu0 %v4860_v5, %s4735_s26  ;;  %vm6329_vm13 = vcmask 900096   ;;  %s6334_s24 = smov 61   ;;  %s4756_s26 = smov 34  }
  0xcd   : > { %v3970_v24 = vpack.c.bf16 %v1492_v23, %v1483_v33  ;;  %v4374_v25 = vpop.permute.xlu0 %4373  ;;  %v4379_v32 = vpop.permute.xlu1 %4378  ;;  %vm1537_vm12 = vcmask 875520  }
  0xce   : > { %v4376_v37 = vunpack.i.h.bf16 %v4374_v25  ;;  %v4375_v26 = vunpack.i.l.bf16 %v4374_v25  ;;  %v4381_v27 = vunpack.i.h.bf16 %v4379_v32  ;;  %v4380_v29 = vunpack.i.l.bf16 %v4379_v32  ;;  %3969 = vmatprep.subr.msk.bf16.mxu1 %vm5172_vm0, %v3967_v22 }
  0xcf   : > { %3972 = vmatpush1.bf16.msk.msra.mxu1 %vm5187_vm11, %v3970_v24 }
  0xd0   : > { %v1501_v34 = vsel %vm6328_vm2, %v4375_v26, %v4376_v37  ;;  %v3973_v36 = vpack.c.bf16 %v4381_v27, %v4376_v37  ;;  %v1510_v60 = vsel %vm6329_vm13, %v4380_v29, %v4381_v27  ;;  %4539 = vrot.lane.b32.xlu1 %v4860_v5, %s4736_s13  ;;  %4544 = vrot.lane.b32.xlu0 %v4860_v5, %s4737_s28  ;;  %vm6330_vm2 = vcmask 891904   ;;  %s6335_s13 = smov 60   ;;  %s4759_s28 = smov 32  }
  0xd1   : > { %v3976_v38 = vpack.c.bf16 %v1510_v60, %v1501_v34  ;;  %v4384_v39 = vpop.permute.xlu0 %4383  ;;  %v4389_v40 = vpop.permute.xlu1 %4388  ;;  %vm6331_vm13 = vcmask 883712  }
  0xd2   : > { %v4386_v41 = vunpack.i.h.bf16 %v4384_v39  ;;  %v4385_v42 = vunpack.i.l.bf16 %v4384_v39  ;;  %v4391_v44 = vunpack.i.h.bf16 %v4389_v40  ;;  %v4390_v45 = vunpack.i.l.bf16 %v4389_v40  ;;  %3975 = vmatprep.subr.msk.bf16.mxu1 %vm5197_vm1, %v3973_v36 }
  0xd3   : > { %3978 = vmatpush1.bf16.msk.msra.mxu1 %vm5219_vm3, %v3976_v38 }
  0xd4   : > { %v1519_v46 = vsel %vm6330_vm2, %v4385_v42, %v4386_v41  ;;  %v3979_v61 = vpack.c.bf16 %v4391_v44, %v4386_v41  ;;  %v1528_v47 = vsel %vm6331_vm13, %v4390_v45, %v4391_v44  ;;  %4549 = vrot.lane.b32.xlu1 %v4860_v5, %s4738_s20  ;;  %4554 = vrot.lane.b32.xlu0 %v5018_v30, %s4743_s30  ;;  %vm6249_vm2 = vcmask 793600   ;;  %s6339_s20 = smov 14  }
  0xd5   : > { %v3982_v48 = vpack.c.bf16 %v1528_v47, %v1519_v46  ;;  %v1534_v50 = vpop.permute.xlu0 %1533  ;;  %v1536_v51 = vpop.permute.xlu1 %1535  ;;  %vm6250_vm13 = vcmask 785408   ;;  %v5404_v47 = vld [vmem:[#allocation2 + $0x10] sm:$0xff] }
  0xd6   : > { %3981 = vmatprep.subr.msk.bf16.mxu1 %vm5229_vm7, %v3979_v61  ;;  %v1538_v53 = vsel %vm1537_vm12, %v1534_v50, %v1536_v51  ;;  %vm6254_vm12 = vcmask 777216  }
  0xd7   : > { %3984 = vmatpush1.bf16.msk.msra.mxu1 %vm5245_vm15, %v3982_v48 }
  0xd8   : > { %3718 = vmatprep.subr.msk.mxu1 %vm5257_vm5, %v1536_v51  ;;  %884 = vrot.lane.b32.xlu1 %v4853_v3, %s4739_s12 }
  0xd9   : > { %v4394_v56 = vpop.permute.xlu0 %4393  ;;  %v4399_v57 = vpop.permute.xlu1 %4398  ;;  %886 = vrot.lane.b32.xlu0 %v4856_v4, %s4739_s12  ;;  %s6333_s12 = smov 62  }
  0xda   : > { %v4396_v62 = vunpack.i.h.bf16 %v4394_v56  ;;  %v4395_v6 = vunpack.i.l.bf16 %v4394_v56  ;;  %v4401_v10 = vunpack.i.h.bf16 %v4399_v57  ;;  %v4400_v13 = vunpack.i.l.bf16 %v4399_v57 }
  0xdb   : > { %3719 = vmatpush1.msk.msra.mxu1 %vm5264_vm14, %v1538_v53 }
  0xdc   : > { %v1626_v15 = vsel %vm6249_vm2, %v4395_v6, %v4396_v62  ;;  %v3985_v18 = vpack.c.bf16 %v4401_v10, %v4396_v62  ;;  %v1635_v19 = vsel %vm6250_vm13, %v4400_v13, %v4401_v10  ;;  %3720 = vmatmul.mubr.msk.f32.vlgmr.msra.gmra.mrb[2].mxu1 %vm1329_vm8, %v3705_v58  ;;  %4559 = vrot.lane.b32.xlu1 %v4860_v5, %s6332_s29  ;;  %vm6253_vm2 = vcmask 760832   ;;  %v4695_v58 = vld [vmem:[%s4845_s22] sm:$0xff]  ;;  %s6336_s22 = smov 17   ;;  %s6366_s29 = smov 126  }
  0xdd   : > { %v3988_v20 = vpack.c.bf16 %v1635_v19, %v1626_v15  ;;  %v4404_v33 = vpop.permute.xlu0 %4403  ;;  %v4409_v22 = vpop.permute.xlu1 %4408  ;;  %988 = vrot.lane.b32.xlu0 %v4853_v3, %s4743_s30  ;;  %1755 = vmatprep.mubr.f32.mxu1 %v4705_v0  ;;  %vm6252_vm13 = vcmask 752640   ;;  %s4760_s30 = smov 2  }
  0xde   : > { %v4406_v23 = vunpack.i.h.bf16 %v4404_v33  ;;  %v4405_v24 = vunpack.i.l.bf16 %v4404_v33  ;;  %v4411_v25 = vunpack.i.h.bf16 %v4409_v22  ;;  %v4410_v32 = vunpack.i.l.bf16 %v4409_v22  ;;  %3987 = vmatprep.subr.msk.bf16.mxu1 %vm5172_vm0, %v3985_v18 }
  0xdf   : > { %3990 = vmatpush1.bf16.msk.msra.mxu1 %vm5187_vm11, %v3988_v20 }
  0xe0   : > { %v1644_v5 = vsel %vm6254_vm12, %v4405_v24, %v4406_v23  ;;  %v3991_v37 = vpack.c.bf16 %v4411_v25, %v4406_v23  ;;  %v1653_v26 = vsel %vm6251_vm4, %v4410_v32, %v4411_v25  ;;  %4564 = vrot.lane.b32.xlu1 %v5018_v30, %s6333_s12  ;;  %vm1680_vm4 = vcmask 744448  }
  0xe1   : > { %v3994_v27 = vpack.c.bf16 %v1653_v26, %v1644_v5  ;;  %v4414_v0 = vpop.permute.xlu0 %4413  ;;  %v4419_v29 = vpop.permute.xlu1 %4418  ;;  %4569 = vrot.lane.b32.xlu0 %v5018_v30, %s6334_s24  ;;  %vm6256_vm12 = vcmask 637952  }
  0xe2   : > { %v4416_v34 = vunpack.i.h.bf16 %v4414_v0  ;;  %v4415_v36 = vunpack.i.l.bf16 %v4414_v0  ;;  %v4421_v60 = vunpack.i.h.bf16 %v4419_v29  ;;  %v4420_v38 = vunpack.i.l.bf16 %v4419_v29  ;;  %3993 = vmatprep.subr.msk.bf16.mxu1 %vm5197_vm1, %v3991_v37 }
  0xe3   : > { %3996 = vmatpush1.bf16.msk.msra.mxu1 %vm5219_vm3, %v3994_v27 }
  0xe4   : > { %v1662_v39 = vsel %vm6253_vm2, %v4415_v36, %v4416_v34  ;;  %v3997_v40 = vpack.c.bf16 %v4421_v60, %v4416_v34  ;;  %v1671_v41 = vsel %vm6252_vm13, %v4420_v38, %v4421_v60  ;;  %1001 = vrot.lane.b32.xlu1 %v4853_v3, %s6333_s12  ;;  %vm1768_vm13 = vcmask 662528   ;;  %s6368_s12 = smov 112  }
  0xe5   : > { %v4000_v42 = vpack.c.bf16 %v1671_v41, %v1662_v39  ;;  %v1677_v30 = vpop.permute.xlu0 %1676  ;;  %v1679_v44 = vpop.permute.xlu1 %1678  ;;  %1014 = vrot.lane.b32.xlu0 %v4853_v3, %s6334_s24  ;;  %vm6255_vm2 = vcmask 654336   ;;  %v3721_v3 = vld [vmem:[%s6183_s4 + $0x18] sm:$0xff]  ;;  %v3737_v41 = vld [vmem:[%s6183_s4 + $0x20] sm:$0xff]  ;;  %s4757_s24 = smov 33  }
  0xe6   : > { %3999 = vmatprep.subr.msk.bf16.mxu1 %vm5229_vm7, %v3997_v40  ;;  %v1681_v45 = vsel %vm1680_vm4, %v1677_v30, %v1679_v44  ;;  %vm6259_vm4 = vcmask 646144  }
  0xe7   : > { %4002 = vmatpush1.bf16.msk.msra.mxu1 %vm5245_vm15, %v4000_v42 }
  0xe8   : > { %3734 = vmatprep.subr.msk.mxu1 %vm5257_vm5, %v1679_v44  ;;  %1029 = vrot.lane.b32.xlu1 %v4856_v4, %s6335_s13 }
  0xe9   : > { %v4424_v46 = vpop.permute.xlu0 %4423  ;;  %v4429_v61 = vpop.permute.xlu1 %4428  ;;  %1031 = vrot.lane.b32.xlu0 %v5404_v47, %s6335_s13 }
  0xea   : > { %v4426_v48 = vunpack.i.h.bf16 %v4424_v46  ;;  %v4425_v50 = vunpack.i.l.bf16 %v4424_v46  ;;  %v4431_v51 = vunpack.i.h.bf16 %v4429_v61  ;;  %v4430_v53 = vunpack.i.l.bf16 %v4429_v61 }
  0xeb   : > { %3735 = vmatpush1.msk.msra.mxu1 %vm5264_vm14, %v1681_v45 }
  0xec   : > { %v1769_v4 = vsel %vm1768_vm13, %v4425_v50, %v4426_v48  ;;  %v4003_v56 = vpack.c.bf16 %v4431_v51, %v4426_v48  ;;  %v1778_v57 = vsel %vm6255_vm2, %v4430_v53, %v4431_v51  ;;  %3736 = vmatmul.mubr.msk.f32.vlgmr.msra.gmra.mrb[2].mxu1 %vm1329_vm8, %v3721_v3  ;;  %1027 = vrot.lane.b32.xlu1 %v4695_v58, %s6335_s13  ;;  %vm6258_vm13 = vcmask 629760   ;;  %s4758_s13 = smov 31  }
  0xed   : > { %v4006_v62 = vpack.c.bf16 %v1778_v57, %v1769_v4  ;;  %v4434_v6 = vpop.permute.xlu0 %4433  ;;  %v4439_v10 = vpop.permute.xlu1 %4438  ;;  %1898 = vmatprep.mubr.f32.mxu1 %v5404_v47  ;;  %vm6257_vm2 = vcmask 621568   ;;  %2399 = vrot.lane.b32.xlu0 %v5404_v47, %s4755_s21 }
  0xee   : > { %v4436_v13 = vunpack.i.h.bf16 %v4434_v6  ;;  %v4435_v15 = vunpack.i.l.bf16 %v4434_v6  ;;  %v4441_v18 = vunpack.i.h.bf16 %v4439_v10  ;;  %v4440_v19 = vunpack.i.l.bf16 %v4439_v10  ;;  %4005 = vmatprep.subr.msk.bf16.mxu1 %vm5172_vm0, %v4003_v56 }
  0xef   : > { %4008 = vmatpush1.bf16.msk.msra.mxu1 %vm5187_vm11, %v4006_v62 }
  0xf0   : > { %v1787_v20 = vsel %vm6259_vm4, %v4435_v15, %v4436_v13  ;;  %v4009_v33 = vpack.c.bf16 %v4441_v18, %v4436_v13  ;;  %v1796_v22 = vsel %vm6256_vm12, %v4440_v19, %v4441_v18  ;;  %2412 = vrot.lane.b32.xlu1 %v5404_v47, %s6336_s22  ;;  %vm1823_vm12 = vcmask 613376  }
  0xf1   : > { %v4012_v23 = vpack.c.bf16 %v1796_v22, %v1787_v20  ;;  %v4444_v24 = vpop.permute.xlu0 %4443  ;;  %v4449_v25 = vpop.permute.xlu1 %4448  ;;  %2424 = vrot.lane.b32.xlu0 %v5404_v47, %s6338_s15  ;;  %vm6261_vm4 = vcmask 506880  }
  0xf2   : > { %v4446_v32 = vunpack.i.h.bf16 %v4444_v24  ;;  %v4445_v5 = vunpack.i.l.bf16 %v4444_v24  ;;  %v4451_v37 = vunpack.i.h.bf16 %v4449_v25  ;;  %v4450_v26 = vunpack.i.l.bf16 %v4449_v25  ;;  %4011 = vmatprep.subr.msk.bf16.mxu1 %vm5197_vm1, %v4009_v33 }
  0xf3   : > { %4014 = vmatpush1.bf16.msk.msra.mxu1 %vm5219_vm3, %v4012_v23 }
  0xf4   : > { %v1805_v27 = vsel %vm6258_vm13, %v4445_v5, %v4446_v32  ;;  %v4015_v0 = vpack.c.bf16 %v4451_v37, %v4446_v32  ;;  %v1814_v29 = vsel %vm6257_vm2, %v4450_v26, %v4451_v37  ;;  %2436 = vrot.lane.b32.xlu1 %v5404_v47, %s6337_s19  ;;  %vm1911_vm2 = vcmask 531456  }
  0xf5   : > { %v4018_v34 = vpack.c.bf16 %v1814_v29, %v1805_v27  ;;  %v1820_v36 = vpop.permute.xlu0 %1819  ;;  %v1822_v60 = vpop.permute.xlu1 %1821  ;;  %vm6260_vm13 = vcmask 523264   ;;  %2281 = vrot.lane.b32.xlu0 %v5404_v47, %s4756_s26 }
  0xf6   : > { %4017 = vmatprep.subr.msk.bf16.mxu1 %vm5229_vm7, %v4015_v0  ;;  %v1824_v38 = vsel %vm1823_vm12, %v1820_v36, %v1822_v60  ;;  %vm994_vm12 = vcmask 515072  }
  0xf7   : > { %4020 = vmatpush1.bf16.msk.msra.mxu1 %vm5245_vm15, %v4018_v34 }
  0xf8   : > { %3750 = vmatprep.subr.msk.mxu1 %vm5257_vm5, %v1822_v60  ;;  %2307 = vrot.lane.b32.xlu1 %v5404_v47, %s4757_s24 }
  0xf9   : > { %v4454_v39 = vpop.permute.xlu0 %4453  ;;  %v4459_v40 = vpop.permute.xlu1 %4458  ;;  %2448 = vrot.lane.b32.xlu0 %v5404_v47, %s6339_s20 }
  0xfa   : > { %v4456_v42 = vunpack.i.h.bf16 %v4454_v39  ;;  %v4455_v30 = vunpack.i.l.bf16 %v4454_v39  ;;  %v4461_v44 = vunpack.i.h.bf16 %v4459_v40  ;;  %v4460_v45 = vunpack.i.l.bf16 %v4459_v40 }
  0xfb   : > { %3751 = vmatpush1.msk.msra.mxu1 %vm5264_vm14, %v1824_v38 }
  0xfc   : > { %v1912_v46 = vsel %vm1911_vm2, %v4455_v30, %v4456_v42  ;;  %v4021_v61 = vpack.c.bf16 %v4461_v44, %v4456_v42  ;;  %v1921_v3 = vsel %vm6260_vm13, %v4460_v45, %v4461_v44  ;;  %3752 = vmatmul.mubr.msk.f32.vlgmr.msra.gmra.mrb[2].mxu1 %vm1329_vm8, %v3737_v41  ;;  %vm6262_vm2 = vcmask 498688   ;;  %2333 = vrot.lane.b32.xlu1 %v5404_v47, %s4759_s28 }
  0xfd   : > { %v4024_v48 = vpack.c.bf16 %v1921_v3, %v1912_v46  ;;  %v4464_v50 = vpop.permute.xlu0 %4463  ;;  %v4469_v51 = vpop.permute.xlu1 %4468  ;;  %2062 = vmatprep.mubr.f32.mxu1 %v5404_v47  ;;  %vm6263_vm13 = vcmask 490496   ;;  %2359 = vrot.lane.b32.xlu0 %v5404_v47, %s4758_s13 }
  0xfe   : > { %v4466_v53 = vunpack.i.h.bf16 %v4464_v50  ;;  %v4465_v4 = vunpack.i.l.bf16 %v4464_v50  ;;  %v4471_v56 = vunpack.i.h.bf16 %v4469_v51  ;;  %v4470_v57 = vunpack.i.l.bf16 %v4469_v51  ;;  %4023 = vmatprep.subr.msk.bf16.mxu1 %vm5172_vm0, %v4021_v61  ;;  %v3753_v50 = vld [vmem:[%s6183_s4 + $0x28] sm:$0xff] }
  0xff   : > { %4026 = vmatpush1.bf16.msk.msra.mxu1 %vm5187_vm11, %v4024_v48 }
 0x100   : > { %v1939_v58 = vsel %vm994_vm12, %v4465_v4, %v4466_v53  ;;  %v1951_v62 = vsel %vm6261_vm4, %v4470_v57, %v4471_v56  ;;  %2385 = vrot.lane.b32.xlu1 %v5404_v47, %s4761_s16 }
 0x101   : > { %v1933_v6 = vpop.permute.xlu0 %1932  ;;  %v4027_v10 = vpack.c.bf16 %v1951_v62, %v1939_v58  ;;  %2610 = vrot.lane.b32.xlu0 %v5404_v47, %s4760_s30 }
 0x102   : > { %v1938_v13 = vsel %vm994_vm12, %v1933_v6, %v4465_v4  ;;  %v1945_v15 = vpop.permute.xlu1 %1944 }
 0x103   : > { %v1950_v18 = vsel %vm6261_vm4, %v1945_v15, %v4470_v57  ;;  %4029 = vmatprep.subr.msk.bf16.mxu1 %vm5197_vm1, %v4027_v10  ;;  %vm1986_vm4 = vcmask 482304  }
 0x104   : > { %v4030_v19 = vpack.c.bf16 %v1950_v18, %v1938_v13 }
 0x105   : > { %v4474_v20 = vpop.permute.xlu0 %4473 }
 0x106   : > { %v4476_v33 = vunpack.i.h.bf16 %v4474_v20  ;;  %v4475_v22 = vunpack.i.l.bf16 %v4474_v20  ;;  %v4479_v23 = vpop.permute.xlu1 %4478  ;;  %4032 = vmatpush1.bf16.msk.msra.mxu1 %vm5219_vm3, %v4030_v19 }
 0x107   : > { %v4481_v24 = vunpack.i.h.bf16 %v4479_v23  ;;  %v4480_v25 = vunpack.i.l.bf16 %v4479_v23 }
 0x108   : > { %v1963_v32 = vsel %vm6262_vm2, %v4475_v22, %v4476_v33 }
 0x109   : > { %v1957_v5 = vpop.permute.xlu0 %1956  ;;  %v1975_v37 = vsel %vm6263_vm13, %v4480_v25, %v4481_v24 }
 0x10a   : > { %v1962_v26 = vsel %vm6262_vm2, %v1957_v5, %v4475_v22  ;;  %v1969_v27 = vpop.permute.xlu1 %1968  ;;  %v4033_v0 = vpack.c.bf16 %v1975_v37, %v1963_v32  ;;  %vm2077_vm2 = vcmask 400384  }
 0x10b   : > { %v1974_v29 = vsel %vm6263_vm13, %v1969_v27, %v4480_v25  ;;  %vm2090_vm13 = vcmask 392192  }
 0x10c   : > { %v4036_v34 = vpack.c.bf16 %v1974_v29, %v1962_v26  ;;  %4035 = vmatprep.subr.msk.bf16.mxu1 %vm5229_vm7, %v4033_v0 }
 0x10d   : > { %v1983_v36 = vpop.permute.xlu0 %1982 }
 0x10e   : > { %v1985_v60 = vpop.permute.xlu1 %1984  ;;  %4038 = vmatpush1.bf16.msk.msra.mxu1 %vm5245_vm15, %v4036_v34 }
 0x10f   : > { %v1988_v38 = vsel %vm1986_vm4, %v1983_v36, %v1985_v60 }
 0x110   : > { %3766 = vmatprep.subr.msk.mxu1 %vm5257_vm5, %v1988_v38 }
 0x111   : > { %v4484_v39 = vpop.permute.xlu0 %4483 }
 0x112   : > { %v4486_v40 = vunpack.i.h.bf16 %v4484_v39  ;;  %v4485_v41 = vunpack.i.l.bf16 %v4484_v39  ;;  %v4489_v42 = vpop.permute.xlu1 %4488 }
 0x113   : > { %v4491_v30 = vunpack.i.h.bf16 %v4489_v42  ;;  %v4490_v44 = vunpack.i.l.bf16 %v4489_v42  ;;  %v3769_v42 = vld [vmem:[%s6183_s4 + $0x30] sm:$0xff] }
 0x114   : > { %v2079_v45 = vsel %vm2077_vm2, %v4485_v41, %v4486_v40 }
 0x115   : > { %v2092_v46 = vsel %vm2090_vm13, %v4490_v44, %v4491_v30 }
 0x116   : > { %v1981_v61 = vpop.permute.xlu0 %1980  ;;  %v2072_v3 = vpop.permute.xlu1 %2071  ;;  %v4039_v48 = vpack.c.bf16 %v2092_v46, %v2079_v45 }
 0x117   : > { %v1987_v51 = vsel %vm1986_vm4, %v1981_v61, %v1983_v36  ;;  %v2078_v56 = vsel %vm2077_vm2, %v2072_v3, %v4485_v41  ;;  %vm2103_vm4 = vcmask 384000   ;;  %vm6346_vm2 = vnez %v6298_v17 }
 0x118   : > { %3767 = vmatpush1.msk.msra.mxu1 %vm5264_vm14, %v1987_v51 }
 0x119   : > { %4041 = vmatprep.subr.msk.bf16.mxu1 %vm5172_vm0, %v4039_v48  ;;  %3768 = vmatmul.mubr.msk.f32.vlgmr.msra.gmra.mrb[2].mxu1 %vm1329_vm8, %v3753_v50  ;;  %vm2116_vm0 = vcmask 375808  }
 0x11a   : > { %v2085_v53 = vpop.permute.xlu0 %2084  ;;  %v4494_v4 = vpop.permute.xlu1 %4493  ;;  %2231 = vmatprep.mubr.f32.mxu1 %v5404_v47 }
 0x11b   : > { %v2091_v57 = vsel %vm2090_vm13, %v2085_v53, %v4490_v44  ;;  %v4496_v62 = vunpack.i.h.bf16 %v4494_v4  ;;  %v4495_v6 = vunpack.i.l.bf16 %v4494_v4  ;;  %vm2129_vm13 = vcmask 367616  }
 0x11c   : > { %v4042_v58 = vpack.c.bf16 %v2091_v57, %v2078_v56 }
 0x11d   : > { %v2105_v18 = vsel %vm2103_vm4, %v4495_v6, %v4496_v62 }
 0x11e   : > { %v4499_v10 = vpop.permute.xlu0 %4498  ;;  %v2098_v13 = vpop.permute.xlu1 %2097  ;;  %4044 = vmatpush1.bf16.msk.msra.mxu1 %vm5187_vm11, %v4042_v58  ;;  %vm2142_vm11 = vcmask 359424  }
 0x11f   : > { %v4501_v63 = vunpack.i.h.bf16 %v4499_v10  ;;  %v4500_v15 = vunpack.i.l.bf16 %v4499_v10  ;;  %v2104_v23 = vsel %vm2103_vm4, %v2098_v13, %v4495_v6  ;;  %vm6347_vm4 = vcmask 646144  }
 0x121   : > { %v2118_v19 = vsel %vm2116_vm0, %v4500_v15, %v4501_v63 }
 0x122   : > { %v2111_v20 = vpop.permute.xlu0 %2110  ;;  %v4045_v33 = vpack.c.bf16 %v2118_v19, %v2105_v18  ;;  %v4504_v22 = vpop.permute.xlu1 %4503 }
 0x123   : > { %v2117_v24 = vsel %vm2116_vm0, %v2111_v20, %v4500_v15  ;;  %v4506_v32 = vunpack.i.h.bf16 %v4504_v22  ;;  %v4505_v5 = vunpack.i.l.bf16 %v4504_v22  ;;  %vm6348_vm0 = vnez %v6300_v7 }
 0x124   : > { %v4048_v25 = vpack.c.bf16 %v2117_v24, %v2104_v23  ;;  %4047 = vmatprep.subr.msk.bf16.mxu1 %vm5197_vm1, %v4045_v33  ;;  %vm2155_vm1 = vcmask 351232  }
 0x125   : > { %v2131_v0 = vsel %vm2129_vm13, %v4505_v5, %v4506_v32  ;;  %v3638_v32 = vld [vmem:[%s6181_s2 + $0x10] sm:$0xff] }
 0x126   : > { %v4509_v37 = vpop.permute.xlu0 %4508  ;;  %v2124_v31 = vpop.permute.xlu1 %2123  ;;  %4050 = vmatpush1.bf16.msk.msra.mxu1 %vm5219_vm3, %v4048_v25  ;;  %vm6340_vm3 = vcmask 785408  }
 0x127   : > { %v4511_v26 = vunpack.i.h.bf16 %v4509_v37  ;;  %v4510_v27 = vunpack.i.l.bf16 %v4509_v37  ;;  %v2130_v38 = vsel %vm2129_vm13, %v2124_v31, %v4505_v5  ;;  %vm6349_vm13 = vcmask 654336  }
 0x129   : > { %v2144_v29 = vsel %vm2142_vm11, %v4510_v27, %v4511_v26 }
 0x12a   : > { %v2137_v34 = vpop.permute.xlu0 %2136  ;;  %v4051_v36 = vpack.c.bf16 %v2144_v29, %v2131_v0  ;;  %v2152_v60 = vpop.permute.xlu1 %2151 }
 0x12b   : > { %v2143_v39 = vsel %vm2142_vm11, %v2137_v34, %v4510_v27  ;;  %vm6350_vm11 = vcmask 326656  }
 0x12c   : > { %v4054_v21 = vpack.c.bf16 %v2143_v39, %v2130_v38  ;;  %4053 = vmatprep.subr.msk.bf16.mxu1 %vm5229_vm7, %v4051_v36  ;;  %vm6341_vm7 = vcmask 777216  }
 0x12e   : > { %v2154_v40 = vpop.permute.xlu0 %2153  ;;  %v2150_v41 = vpop.permute.xlu1 %2149  ;;  %4056 = vmatpush1.bf16.msk.msra.mxu1 %vm5245_vm15, %v4054_v21  ;;  %vm6343_vm15 = vcmask 769024  }
 0x12f   : > { %v2157_v28 = vsel %vm2155_vm1, %v2152_v60, %v2154_v40  ;;  %v2156_v30 = vsel %vm2155_vm1, %v2150_v41, %v2152_v60  ;;  %vm6351_vm1 = vcmask 629760  }
 0x130   : > { %3782 = vmatprep.subr.msk.mxu1 %vm5257_vm5, %v2157_v28  ;;  %vm6344_vm5 = vnez %v6295_v12 }
 0x132   : > { %3783 = vmatpush1.msk.msra.mxu1 %vm5264_vm14, %v2156_v30  ;;  %v4515_v35 = vpop.permute.xlu1 %4514  ;;  %vm6345_vm14 = vcmask 752640  }
 0x133   : > { %3784 = vmatmul.mubr.msk.f32.vlgmr.msra.gmra.mrb[2].mxu1 %vm1329_vm8, %v3769_v42  ;;  %v4516_v44 = vunpack.i.l.bf16 %v4515_v35  ;;  %v4517_v45 = vunpack.i.h.bf16 %v4515_v35  ;;  %vm6342_vm8 = vcmask 760832  }
 0x134   : > { %3211 = vmatprep.mubr.f32.mxu1 %v5404_v47 }
 0x135   : > { %v721_v52 = vsel %vm6340_vm3, %v4516_v44, %v4517_v45  ;;  %vm6352_vm3 = vcmask 637952  }
 0x136   : > { %v4520_v43 = vpop.permute.xlu1 %4519 }
 0x137   : > { %v4521_v46 = vunpack.i.l.bf16 %v4520_v43  ;;  %v4522_v61 = vunpack.i.h.bf16 %v4520_v43 }
 0x139   : > { %v3895_v3 = vpack.c.bf16 %v4522_v61, %v4517_v45  ;;  %v731_v48 = vsel %vm6341_vm7, %v4521_v46, %v4522_v61  ;;  %vm6353_vm7 = vcmask 621568  }
 0x13a   : > { %v4530_v50 = vpop.permute.xlu1 %4529  ;;  %v3898_v51 = vpack.c.bf16 %v731_v48, %v721_v52  ;;  %v3650_v52 = vld [vmem:[%s6181_s2 + $0x18] sm:$0xff] }
 0x13b   : > { %3897 = vmatprep.subr.msk.bf16.mxu0 %vm5057_vm10, %v3895_v3  ;;  %v4532_v4 = vunpack.i.h.bf16 %v4530_v50  ;;  %v4531_v56 = vunpack.i.l.bf16 %v4530_v50 }
 0x13c   : > { %3900 = vmatpush1.bf16.msk.msra.mxu0 %vm5067_vm9, %v3898_v51 }
 0x13d   : > { %v751_v10 = vsel %vm6342_vm8, %v4531_v56, %v4532_v4  ;;  %vm6354_vm8 = vcmask 523264  }
 0x13e   : > { %v759_v55 = vpop.permute.xlu1 %758 }
 0x13f   : > { %v5515_v53 = vpop.permute.xlu0 %2243 }
 0x142   : > { %v4540_v57 = vpop.permute.xlu1 %4539 }
 0x143   : > { %v4525_v58 = vpop.permute.xlu0 %4524  ;;  %v4542_v20 = vunpack.i.h.bf16 %v4540_v57  ;;  %v4541_v33 = vunpack.i.l.bf16 %v4540_v57 }
 0x144   : > { %v4527_v62 = vunpack.i.h.bf16 %v4525_v58  ;;  %v4526_v6 = vunpack.i.l.bf16 %v4525_v58 }
 0x145   : > { %v859_v25 = vsel %vm6347_vm4, %v4541_v33, %v4542_v20 }
 0x146   : > { %v741_v13 = vsel %vm6343_vm15, %v4526_v6, %v4527_v62  ;;  %v3901_v63 = vpack.c.bf16 %v4532_v4, %v4527_v62  ;;  %v4550_v15 = vpop.permute.xlu1 %4549  ;;  %vm6355_vm15 = vmmov %vm6350_vm11 }
 0x147   : > { %v3904_v18 = vpack.c.bf16 %v751_v10, %v741_v13  ;;  %v757_v19 = vpop.permute.xlu0 %756  ;;  %v4552_v31 = vunpack.i.h.bf16 %v4550_v15  ;;  %v4551_v26 = vunpack.i.l.bf16 %v4550_v15 }
 0x148   : > { %3903 = vmatprep.subr.msk.bf16.mxu0 %vm5076_vm6, %v3901_v63  ;;  %v761_v22 = vsel %vm6345_vm14, %v757_v19, %v759_v55  ;;  %vm6356_vm14 = vcmask 506880  }
 0x149   : > { %3906 = vmatpush1.bf16.msk.msra.mxu0 %vm6344_vm5, %v3904_v18  ;;  %v879_v39 = vsel %vm6351_vm1, %v4551_v26, %v4552_v31  ;;  %vm6358_vm4 = vmmov %vm6356_vm14 }
 0x14a   : > { %v885_v23 = vpop.permute.xlu1 %884  ;;  %3647 = vmatprep.subr.msk.mxu0 %vm6346_vm2, %v759_v55 }
 0x14b   : > { %v4535_v24 = vpop.permute.xlu0 %4534 }
 0x14c   : > { %v4537_v5 = vunpack.i.h.bf16 %v4535_v24  ;;  %v4536_v37 = vunpack.i.l.bf16 %v4535_v24  ;;  %v3662_v24 = vld [vmem:[%s6181_s2 + $0x20] sm:$0xff] }
 0x14d   : > { %3648 = vmatpush1.msk.msra.mxu0 %vm6348_vm0, %v761_v22 }
 0x14e   : > { %v849_v27 = vsel %vm6349_vm13, %v4536_v37, %v4537_v5  ;;  %v3907_v0 = vpack.c.bf16 %v4542_v20, %v4537_v5  ;;  %v4560_v29 = vpop.permute.xlu1 %4559  ;;  %3649 = vmatmul.mubr.msk.f32.vlgmr.msra.gmra.mrb[0].mxu0 %vm6350_vm11, %v3638_v32 }
 0x14f   : > { %v3910_v34 = vpack.c.bf16 %v859_v25, %v849_v27  ;;  %v4545_v36 = vpop.permute.xlu0 %4544  ;;  %963 = vmatprep.mubr.f32.mxu0 %v5404_v47  ;;  %v4562_v42 = vunpack.i.h.bf16 %v4560_v29  ;;  %v4561_v43 = vunpack.i.l.bf16 %v4560_v29 }
 0x150   : > { %v4547_v60 = vunpack.i.h.bf16 %v4545_v36  ;;  %v4546_v38 = vunpack.i.l.bf16 %v4545_v36  ;;  %3909 = vmatprep.subr.msk.bf16.mxu0 %vm5057_vm10, %v3907_v0 }
 0x151   : > { %3912 = vmatpush1.bf16.msk.msra.mxu0 %vm5067_vm9, %v3910_v34  ;;  %v977_v50 = vsel %vm6354_vm8, %v4561_v43, %v4562_v42 }
 0x152   : > { %v869_v21 = vsel %vm6352_vm3, %v4546_v38, %v4547_v60  ;;  %v3913_v40 = vpack.c.bf16 %v4552_v31, %v4547_v60  ;;  %v4565_v30 = vpop.permute.xlu1 %4564  ;;  %v2981_v60 = vld [vmem:[%s6186_s7] sm:$0xff] }
 0x153   : > { %v3916_v41 = vpack.c.bf16 %v879_v39, %v869_v21  ;;  %v4555_v28 = vpop.permute.xlu0 %4554  ;;  %v4567_v4 = vunpack.i.h.bf16 %v4565_v30  ;;  %v4566_v56 = vunpack.i.l.bf16 %v4565_v30  ;;  %v4696_v30 = vld [vmem:[%s6180_s1] sm:$0x3] }
 0x154   : > { %v4557_v35 = vunpack.i.h.bf16 %v4555_v28  ;;  %v4556_v44 = vunpack.i.l.bf16 %v4555_v28  ;;  %3915 = vmatprep.subr.msk.bf16.mxu0 %vm5076_vm6, %v3913_v40 }
 0x155   : > { %3918 = vmatpush1.bf16.msk.msra.mxu0 %vm6344_vm5, %v3916_v41  ;;  %v1009_v6 = vsel %vm6356_vm14, %v4566_v56, %v4567_v4 }
 0x156   : > { %v996_v45 = vsel %vm994_vm12, %v4556_v44, %v4557_v35  ;;  %v1002_v48 = vpop.permute.xlu1 %1001  ;;  %v2263_v35 = vadd.s32 4294967294, %v4696_v30 }
 0x157   : > { %v887_v46 = vpop.permute.xlu0 %886  ;;  %v3919_v61 = vpack.c.bf16 %v996_v45, %v4562_v42  ;;  %v1008_v63 = vsel %vm6358_vm4, %v1002_v48, %v4566_v56  ;;  %vm2372_vm4 = vcmp.lt.s32.totalorder %v4970_v11, 12 }
 0x158   : > { %v889_v3 = vsel %vm6353_vm7, %v885_v23, %v887_v46  ;;  %3659 = vmatprep.subr.msk.mxu0 %vm6346_vm2, %v887_v46  ;;  %vm2265_vm1 = vcmp.lt.s32.totalorder %v2263_v35, 12  ;;  %vm2320_vm7 = vcmp.lt.s32.totalorder %v4696_v30, 12 }
 0x159   : > { %3660 = vmatpush1.msk.msra.mxu0 %vm6348_vm0, %v889_v3 }
 0x15a   : > { %3921 = vmatprep.subr.msk.bf16.mxu0 %vm5057_vm10, %v3919_v61  ;;  %3661 = vmatmul.mubr.msk.f32.vlgmr.msra.gmra.mrb[0].mxu0 %vm6355_vm15, %v3650_v52  ;;  %v1030_v62 = vpop.permute.xlu1 %1029  ;;  %vm6357_vm10 = vcmask 498688   ;;  %vm6373_vm15 = vcmp.ge.s32.totalorder %v4850_v2, 0 }
 0x15b   : > { %v989_v51 = vpop.permute.xlu0 %988  ;;  %1109 = vmatprep.mubr.f32.mxu0 %v5404_v47  ;;  %vm6359_vm13 = vmmov %vm6357_vm10 }
 0x15c   : > { %v995_v55 = vsel %vm994_vm12, %v989_v51, %v4556_v44  ;;  %vm2321_vm14 = vmand %vm6373_vm15, %vm2320_vm7 }
 0x15d   : > { %v3922_v57 = vpack.c.bf16 %v995_v55, %v977_v50  ;;  %v2322_v2 = vsel %vm2321_vm14, 1, %v4706_v1 }
 0x15e   : > { %v1028_v33 = vpop.permute.xlu1 %1027 }
 0x15f   : > { %v4570_v58 = vpop.permute.xlu0 %4569  ;;  %3924 = vmatpush1.bf16.msk.msra.mxu0 %vm5067_vm9, %v3922_v57  ;;  %vm6360_vm9 = vcmask 490496  }
 0x160   : > { %v4572_v10 = vunpack.i.h.bf16 %v4570_v58  ;;  %v4571_v49 = vunpack.i.l.bf16 %v4570_v58  ;;  %vm6361_vm12 = vmmov %vm6360_vm9 }
 0x161   : > { %v1034_v23 = vsel %vm6361_vm12, %v1028_v33, %v1030_v62 }
 0x162   : > { %v1022_v13 = vsel %vm6357_vm10, %v4571_v49, %v4572_v10  ;;  %v2413_v21 = vpop.permute.xlu1 %2412  ;;  %vm6374_vm10 = vnez %v6269_v9 }
 0x163   : > { %v3925_v15 = vpack.c.bf16 %v1022_v13, %v1009_v6  ;;  %v1015_v18 = vpop.permute.xlu0 %1014  ;;  %v2348_v3 = vsel %vm6374_vm10, 1, %v4706_v1  ;;  %v2330_v13 = vrot.slane %v2322_v2, %v4986_v14 }
 0x164   : > { %v1021_v19 = vsel %vm6359_vm13, %v1015_v18, %v4571_v49  ;;  %v2352_v56 = vrot.slane %v2348_v3, %v4995_v16  ;;  %v2356_v9 = vrot.slane %v2348_v3, %v4986_v14  ;;  %vm2405_vm13 = vcmask 146432  }
 0x165   : > { %v3928_v20 = vpack.c.bf16 %v1021_v19, %v1008_v63  ;;  %3927 = vmatprep.subr.msk.bf16.mxu0 %vm5076_vm6, %v3925_v15  ;;  %vm6362_vm6 = vmmov %vm6350_vm11  ;;  %vm2264_vm11 = vcmp.ge.s32.totalorder %v2263_v35, 0  ;;  %v2326_v63 = vrot.slane %v2322_v2, %v4995_v16  ;;  %vm5741_vm14 = vcmp.eq.s32.totalorder %v2330_v13, 1 }
 0x166   : > { %v5654_v41 = vpop.permute.xlu1 %2436  ;;  %vm2266_vm3 = vmand %vm2264_vm11, %vm2265_vm1  ;;  %vm5712_vm11 = vcmp.eq.s32.totalorder %v2352_v56, 1  ;;  %vm5716_vm1 = vcmp.eq.s32.totalorder %v2356_v9, 1 }
 0x167   : > { %3930 = vmatpush1.bf16.msk.msra.mxu0 %vm6344_vm5, %v3928_v20  ;;  %v1032_v54 = vpop.permute.xlu0 %1031  ;;  %v2267_v61 = vsel %vm2266_vm3, 1, %v4706_v1  ;;  %vm6388_vm3 = vcmask 138240   ;;  %vm5745_vm10 = vcmp.eq.s32.totalorder %v2326_v63, 1 }
 0x168   : > { %v1035_v22 = vsel %vm6360_vm9, %v1030_v62, %v1032_v54  ;;  %v2275_v48 = vrot.slane %v2267_v61, %v4986_v14  ;;  %v2271_v4 = vrot.slane %v2267_v61, %v4995_v16  ;;  %vm6389_vm7 = vmmov %vm6388_vm3 }
 0x169   : > { %3671 = vmatprep.subr.msk.mxu0 %vm6346_vm2, %v1035_v22 }
 0x16a   : > { %v5658_v42 = vpop.permute.xlu1 %2307  ;;  %vm5692_vm9 = vcmp.eq.s32.totalorder %v2275_v48, 1 }
 0x16b   : > { %3672 = vmatpush1.msk.msra.mxu0 %vm6348_vm0, %v1034_v23  ;;  %vm6363_vm0 = vmmov %vm6354_vm8  ;;  %v2400_v38 = vpop.permute.xlu0 %2399  ;;  %vm6372_vm8 = vnez %v6267_v8 }
 0x16c   : > { %3673 = vmatmul.mubr.msk.f32.vlgmr.msra.gmra.mrb[0].mxu0 %vm6362_vm6, %v3662_v24  ;;  %v2296_v52 = vsel %vm6372_vm8, 1, %v4706_v1  ;;  %vm6379_vm6 = vcmp.ge.s32.totalorder %v4970_v11, 0  ;;  %v6384_v11 = vmov 0 }
 0x16d   : > { %2529 = vmatprep.mubr.f32.mxu0 %v5404_v47  ;;  %v2304_v50 = vrot.slane %v2296_v52, %v4986_v14  ;;  %v2300_v8 = vrot.slane %v2296_v52, %v4995_v16  ;;  %v6385_v11 = vsel %vm5712_vm11, 4294967295, %v6384_v11 }
 0x16e   : > { %v5665_v45 = vpop.permute.xlu1 %2333 }
 0x16f   : > { %v5650_v39 = vpop.permute.xlu0 %2424  ;;  %vm5696_vm12 = vcmp.eq.s32.totalorder %v2304_v50, 1 }
 0x170   : > { %vm5729_vm8 = vmpackc.low %vm5696_vm12, %vm5692_vm9 }
 0x172   : > { %v5669_v46 = vpop.permute.xlu1 %2385 }
 0x173   : > { %v5652_v40 = vpop.permute.xlu0 %2281 }
 0x176   : > { %v711_v59 = vpop.f32.mrb[0].mxu1 }
 0x177   : > { %v713_v12 = vpop.f32.mrb[1].mxu1  ;;  %v5656_v28 = vpop.permute.xlu0 %2448 }
 0x17b   : > { %v5663_v44 = vpop.permute.xlu0 %2359 }
 0x17f   : > { %v5667_v43 = vpop.permute.xlu0 %2610 }
 0x206   : > { %v2233_v17 = vpop.f32.mrb[2].mxu1 }
 0x207   : > { %v2246_v7 = vadd.f32 %v5515_v53, %v2233_v17  ;;  %v2235_v25 = vpop.f32.mrb[3].mxu1 }
 0x208   : > { %v2247_v32 = vadd.f32 %v5515_v53, %v2235_v25 }
 0x209   : > { %vm2248_vm5 = vcmp.gt.f32.partialorder %v2246_v7, 0.0  ;;  %v2250_v5 = vmul.f32 0.01, %v2246_v7 }
 0x20a   : > { %vm2249_vm2 = vcmp.gt.f32.partialorder %v2247_v32, 0.0  ;;  %v2251_v37 = vmul.f32 0.01, %v2247_v32 }
 0x20b   : > { %v5592_v31 = vsel %vm2248_vm5, %v2246_v7, %v2250_v5  ;;  %vm2373_vm5 = vmand %vm6379_vm6, %vm2372_vm4  ;;  %vm2313_vm4 = vcmask 269312   ;;  %vm6400_vm6 = vcmask 130048  }
 0x20c   : > { %v2253_v26 = vsel %vm2249_vm2, %v2247_v32, %v2251_v37  ;;  %2387 = vrot.lane.b32.xlu1 %v5592_v31, %s4761_s16  ;;  %2450 = vrot.lane.b32.xlu0 %v5592_v31, %s6339_s20  ;;  %vm5702_vm2 = vcmp.eq.s32.totalorder %v2271_v4, 1  ;;  %v2374_v54 = vsel %vm2373_vm5, 1, %v4706_v1  ;;  %vm6401_vm5 = vmmov %vm6400_vm6 }
 0x20d   : > { %2259 = vst.msk [vmem:[#allocation2 + $0x10] sm:$0xff] %vm6363_vm0, %v2253_v26  ;;  %vm5706_vm0 = vcmp.eq.s32.totalorder %v2300_v8, 1  ;;  %v2378_v48 = vrot.slane %v2374_v54, %v4995_v16 }
 0x20e   : > { %vm5737_vm15 = vmpackc.low %vm5706_vm0, %vm5702_vm2 }
 0x20f   : > { %vm5764_vm2 = vmpackc.low %vm5716_vm1, %vm5741_vm14 }
 0x214   : > { %v5598_v27 = vld [vmem:[#allocation2 + $0x10] sm:$0xff] }
 0x215   : > { %2997 = vst [vmem:[#allocation2 + $0x10] sm:$0xff] %v5404_v47  ;;  %v4573_v53 = vpack.i.bf16 %v5598_v27, %v5592_v31 }
 0x217   : > { %4574 = vrot.lane.b32.xlu1 %v4573_v53, %s4755_s21  ;;  %4579 = vrot.lane.b32.xlu0 %v4573_v53, %s6336_s22  ;;  %s6364_s21 = smov 1  }
 0x21b   : > { %4589 = vrot.lane.b32.xlu1 %v4573_v53, %s6337_s19  ;;  %4584 = vrot.lane.b32.xlu0 %v4573_v53, %s6338_s15 }
 0x21f   : > { %4599 = vrot.lane.b32.xlu1 %v4573_v53, %s4757_s24  ;;  %4594 = vrot.lane.b32.xlu0 %v4573_v53, %s4756_s26  ;;  %s4762_s26 = smov 114   ;;  %s6369_s24 = smov 111  }
 0x223   : > { %2452 = vrot.lane.b32.xlu1 %v5598_v27, %s6339_s20  ;;  %4609 = vrot.lane.b32.xlu0 %v4573_v53, %s4758_s13  ;;  %s6367_s20 = smov 113   ;;  %s6370_s13 = smov 110  }
 0x227   : > { %4604 = vrot.lane.b32.xlu1 %v4573_v53, %s4759_s28  ;;  %2389 = vrot.lane.b32.xlu0 %v5598_v27, %s4761_s16  ;;  %s4763_s28 = smov 98  }
 0x22b   : > { %4614 = vrot.lane.b32.xlu1 %v4573_v53, %s4760_s30  ;;  %4619 = vrot.lane.b32.xlu0 %v4573_v53, %s6364_s21  ;;  %s6371_s30 = smov 97  }
 0x22f   : > { %2623 = vrot.lane.b32.xlu1 %v5404_v47, %s6364_s21  ;;  %4624 = vrot.lane.b32.xlu0 %v4573_v53, %s6365_s23 }
 0x233   : > { %2646 = vrot.lane.b32.xlu1 %v5592_v31, %s6366_s29  ;;  %2648 = vrot.lane.b32.xlu0 %v5598_v27, %s6366_s29 }
 0x237   : > { %4629 = vrot.lane.b32.xlu1 %v4573_v53, %s4762_s26  ;;  %4634 = vrot.lane.b32.xlu0 %v4573_v53, %s6367_s20 }
 0x23b   : > { %4639 = vrot.lane.b32.xlu1 %v4573_v53, %s6368_s12  ;;  %4644 = vrot.lane.b32.xlu0 %v4573_v53, %s6369_s24 }
 0x23f   : > { %v1111_v0 = vpop.f32.mrb[0].mxu0  ;;  %2770 = vrot.lane.b32.xlu1 %v5592_v31, %s6370_s13  ;;  %2772 = vrot.lane.b32.xlu0 %v5598_v27, %s6370_s13 }
 0x240   : > { %v5630_v29 = vadd.f32 %v1111_v0, %v711_v59  ;;  %v1113_v34 = vpop.f32.mrb[1].mxu0 }
 0x241   : > { %v5632_v36 = vadd.f32 %v1113_v34, %v713_v12  ;;  %v3832_v12 = vld [vmem:[%s6185_s6 + $0x20] sm:$0xff] }
 0x243   : > { %4649 = vrot.lane.b32.xlu1 %v4573_v53, %s4763_s28  ;;  %4654 = vrot.lane.b32.xlu0 %v4573_v53, %s6371_s30 }
 0x247   : > { %4659 = vrot.lane.b32.xlu1 %v4573_v53, %s4728_s14  ;;  %4664 = vrot.lane.b32.xlu0 %v4573_v53, %s4729_s25 }
 0x24b   : > { %2894 = vrot.lane.b32.xlu1 %v5592_v31, %s4730_s27  ;;  %2896 = vrot.lane.b32.xlu0 %v5598_v27, %s4730_s27 }
 0x24f   : > { %2984 = vperm.xlu1 %4668, %v2981_v60   ;;  %3007 = vrot.lane.b32.xlu0 %v5404_v47, %s6336_s22  ;;  %v2382_v60 = vrot.slane %v2374_v54, %v4986_v14 }
 0x253   : > { %3031 = vrot.lane.b32.xlu0 %v5404_v47, %s6337_s19  ;;  %3019 = vrot.lane.b32.xlu1 %v5404_v47, %s6338_s15 }
 0x27e   : > { %v5682_v51 = vpop.permute.xlu1 %2387  ;;  %v5684_v55 = vpop.permute.xlu0 %2450 }
 0x289   : > { %v4575_v62 = vpop.permute.xlu1 %4574  ;;  %v4580_v6 = vpop.permute.xlu0 %4579 }
 0x28a   : > { %v4577_v15 = vunpack.i.h.bf16 %v4575_v62  ;;  %v4576_v18 = vunpack.i.l.bf16 %v4575_v62  ;;  %v4582_v19 = vunpack.i.h.bf16 %v4580_v6  ;;  %v4581_v20 = vunpack.i.l.bf16 %v4580_v6 }
 0x28c   : > { %v2406_v22 = vsel %vm2405_vm13, %v2400_v38, %v4576_v18  ;;  %v2407_v23 = vsel %vm2405_vm13, %v4576_v18, %v4577_v15  ;;  %v2418_v24 = vsel %vm6388_vm3, %v2413_v21, %v4581_v20  ;;  %v2419_v59 = vsel %vm6389_vm7, %v4581_v20, %v4582_v19  ;;  %vm5772_vm7 = vmpackc.low %vm5712_vm11, %vm5745_vm10  ;;  %v3785_v15 = vld [vmem:[%s6185_s6 + $0x8] sm:$0xff] }
 0x28d   : > { %v4057_v17 = vpack.c.bf16 %v2419_v59, %v2407_v23  ;;  %v4060_v7 = vpack.c.bf16 %v2418_v24, %v2406_v22  ;;  %v4590_v25 = vpop.permute.xlu1 %4589  ;;  %v4585_v1 = vpop.permute.xlu0 %4584  ;;  %vm6398_vm13 = vcmask 121856   ;;  %vm2287_vm3 = vcmask 277504  }
 0x28e   : > { %v4592_v26 = vunpack.i.h.bf16 %v4590_v25  ;;  %v4591_v53 = vunpack.i.l.bf16 %v4590_v25  ;;  %v4587_v0 = vunpack.i.h.bf16 %v4585_v1  ;;  %v4586_v34 = vunpack.i.l.bf16 %v4585_v1  ;;  %vm6399_vm9 = vmmov %vm6398_vm13 }
 0x28f   : > { %4059 = vmatprep.subr.msk.bf16.mxu0 %vm5729_vm8, %v4057_v17  ;;  %vm6413_vm11 = vcmask 7168  }
 0x290   : > { %v2442_v38 = vsel %vm6398_vm13, %v5654_v41, %v4591_v53  ;;  %v2443_v21 = vsel %vm6399_vm9, %v4591_v53, %v4592_v26  ;;  %v2430_v30 = vsel %vm6400_vm6, %v5650_v39, %v4586_v34  ;;  %v2431_v35 = vsel %vm6401_vm5, %v4586_v34, %v4587_v0  ;;  %4062 = vmatpush1.bf16.msk.msra.mxu0 %vm5737_vm15, %v4060_v7 }
 0x291   : > { %v4063_v14 = vpack.c.bf16 %v2443_v21, %v2431_v35  ;;  %v4066_v41 = vpack.c.bf16 %v2442_v38, %v2430_v30  ;;  %v4600_v52 = vpop.permute.xlu1 %4599  ;;  %v4595_v3 = vpop.permute.xlu0 %4594  ;;  %vm5782_vm13 = vcmp.eq.s32.totalorder %v2382_v60, 1  ;;  %vm5789_vm9 = vcmp.eq.s32.totalorder %v2378_v48, 1 }
 0x292   : > { %v4602_v50 = vunpack.i.h.bf16 %v4600_v52  ;;  %v4601_v4 = vunpack.i.l.bf16 %v4600_v52  ;;  %v4597_v8 = vunpack.i.h.bf16 %v4595_v3  ;;  %v4596_v2 = vunpack.i.l.bf16 %v4595_v3  ;;  %v2398_v3 = vld [vmem:[%s6185_s6] sm:$0xff] }
 0x293   : > { %4065 = vmatprep.subr.msk.bf16.mxu0 %vm5764_vm2, %v4063_v14  ;;  %vm6410_vm6 = vcmask 113664  }
 0x294   : > { %v2315_v56 = vsel %vm2313_vm4, %v4601_v4, %v4602_v50  ;;  %v2289_v9 = vsel %vm2287_vm3, %v4596_v2, %v4597_v8  ;;  %4068 = vmatpush1.bf16.msk.msra.mxu0 %vm5772_vm7, %v4066_v41  ;;  %v2314_v16 = vsel %vm2313_vm4, %v5658_v42, %v4601_v4  ;;  %v2288_v62 = vsel %vm2287_vm3, %v5652_v40, %v4596_v2  ;;  %vm6411_vm5 = vmmov %vm6410_vm6 }
 0x295   : > { %v2453_v6 = vpop.permute.xlu1 %2452  ;;  %v4610_v10 = vpop.permute.xlu0 %4609  ;;  %v2454_v18 = vsel %vm6411_vm5, %v5656_v28, %v5684_v55  ;;  %v4069_v42 = vpack.c.bf16 %v2315_v56, %v2289_v9  ;;  %v4072_v40 = vpack.c.bf16 %v2314_v16, %v2288_v62  ;;  %vm2365_vm4 = vcmask 252928  }
 0x296   : > { %v2455_v63 = vsel %vm6410_vm6, %v5684_v55, %v2453_v6  ;;  %v4612_v19 = vunpack.i.h.bf16 %v4610_v10  ;;  %v4611_v20 = vunpack.i.l.bf16 %v4610_v10  ;;  %vm2339_vm3 = vcmask 261120  }
 0x297   : > { %3794 = vmatprep.subr.msk.mxu0 %vm5782_vm13, %v2455_v63  ;;  %vm6412_vm6 = vcmask 326656   ;;  %vm2616_vm5 = vcmask 15360  }
 0x298   : > { %3795 = vmatpush1.msk.msra.mxu0 %vm5789_vm9, %v2454_v18  ;;  %v2366_v23 = vsel %vm2365_vm4, %v5663_v44, %v4611_v20  ;;  %v2367_v24 = vsel %vm2365_vm4, %v4611_v20, %v4612_v19  ;;  %vm6414_vm4 = vmmov %vm6413_vm11 }
 0x299   : > { %v4605_v54 = vpop.permute.xlu1 %4604  ;;  %v2390_v22 = vpop.permute.xlu0 %2389  ;;  %4071 = vmatprep.subr.msk.bf16.mxu0 %vm5729_vm8, %v4069_v42  ;;  %3796 = vmatmul.mubr.msk.f32.vlgmr.msra.gmra.mrb[2].mxu0 %vm6412_vm6, %v3785_v15  ;;  %vm2391_vm6 = vcmask 244736  }
 0x29a   : > { %v4607_v28 = vunpack.i.h.bf16 %v4605_v54  ;;  %v4606_v55 = vunpack.i.l.bf16 %v4605_v54  ;;  %4074 = vmatpush1.bf16.msk.msra.mxu0 %vm5737_vm15, %v4072_v40  ;;  %2603 = vmatprep.mubr.f32.mxu0 %v5404_v47  ;;  %v2393_v38 = vsel %vm2391_vm6, %v5682_v51, %v2390_v22  ;;  %v2392_v48 = vsel %vm2391_vm6, %v5669_v46, %v5682_v51 }
 0x29b   : > { %vm6417_vm6 = vcmask 924672  }
 0x29c   : > { %v2340_v59 = vsel %vm2339_vm3, %v5665_v45, %v4606_v55  ;;  %v2341_v17 = vsel %vm2339_vm3, %v4606_v55, %v4607_v28  ;;  %vm6416_vm3 = vcmask 326656  }
 0x29d   : > { %v4075_v7 = vpack.c.bf16 %v2367_v24, %v2341_v17  ;;  %v4078_v25 = vpack.c.bf16 %v2366_v23, %v2340_v59  ;;  %v4615_v1 = vpop.permute.xlu1 %4614  ;;  %v4620_v26 = vpop.permute.xlu0 %4619 }
 0x29e   : > { %v4617_v53 = vunpack.i.h.bf16 %v4615_v1  ;;  %v4616_v0 = vunpack.i.l.bf16 %v4615_v1  ;;  %v4622_v34 = vunpack.i.h.bf16 %v4620_v26  ;;  %v4621_v60 = vunpack.i.l.bf16 %v4620_v26 }
 0x29f   : > { %4077 = vmatprep.subr.msk.bf16.mxu0 %vm5764_vm2, %v4075_v7 }
 0x2a0   : > { %v2630_v44 = vsel %vm6413_vm11, %v4621_v60, %v4622_v34  ;;  %4080 = vmatpush1.bf16.msk.msra.mxu0 %vm5772_vm7, %v4078_v25  ;;  %v2618_v45 = vsel %vm2616_vm5, %v4616_v0, %v4617_v53  ;;  %v2617_v35 = vsel %vm2616_vm5, %v5667_v43, %v4616_v0  ;;  %vm6415_vm11 = vcmask 1039360  }
 0x2a1   : > { %v2624_v21 = vpop.permute.xlu1 %2623  ;;  %v4625_v30 = vpop.permute.xlu0 %4624  ;;  %3805 = vmatprep.subr.msk.mxu0 %vm5782_vm13, %v2393_v38  ;;  %v4081_v4 = vpack.c.bf16 %v2630_v44, %v2618_v45  ;;  %vm2737_vm5 = vcmask 932864  }
 0x2a2   : > { %v2629_v14 = vsel %vm6414_vm4, %v2624_v21, %v4621_v60  ;;  %v4627_v41 = vunpack.i.h.bf16 %v4625_v30  ;;  %v4626_v52 = vunpack.i.l.bf16 %v4625_v30  ;;  %vm6418_vm4 = vcmask 1031168   ;;  %v3820_v60 = vld [vmem:[%s6185_s6 + $0x18] sm:$0xff] }
 0x2a3   : > { %v4084_v50 = vpack.c.bf16 %v2629_v14, %v2617_v35 }
 0x2a4   : > { %v4087_v8 = vpack.c.bf16 %v4627_v41, %v5598_v27  ;;  %3806 = vmatpush1.msk.msra.mxu0 %vm5789_vm9, %v2392_v48  ;;  %v2641_v43 = vsel %vm6415_vm11, %v4626_v52, %v4627_v41  ;;  %vm6419_vm11 = vmmov %vm6416_vm3 }
 0x2a5   : > { %v2647_v2 = vpop.permute.xlu1 %2646  ;;  %v2649_v56 = vpop.permute.xlu0 %2648  ;;  %4083 = vmatprep.subr.msk.bf16.mxu0 %vm5729_vm8, %v4081_v4  ;;  %3807 = vmatmul.mubr.msk.f32.vlgmr.msra.gmra.mrb[2].mxu0 %vm6416_vm3, %v2398_v3  ;;  %v4090_v27 = vpack.c.bf16 %v2641_v43, %v5592_v31  ;;  %v3808_v31 = vld [vmem:[%s6185_s6 + $0x10] sm:$0xff]  ;;  %vm6420_vm3 = vcmask 916480  }
 0x2a6   : > { %4086 = vmatpush1.bf16.msk.msra.mxu0 %vm5737_vm15, %v4084_v50  ;;  %2724 = vmatprep.mubr.f32.mxu0 %v5404_v47  ;;  %v2650_v18 = vsel %vm6418_vm4, %v2647_v2, %v2649_v56  ;;  %vm6422_vm4 = vcmask 900096  }
 0x2a7   : > { %4089 = vmatprep.subr.msk.bf16.mxu0 %vm5764_vm2, %v4087_v8 }
 0x2a9   : > { %v4630_v46 = vpop.permute.xlu1 %4629  ;;  %v4635_v51 = vpop.permute.xlu0 %4634 }
 0x2aa   : > { %v4632_v9 = vunpack.i.h.bf16 %v4630_v46  ;;  %v4631_v16 = vunpack.i.l.bf16 %v4630_v46  ;;  %v4637_v62 = vunpack.i.h.bf16 %v4635_v51  ;;  %v4636_v6 = vunpack.i.l.bf16 %v4635_v51  ;;  %4092 = vmatpush1.bf16.msk.msra.mxu0 %vm5772_vm7, %v4090_v27 }
 0x2ab   : > { %3817 = vmatprep.subr.msk.mxu0 %vm5782_vm13, %v2649_v56 }
 0x2ac   : > { %v2738_v10 = vsel %vm2737_vm5, %v4631_v16, %v4632_v9  ;;  %v4093_v63 = vpack.c.bf16 %v4637_v62, %v4632_v9  ;;  %v2747_v15 = vsel %vm6417_vm6, %v4636_v6, %v4637_v62  ;;  %vm6421_vm5 = vcmask 908288  }
 0x2ad   : > { %v4096_v42 = vpack.c.bf16 %v2747_v15, %v2738_v10  ;;  %v4640_v40 = vpop.permute.xlu1 %4639  ;;  %v4645_v19 = vpop.permute.xlu0 %4644  ;;  %vm2861_vm6 = vcmask 801792   ;;  %v4764_v6 = vmov -1e+09   ;;  %v1118_v15 = vld [vmem:[%s6182_s3] sm:$0xff] }
 0x2ae   : > { %v4642_v20 = vunpack.i.h.bf16 %v4640_v40  ;;  %v4641_v54 = vunpack.i.l.bf16 %v4640_v40  ;;  %v4647_v22 = vunpack.i.h.bf16 %v4645_v19  ;;  %v4646_v28 = vunpack.i.l.bf16 %v4645_v19  ;;  %3818 = vmatpush1.msk.msra.mxu0 %vm5789_vm9, %v2650_v18 }
 0x2af   : > { %4095 = vmatprep.subr.msk.bf16.mxu0 %vm5729_vm8, %v4093_v63  ;;  %3819 = vmatmul.mubr.msk.f32.vlgmr.msra.gmra.mrb[2].mxu0 %vm6419_vm11, %v3808_v31  ;;  %vm6423_vm11 = vcmask 793600   ;;  %v3323_v63 = vld [vmem:[%s6188_s9] sm:$0xff] }
 0x2b0   : > { %v2756_v55 = vsel %vm6420_vm3, %v4641_v54, %v4642_v20  ;;  %v4099_v23 = vpack.c.bf16 %v4647_v22, %v4642_v20  ;;  %v2765_v24 = vsel %vm6421_vm5, %v4646_v28, %v4647_v22  ;;  %4098 = vmatpush1.bf16.msk.msra.mxu0 %vm5737_vm15, %v4096_v42  ;;  %2848 = vmatprep.mubr.f32.mxu0 %v5404_v47  ;;  %vm6424_vm3 = vcmask 326656  }
 0x2b1   : > { %v4102_v59 = vpack.c.bf16 %v2765_v24, %v2756_v55  ;;  %v2771_v17 = vpop.permute.xlu1 %2770  ;;  %v2773_v7 = vpop.permute.xlu0 %2772  ;;  %vm6425_vm5 = vcmask 785408  }
 0x2b2   : > { %4101 = vmatprep.subr.msk.bf16.mxu0 %vm5764_vm2, %v4099_v23  ;;  %v2774_v38 = vsel %vm6422_vm4, %v2771_v17, %v2773_v7 }
 0x2b4   : > { %4104 = vmatpush1.bf16.msk.msra.mxu0 %vm5772_vm7, %v4102_v59 }
 0x2b5   : > { %v4650_v25 = vpop.permute.xlu1 %4649  ;;  %v4655_v1 = vpop.permute.xlu0 %4654  ;;  %3829 = vmatprep.subr.msk.mxu0 %vm5782_vm13, %v2773_v7 }
 0x2b6   : > { %v4652_v26 = vunpack.i.h.bf16 %v4650_v25  ;;  %v4651_v53 = vunpack.i.l.bf16 %v4650_v25  ;;  %v4657_v0 = vunpack.i.h.bf16 %v4655_v1  ;;  %v4656_v34 = vunpack.i.l.bf16 %v4655_v1 }
 0x2b8   : > { %v2862_v44 = vsel %vm2861_vm6, %v4651_v53, %v4652_v26  ;;  %v4105_v45 = vpack.c.bf16 %v4657_v0, %v4652_v26  ;;  %v2871_v21 = vsel %vm6423_vm11, %v4656_v34, %v4657_v0  ;;  %3830 = vmatpush1.msk.msra.mxu0 %vm5789_vm9, %v2774_v38  ;;  %vm6426_vm6 = vcmask 777216  }
 0x2b9   : > { %v4108_v30 = vpack.c.bf16 %v2871_v21, %v2862_v44  ;;  %v4660_v35 = vpop.permute.xlu1 %4659  ;;  %v4665_v14 = vpop.permute.xlu0 %4664  ;;  %3831 = vmatmul.mubr.msk.f32.vlgmr.msra.gmra.mrb[2].mxu0 %vm6424_vm3, %v3820_v60  ;;  %vm6432_vm11 = vcmask 138240   ;;  %v3043_v21 = vld [vmem:[%s6187_s8] sm:$0xff] }
 0x2ba   : > { %v4662_v41 = vunpack.i.h.bf16 %v4660_v35  ;;  %v4661_v52 = vunpack.i.l.bf16 %v4660_v35  ;;  %v4667_v3 = vunpack.i.h.bf16 %v4665_v14  ;;  %v4666_v48 = vunpack.i.l.bf16 %v4665_v14  ;;  %4107 = vmatprep.subr.msk.bf16.mxu0 %vm5729_vm8, %v4105_v45  ;;  %2972 = vmatprep.mubr.f32.mxu0 %v5404_v47 }
 0x2bb   : > { %4110 = vmatpush1.bf16.msk.msra.mxu0 %vm5737_vm15, %v4108_v30  ;;  %vm6427_vm8 = vcmask 769024   ;;  %vm6428_vm15 = vmmov %vm6424_vm3 }
 0x2bc   : > { %v2880_v50 = vsel %vm6425_vm5, %v4661_v52, %v4662_v41  ;;  %v4111_v4 = vpack.c.bf16 %v4667_v3, %v4662_v41  ;;  %v2889_v8 = vsel %vm6426_vm6, %v4666_v48, %v4667_v3  ;;  %vm6433_vm3 = vmmov %vm6432_vm11 }
 0x2bd   : > { %v4114_v43 = vpack.c.bf16 %v2889_v8, %v2880_v50  ;;  %v2895_v2 = vpop.permute.xlu1 %2894  ;;  %v2897_v56 = vpop.permute.xlu0 %2896  ;;  %vm5939_vm5 = vmpackc.low %vm5741_vm14, %vm5696_vm12 }
 0x2be   : > { %4113 = vmatprep.subr.msk.bf16.mxu0 %vm5764_vm2, %v4111_v4  ;;  %v2898_v32 = vsel %vm6427_vm8, %v2895_v2, %v2897_v56  ;;  %vm5947_vm6 = vmpackc.low %vm5745_vm10, %vm5706_vm0  ;;  %vm6438_vm8 = vcmask 121856  }
 0x2bf   : > { %4116 = vmatpush1.bf16.msk.msra.mxu0 %vm5772_vm7, %v4114_v43 }
 0x2c0   : > { %3841 = vmatprep.subr.msk.mxu0 %vm5782_vm13, %v2897_v56  ;;  %vm6429_vm13 = vcmask 523264  }
 0x2c1   : > { %v3008_v31 = vpop.permute.xlu0 %3007 }
 0x2c3   : > { %3842 = vmatpush1.msk.msra.mxu0 %vm5789_vm9, %v2898_v32  ;;  %vm6430_vm9 = vcmask 130048  }
 0x2c4   : > { %3843 = vmatmul.mubr.msk.f32.vlgmr.msra.gmra.mrb[2].mxu0 %vm6428_vm15, %v3832_v12  ;;  %vm6431_vm4 = vmmov %vm6430_vm9  ;;  %vm3069_vm15 = vcmask 195584  }
 0x2c5   : > { %3137 = vmatprep.mubr.f32.mxu0 %v5404_v47  ;;  %v3032_v18 = vpop.permute.xlu0 %3031 }
 0x2ce   : > { %v2985_v61 = vpop.permute.xlu1 %2984 }
 0x2d2   : > { %v3020_v42 = vpop.permute.xlu1 %3019 }
 0x397   : > { %v2974_v27 = vpop.f32.mrb[2].mxu0 }
 0x398   : > { %v2987_v39 = vadd.f32 %v2985_v61, %v2974_v27  ;;  %v2976_v46 = vpop.f32.mrb[3].mxu0 }
 0x399   : > { %v2988_v51 = vadd.f32 %v2985_v61, %v2976_v46 }
 0x39a   : > { %vm2989_vm2 = vcmp.gt.f32.partialorder %v2987_v39, 0.0  ;;  %v2991_v57 = vmul.f32 0.01, %v2987_v39 }
 0x39b   : > { %vm2990_vm7 = vcmp.gt.f32.partialorder %v2988_v51, 0.0  ;;  %v2992_v9 = vmul.f32 0.01, %v2988_v51 }
 0x39c   : > { %v5895_v16 = vsel %vm2989_vm2, %v2987_v39, %v2991_v57  ;;  %vm6439_vm2 = vmmov %vm6438_vm8 }
 0x39d   : > { %v2994_v62 = vsel %vm2990_vm7, %v2988_v51, %v2992_v9  ;;  %3033 = vrot.lane.b32.xlu0 %v5895_v16, %s6337_s19  ;;  %vm6440_vm7 = vcmask 7168   ;;  %v3859_v51 = vld [vmem:[%s6187_s8 + $0x10] sm:$0xff]  ;;  %v3455_v9 = vld [vmem:[%s6189_s10] sm:$0xff] }
 0x39e   : > { %3000 = vst.msk [vmem:[#allocation2 + $0x10] sm:$0xff] %vm6429_vm13, %v2994_v62  ;;  %vm6441_vm13 = vmmov %vm6440_vm7  ;;  %v3457_v62 = vld [vmem:[%s6189_s10 + $0x10] sm:$0xff] }
 0x3a5   : > { %v5900_v13 = vld [vmem:[#allocation2 + $0x10] sm:$0xff] }
 0x3a6   : > { %3341 = vst [vmem:[#allocation2 + $0x10] sm:$0xff] %v4764_v6  ;;  %v4674_v10 = vpack.i.bf16 %v5900_v13, %v5895_v16 }
 0x3a8   : > { %4675 = vrot.lane.b32.xlu1 %v4674_v10, %s6338_s15  ;;  %4670 = vrot.lane.b32.xlu0 %v4674_v10, %s6336_s22 }
 0x3ac   : > { %3035 = vrot.lane.b32.xlu1 %v5900_v13, %s6337_s19  ;;  %3044 = vrot.lane.b32.xlu0 %v5404_v47, %s6364_s21 }
 0x3b0   : > { %4680 = vrot.lane.b32.xlu1 %v4674_v10, %s6364_s21  ;;  %4690 = vrot.lane.b32.xlu0 %v4674_v10, %s6368_s12 }
 0x3b4   : > { %4685 = vrot.lane.b32.xlu1 %v4674_v10, %s6367_s20  ;;  %3060 = vrot.lane.b32.xlu0 %v5900_v13, %s6365_s23  ;;  %v3458_v10 = vld [vmem:[%s6189_s10 + $0x18] sm:$0xff] }
 0x3b8   : > { %3058 = vrot.lane.b32.xlu1 %v5895_v16, %s6365_s23  ;;  %3238 = vrot.lane.b32.xlu0 %v5900_v13, %s6369_s24 }
 0x3bc   : > { %3236 = vrot.lane.b32.xlu1 %v5895_v16, %s6369_s24  ;;  %3326 = vperm.xlu0 %4512, %v3323_v63   ;;  %v4139_v63 = vpack.c.bf16 %v3458_v10, %v3457_v62 }
 0x3c0   : > { %1121 = vperm.xlu1 %4668, %v1118_v15   ;;  %3365 = vrot.lane.b32.xlu0 %v4764_v6, %s6338_s15  ;;  %v3459_v15 = vld [vmem:[%s6189_s10 + $0x20] sm:$0xff] }
 0x3c4   : > { %3351 = vrot.lane.b32.xlu1 %v4764_v6, %s6336_s22  ;;  %3393 = vrot.lane.b32.xlu0 %v4764_v6, %s6364_s21 }
 0x3c8   : > { %3379 = vrot.lane.b32.xlu1 %v4764_v6, %s6337_s19 }
 0x40f   : > { %v3034_v40 = vpop.permute.xlu0 %3033 }
 0x410   : > { %v3037_v30 = vsel %vm6439_vm2, %v3032_v18, %v3034_v40 }
 0x41a   : > { %v4676_v19 = vpop.permute.xlu1 %4675  ;;  %v4671_v20 = vpop.permute.xlu0 %4670 }
 0x41b   : > { %v4678_v54 = vunpack.i.h.bf16 %v4676_v19  ;;  %v4677_v22 = vunpack.i.l.bf16 %v4676_v19  ;;  %v4673_v28 = vunpack.i.h.bf16 %v4671_v20  ;;  %v4672_v55 = vunpack.i.l.bf16 %v4671_v20 }
 0x41d   : > { %v3025_v23 = vsel %vm6430_vm9, %v3020_v42, %v4677_v22  ;;  %v3026_v24 = vsel %vm6431_vm4, %v4677_v22, %v4678_v54  ;;  %v3013_v59 = vsel %vm6432_vm11, %v3008_v31, %v4672_v55  ;;  %v3014_v17 = vsel %vm6433_vm3, %v4672_v55, %v4673_v28  ;;  %v3460_v31 = vld [vmem:[%s6189_s10 + $0x28] sm:$0xff]  ;;  %v3461_v42 = vld [vmem:[%s6189_s10 + $0x30] sm:$0xff]  ;;  %v3463_v22 = vld [vmem:[%s6189_s10 + $0x40] sm:$0xff] }
 0x41e   : > { %v4123_v25 = vpack.c.bf16 %v3026_v24, %v3014_v17  ;;  %v4126_v1 = vpack.c.bf16 %v3025_v23, %v3013_v59  ;;  %v3036_v26 = vpop.permute.xlu1 %3035  ;;  %v3045_v53 = vpop.permute.xlu0 %3044  ;;  %vm6442_vm9 = vnez %v6385_v11  ;;  %vm6443_vm4 = vcmask 916480   ;;  %v3464_v28 = vld [vmem:[%s6189_s10 + $0x48] sm:$0xff] }
 0x41f   : > { %v3038_v34 = vsel %vm6438_vm8, %v3034_v40, %v3036_v26  ;;  %vm6444_vm11 = vcmask 924672   ;;  %vm6445_vm3 = vcmask 1039360   ;;  %v4142_v18 = vpack.c.bf16 %v3460_v31, %v3459_v15  ;;  %v3462_v40 = vld [vmem:[%s6189_s10 + $0x38] sm:$0xff] }
 0x420   : > { %4125 = vmatprep.subr.msk.bf16.mxu1 %vm5939_vm5, %v4123_v25  ;;  %v4145_v19 = vpack.c.bf16 %v3462_v40, %v3461_v42  ;;  %v4148_v23 = vpack.c.bf16 %v3464_v28, %v3463_v22  ;;  %v3466_v26 = vld [vmem:[%s6189_s10 + $0x58] sm:$0xff] }
 0x421   : > { %4128 = vmatpush1.bf16.msk.msra.mxu1 %vm5947_vm6, %v4126_v1  ;;  %v3465_v1 = vld [vmem:[%s6189_s10 + $0x50] sm:$0xff] }
 0x422   : > { %v4681_v60 = vpop.permute.xlu1 %4680  ;;  %v4691_v38 = vpop.permute.xlu0 %4690  ;;  %3856 = vmatprep.subr.msk.mxu1 %vm5716_vm1, %v3038_v34  ;;  %v4151_v34 = vpack.c.bf16 %v3466_v26, %v3465_v1 }
 0x423   : > { %v4683_v44 = vunpack.i.h.bf16 %v4681_v60  ;;  %v4682_v45 = vunpack.i.l.bf16 %v4681_v60  ;;  %v4693_v41 = vunpack.i.h.bf16 %v4691_v38  ;;  %v4692_v52 = vunpack.i.l.bf16 %v4691_v38 }
 0x425   : > { %v3050_v35 = vsel %vm6440_vm7, %v3045_v53, %v4682_v45  ;;  %v3051_v14 = vsel %vm6441_vm13, %v4682_v45, %v4683_v44  ;;  %3857 = vmatpush1.msk.msra.mxu1 %vm6442_vm9, %v3037_v30  ;;  %v3231_v2 = vsel %vm6443_vm4, %v4692_v52, %v4693_v41  ;;  %v3467_v45 = vld [vmem:[%s6189_s10 + $0x60] sm:$0xff]  ;;  %vm6447_vm7 = vcmask 523264  }
 0x426   : > { %v4117_v3 = vpack.c.bf16 %v5900_v13, %v3051_v14  ;;  %v4120_v48 = vpack.c.bf16 %v5895_v16, %v3050_v35  ;;  %v4686_v50 = vpop.permute.xlu1 %4685  ;;  %v3061_v4 = vpop.permute.xlu0 %3060  ;;  %3858 = vmatmul.mubr.msk.f32.vlgmr.msra.gmra.mrb[4].mxu1 %vm3069_vm15, %v3043_v21  ;;  %v3456_v16 = vld [vmem:[%s6189_s10 + $0x8] sm:$0xff]  ;;  %v4765_v13 = vmov 0.0|0.0   ;;  %vm6448_vm13 = vcmask 138240  }
 0x427   : > { %v4688_v8 = vunpack.i.h.bf16 %v4686_v50  ;;  %v4687_v43 = vunpack.i.l.bf16 %v4686_v50  ;;  %3314 = vmatprep.mubr.f32.mxu1 %v5404_v47  ;;  %v3844_v47 = vld [vmem:[%s6187_s8 + $0x8] sm:$0xff]  ;;  %v4136_v6 = vpack.c.bf16 %v3456_v16, %v3455_v9  ;;  %v3478_v9 = vld [vmem:[%s6189_s10 + $0xb8] sm:$0xff]  ;;  %vm6449_vm4 = vcmask 130048  }
 0x428   : > { %4119 = vmatprep.subr.msk.bf16.mxu0 %vm5939_vm5, %v4117_v3  ;;  %v3468_v21 = vld [vmem:[%s6189_s10 + $0x68] sm:$0xff] }
 0x429   : > { %v3222_v56 = vsel %vm6444_vm11, %v4687_v43, %v4688_v8  ;;  %v4129_v12 = vpack.c.bf16 %v4693_v41, %v4688_v8  ;;  %4122 = vmatpush1.bf16.msk.msra.mxu0 %vm5947_vm6, %v4120_v48  ;;  %v4154_v35 = vpack.c.bf16 %v3468_v21, %v3467_v45  ;;  %v3470_v8 = vld [vmem:[%s6189_s10 + $0x78] sm:$0xff]  ;;  %vm6450_vm11 = vcmask 121856  }
 0x42a   : > { %v4132_v32 = vpack.c.bf16 %v3231_v2, %v3222_v56  ;;  %v3059_v61 = vpop.permute.xlu1 %3058  ;;  %3849 = vmatprep.subr.msk.mxu0 %vm5716_vm1, %v3061_v4  ;;  %v3239_v39 = vpop.permute.xlu0 %3238  ;;  %v3471_v2 = vld [vmem:[%s6189_s10 + $0x80] sm:$0xff]  ;;  %v3472_v56 = vld [vmem:[%s6189_s10 + $0x88] sm:$0xff] }
 0x42b   : > { %v3062_v27 = vsel %vm6445_vm3, %v3059_v61, %v3061_v4  ;;  %4131 = vmatprep.subr.msk.bf16.mxu1 %vm5939_vm5, %v4129_v12  ;;  %vm6446_vm5 = vcmask 908288   ;;  %v3469_v4 = vld [vmem:[%s6189_s10 + $0x70] sm:$0xff]  ;;  %v4160_v12 = vpack.c.bf16 %v3472_v56, %v3471_v2  ;;  %v3474_v61 = vld [vmem:[%s6189_s10 + $0x98] sm:$0xff]  ;;  %vm6451_vm3 = vmmov %vm6448_vm13 }
 0x42c   : > { %4134 = vmatpush1.bf16.msk.msra.mxu1 %vm5947_vm6, %v4132_v32  ;;  %v4157_v43 = vpack.c.bf16 %v3470_v8, %v3469_v4  ;;  %v3473_v32 = vld [vmem:[%s6189_s10 + $0x90] sm:$0xff] }
 0x42d   : > { %3850 = vmatpush1.msk.msra.mxu0 %vm6442_vm9, %v3062_v27  ;;  %3864 = vmatprep.subr.msk.mxu1 %vm5716_vm1, %v3239_v39 }
 0x42e   : > { %v3237_v46 = vpop.permute.xlu1 %3236  ;;  %3851 = vmatmul.mubr.msk.f32.vlgmr.msra.gmra.mrb[4].mxu0 %vm3069_vm15, %v3844_v47  ;;  %4135 = vmatprep.subr.bf16.mxu0 %v4765_v13  ;;  %v4163_v47 = vpack.c.bf16 %v3474_v61, %v3473_v32 }
 0x42f   : > { %v3240_v57 = vsel %vm6446_vm5, %v3237_v46, %v3239_v39  ;;  %4137 = vmatpush1.bf16.msra.mxu0 %v4136_v6  ;;  %v3475_v39 = vld [vmem:[%s6189_s10 + $0xa0] sm:$0xff]  ;;  %v3476_v46 = vld [vmem:[%s6189_s10 + $0xa8] sm:$0xff]  ;;  %vm6452_vm5 = vmmov %vm6449_vm4 }
 0x430   : > { %3865 = vmatpush1.msk.msra.mxu1 %vm6442_vm9, %v3240_v57  ;;  %4138 = vmatprep.subr.bf16.mxu0 %v4765_v13  ;;  %v3477_v57 = vld [vmem:[%s6189_s10 + $0xb0] sm:$0xff] }
 0x431   : > { %3866 = vmatmul.mubr.msk.f32.vlgmr.msra.gmra.mrb[4].mxu1 %vm3069_vm15, %v3859_v51  ;;  %v4166_v51 = vpack.c.bf16 %v3476_v46, %v3475_v39  ;;  %v4169_v16 = vpack.c.bf16 %v3478_v9, %v3477_v57 }
 0x433   : > { %4140 = vmatpush1.bf16.msra.mxu0 %v4139_v63 }
 0x434   : > { %4141 = vmatprep.subr.bf16.mxu0 %v4765_v13 }
 0x437   : > { %4143 = vmatpush1.bf16.msra.mxu0 %v4142_v18 }
 0x438   : > { %4144 = vmatprep.subr.bf16.mxu0 %v4765_v13 }
 0x43b   : > { %4146 = vmatpush1.bf16.msra.mxu0 %v4145_v19  ;;  %v3327_v53 = vpop.permute.xlu0 %3326 }
 0x43c   : > { %4147 = vmatprep.subr.bf16.mxu0 %v4765_v13 }
 0x43f   : > { %v1122_v20 = vpop.permute.xlu1 %1121  ;;  %4149 = vmatpush1.bf16.msra.mxu0 %v4148_v23 }
 0x440   : > { %v1124_v24 = vadd.f32 %v5630_v29, %v1122_v20  ;;  %v1125_v59 = vadd.f32 %v5632_v36, %v1122_v20  ;;  %4150 = vmatprep.subr.bf16.mxu0 %v4765_v13 }
 0x442   : > { %v1128_v29 = vmul.f32 0.01, %v1124_v24  ;;  %vm1126_vm6 = vcmp.gt.f32.partialorder %v1124_v24, 0.0  ;;  %v1129_v36 = vmul.f32 0.01, %v1125_v59  ;;  %vm1127_vm8 = vcmp.gt.f32.partialorder %v1125_v59, 0.0 }
 0x443   : > { %4152 = vmatpush1.bf16.msra.mxu0 %v4151_v34  ;;  %v3352_v62 = vpop.permute.xlu1 %3351 }
 0x444   : > { %4153 = vmatprep.subr.bf16.mxu0 %v4765_v13  ;;  %v1130_v14 = vsel %vm1126_vm6, %v1124_v24, %v1128_v29  ;;  %v1131_v52 = vsel %vm1127_vm8, %v1125_v59, %v1129_v36  ;;  %vm6453_vm6 = vmmov %vm6450_vm11  ;;  %vm6454_vm8 = vcmask 7168  }
 0x447   : > { %4155 = vmatpush1.bf16.msra.mxu0 %v4154_v35  ;;  %v3380_v6 = vpop.permute.xlu1 %3379 }
 0x448   : > { %4156 = vmatprep.subr.bf16.mxu0 %v4765_v13 }
 0x44b   : > { %4158 = vmatpush1.bf16.msra.mxu0 %v4157_v43 }
 0x44c   : > { %4159 = vmatprep.subr.bf16.mxu0 %v4765_v13 }
 0x44f   : > { %4161 = vmatpush1.bf16.msra.mxu0 %v4160_v12 }
 0x450   : > { %4162 = vmatprep.subr.bf16.mxu0 %v4765_v13 }
 0x453   : > { %4164 = vmatpush1.bf16.msra.mxu0 %v4163_v47 }
 0x454   : > { %4165 = vmatprep.subr.bf16.mxu0 %v4765_v13 }
 0x457   : > { %4167 = vmatpush1.bf16.msra.mxu0 %v4166_v51 }
 0x458   : > { %4168 = vmatprep.subr.bf16.mxu0 %v4765_v13  ;;  %v3366_v13 = vpop.permute.xlu0 %3365 }
 0x45b   : > { %4170 = vmatpush1.bf16.msra.mxu0 %v4169_v16 }
 0x45c   : > { %v3394_v10 = vpop.permute.xlu0 %3393 }
 0x501   : > { %v3139_v54 = vpop.f32.mrb[4].mxu0 }
 0x502   : > { %v3141_v55 = vpop.f32.mrb[5].mxu0 }
 0x504   : > { %v3316_v17 = vpop.f32.mrb[4].mxu1 }
 0x505   : > { %v4173_v7 = vadd.f32 %v3316_v17, %v3139_v54  ;;  %v3318_v25 = vpop.f32.mrb[5].mxu1 }
 0x506   : > { %v4174_v0 = vadd.f32 %v3318_v25, %v3141_v55 }
 0x507   : > { %v3329_v60 = vadd.f32 %v4173_v7, %v3327_v53 }
 0x508   : > { %v3330_v38 = vadd.f32 %v4174_v0, %v3327_v53 }
 0x509   : > { %vm3331_vm15 = vcmp.gt.f32.partialorder %v3329_v60, 0.0  ;;  %v3333_v44 = vmul.f32 0.01, %v3329_v60 }
 0x50a   : > { %vm3332_vm2 = vcmp.gt.f32.partialorder %v3330_v38, 0.0  ;;  %v3334_v30 = vmul.f32 0.01, %v3330_v38 }
 0x50b   : > { %v3335_v41 = vsel %vm3331_vm15, %v3329_v60, %v3333_v44  ;;  %vm6455_vm15 = vmmov %vm6454_vm8 }
 0x50c   : > { %v6049_v3 = vadd.f32 %v3335_v41, %v1130_v14  ;;  %v3336_v48 = vsel %vm3332_vm2, %v3330_v38, %v3334_v30  ;;  %vm6456_vm2 = vcmask 1039360  }
 0x50d   : > { %v3338_v50 = vadd.f32 %v3336_v48, %v1131_v52 }
 0x50e   : > { %3367 = vrot.lane.b32.xlu0 %v6049_v3, %s6338_s15  ;;  %3353 = vrot.lane.b32.xlu1 %v6049_v3, %s6336_s22  ;;  %v3407_v56 = vsel %vm5745_vm10, %v6049_v3, -1e+09 }
 0x50f   : > { %3344 = vst.msk [vmem:[#allocation2 + $0x10] sm:$0xff] %vm6447_vm7, %v3338_v50  ;;  %vm6457_vm7 = vcmask 924672  }
 0x512   : > { %3395 = vrot.lane.b32.xlu0 %v6049_v3, %s6364_s21  ;;  %3381 = vrot.lane.b32.xlu1 %v6049_v3, %s6337_s19 }
 0x516   : > { %v6081_v27 = vld [vmem:[#allocation2 + $0x10] sm:$0xff]  ;;  %3411 = vrot.lane.b32.xlu1 %v6049_v3, %s6365_s23 }
 0x517   : > { %3355 = vrot.lane.b32.xlu0 %v6081_v27, %s6336_s22  ;;  %v3408_v48 = vsel %vm5741_vm14, %v6081_v27, -1e+09 }
 0x51a   : > { %3369 = vrot.lane.b32.xlu1 %v6081_v27, %s6338_s15 }
 0x51b   : > { %3383 = vrot.lane.b32.xlu0 %v6081_v27, %s6337_s19  ;;  %s3614_s19 = sshll.u32 %s6462_s18, 3 }
 0x51e   : > { %3397 = vrot.lane.b32.xlu1 %v6081_v27, %s6364_s21 }
 0x51f   : > { %3413 = vrot.lane.b32.xlu0 %v6081_v27, %s6365_s23  ;;  %s384_s23 = scalar_lea.vmem %s6190_s11, %s3614_s19 }
 0x522   : > { %3422 = vrot.lane.b32.xlu1 %v6049_v3, %s6367_s20 }
 0x523   : > { %3424 = vrot.lane.b32.xlu0 %v6081_v27, %s6367_s20 }
 0x526   : > { %3433 = vrot.lane.b32.xlu1 %v6049_v3, %s6368_s12 }
 0x527   : > { %3435 = vrot.lane.b32.xlu0 %v6081_v27, %s6368_s12 }
 0x52a   : > { %3444 = vrot.lane.b32.xlu1 %v6049_v3, %s6369_s24 }
 0x52b   : > { %3446 = vrot.lane.b32.xlu0 %v6081_v27, %s6369_s24 }
 0x580   : > { %v3368_v63 = vpop.permute.xlu0 %3367  ;;  %v3354_v15 = vpop.permute.xlu1 %3353 }
 0x581   : > { %v3357_v31 = vsel %vm6448_vm13, %v3352_v62, %v3354_v15  ;;  %v3371_v19 = vsel %vm6449_vm4, %v3366_v13, %v3368_v63  ;;  %vm6458_vm13 = vcmask 916480  }
 0x582   : > { %v3361_v40 = vsel %vm5706_vm0, %v3357_v31, -1e+09  ;;  %v3375_v23 = vsel %vm5745_vm10, %v3371_v19, -1e+09 }
 0x583   : > { %v3363_v20 = vmax.f32 %v3361_v40, -1e+09 }
 0x584   : > { %v3396_v18 = vpop.permute.xlu0 %3395  ;;  %v3382_v42 = vpop.permute.xlu1 %3381 }
 0x585   : > { %v3385_v28 = vsel %vm6450_vm11, %v3380_v6, %v3382_v42  ;;  %v3377_v59 = vmax.f32 %v3363_v20, %v3375_v23  ;;  %v3399_v60 = vsel %vm6454_vm8, %v3394_v10, %v3396_v18 }
 0x586   : > { %v3389_v25 = vsel %vm6442_vm9, %v3385_v28, -1e+09  ;;  %v3403_v35 = vsel %vm5706_vm0, %v3399_v60, -1e+09 }
 0x587   : > { %v3391_v36 = vmax.f32 %v3377_v59, %v3389_v25 }
 0x588   : > { %v3412_v54 = vpop.permute.xlu1 %3411 }
 0x589   : > { %v3356_v22 = vpop.permute.xlu0 %3355  ;;  %v3405_v41 = vmax.f32 %v3391_v36, %v3403_v35 }
 0x58a   : > { %v3358_v55 = vsel %vm6451_vm3, %v3354_v15, %v3356_v22 }
 0x58b   : > { %v3362_v24 = vsel %vm5696_vm12, %v3358_v55, -1e+09  ;;  %v3409_v61 = vmax.f32 %v3405_v41, %v3407_v56 }
 0x58c   : > { %v3364_v17 = vmax.f32 %v3362_v24, -1e+09  ;;  %v3370_v7 = vpop.permute.xlu1 %3369 }
 0x58d   : > { %v3384_v1 = vpop.permute.xlu0 %3383  ;;  %v3372_v26 = vsel %vm6452_vm5, %v3368_v63, %v3370_v7 }
 0x58e   : > { %v3386_v53 = vsel %vm6453_vm6, %v3382_v42, %v3384_v1  ;;  %v3376_v0 = vsel %vm5741_vm14, %v3372_v26, -1e+09 }
 0x58f   : > { %v3390_v34 = vsel %vm5716_vm1, %v3386_v53, -1e+09  ;;  %v3378_v29 = vmax.f32 %v3364_v17, %v3376_v0 }
 0x590   : > { %v3398_v38 = vpop.permute.xlu1 %3397 }
 0x591   : > { %v3414_v44 = vpop.permute.xlu0 %3413  ;;  %v3392_v45 = vmax.f32 %v3378_v29, %v3390_v34  ;;  %v3400_v21 = vsel %vm6455_vm15, %v3396_v18, %v3398_v38 }
 0x592   : > { %v3404_v30 = vsel %vm5696_vm12, %v3400_v21, -1e+09  ;;  %v3415_v52 = vsel %vm6456_vm2, %v3412_v54, %v3414_v44  ;;  %v3419_v43 = vsel %vm5716_vm1, %v3414_v44, -1e+09 }
 0x593   : > { %v3406_v14 = vmax.f32 %v3392_v45, %v3404_v30  ;;  %v3418_v12 = vsel %vm6442_vm9, %v3415_v52, -1e+09 }
 0x594   : > { %v3423_v50 = vpop.permute.xlu1 %3422  ;;  %v3420_v57 = vmax.f32 %v3409_v61, %v3418_v12 }
 0x595   : > { %v3410_v4 = vmax.f32 %v3406_v14, %v3408_v48  ;;  %v3425_v8 = vpop.permute.xlu0 %3424 }
 0x596   : > { %v3426_v2 = vsel %vm6457_vm7, %v3423_v50, %v3425_v8  ;;  %v3430_v27 = vsel %vm5696_vm12, %v3425_v8, -1e+09  ;;  %vm6459_vm12 = vcmask 908288  }
 0x597   : > { %v3421_v32 = vmax.f32 %v3410_v4, %v3419_v43  ;;  %v3429_v46 = vsel %vm5706_vm0, %v3426_v2, -1e+09  ;;  %vm6460_vm0 = vcmask 523264  }
 0x598   : > { %v3434_v47 = vpop.permute.xlu1 %3433  ;;  %v3431_v62 = vmax.f32 %v3420_v57, %v3429_v46 }
 0x599   : > { %v3432_v39 = vmax.f32 %v3421_v32, %v3430_v27  ;;  %v3436_v51 = vpop.permute.xlu0 %3435 }
 0x59a   : > { %v3441_v9 = vsel %vm5741_vm14, %v3436_v51, -1e+09  ;;  %v3437_v3 = vsel %vm6458_vm13, %v3434_v47, %v3436_v51  ;;  %vm3552_vm14 = vcmask 293888  }
 0x59b   : > { %v3440_v16 = vsel %vm5745_vm10, %v3437_v3, -1e+09  ;;  %v3443_v58 = vmax.f32 %v3432_v39, %v3441_v9 }
 0x59c   : > { %v3445_v13 = vpop.permute.xlu1 %3444  ;;  %v3442_v10 = vmax.f32 %v3431_v62, %v3440_v16 }
 0x59d   : > { %v3447_v6 = vpop.permute.xlu0 %3446 }
 0x59e   : > { %v3452_v49 = vsel %vm5716_vm1, %v3447_v6, -1e+09  ;;  %v3448_v63 = vsel %vm6459_vm12, %v3445_v13, %v3447_v6 }
 0x59f   : > { %v3454_v15 = vmax.f32 %v3443_v58, %v3452_v49  ;;  %v3451_v5 = vsel %vm6442_vm9, %v3448_v63, -1e+09 }
 0x5a0   : > { %v3453_v31 = vmax.f32 %v3442_v10, %v3451_v5 }
 0x5a1   : > { %3867 = vmatprep.mubr.msk.f32.mxu0 %vm6460_vm0, %v3454_v15 }
 0x5a2   : > { %3547 = vmatmul.mubr.f32.vlgmr.msra.gmra.mrb[6].mxu0 %v3453_v31 }
 0x675   : > { %v3548_v37 = vpop.f32.mrb[6].mxu0 }
 0x676   : > { %3553 = vst.msk [vmem:[%s384_s23] sm:$0xff] %vm3552_vm14, %v3548_v37  ;;  %v3550_v33 = vpop.f32.mrb[7].mxu0 }
 0x677 PF: > { %s21_s17 = sadd.s32 1, %s4703_s17  }
 0x678   : > { %p18_p4 = scmp.ge.s32.totalorder %s21_s17, 4  }
 0x67a   :  { %20 = sbr.rel (!%p18_p4) target bundleno = 1 (0x1), region = 110 }

</bundles_post_ra>
